<compile_context>
chip_gen: v7x
topology: tpu7x:2x2x1
jax: 0.10.0
libtpu: 0.0.40
codegen_flags: <defaults>
</compile_context>

<pallas_src>
import functools

import jax
import jax.numpy as jnp
from jax.experimental import pallas as pl
from jax.experimental.pallas import tpu as pltpu


# ----------------------------- helpers ------------------------------------ #

def build_2d_sincos_pos_embed(w, h, embed_dim, temperature=10000.0):
    """Matches AIFI.build_2d_sincos_position_embedding (returns (w*h, embed_dim))."""
    assert embed_dim % 4 == 0
    grid_w = jnp.arange(w, dtype=jnp.float32)
    grid_h = jnp.arange(h, dtype=jnp.float32)
    gw, gh = jnp.meshgrid(grid_w, grid_h, indexing="ij")   # (w, h)
    pos_dim = embed_dim // 4
    omega = jnp.arange(pos_dim, dtype=jnp.float32) / pos_dim
    omega = 1.0 / (temperature ** omega)
    out_w = gw.reshape(-1)[:, None] * omega[None, :]       # (w*h, pos_dim)
    out_h = gh.reshape(-1)[:, None] * omega[None, :]
    return jnp.concatenate(
        [jnp.sin(out_w), jnp.cos(out_w), jnp.sin(out_h), jnp.cos(out_h)], axis=1
    )


def _erf_poly(z):
    """Abramowitz & Stegun 7.1.26 erf approximation, |err| < 1.5e-7."""
    az = jnp.abs(z)
    t = 1.0 / (1.0 + 0.3275911 * az)
    poly = t * (0.254829592 + t * (-0.284496736 + t * (1.421413741
                + t * (-1.453152027 + t * 1.061405429))))
    erf_abs = 1.0 - poly * jnp.exp(-az * az)
    return jnp.where(z < 0, -erf_abs, erf_abs)


def _gelu_exact(x):
    """Exact (erf-based) GELU matching torch.nn.GELU(), via polynomial erf."""
    return 0.5 * x * (1.0 + _erf_poly(x * 0.7071067811865476))


def _layer_norm(x, gamma, beta, eps):
    mu = jnp.mean(x, axis=-1, keepdims=True)
    xc = x - mu
    var = jnp.mean(xc * xc, axis=-1, keepdims=True)
    return xc * jax.lax.rsqrt(var + eps) * gamma + beta


# ----------------------------- Pallas kernel ------------------------------- #

def _aifi_encoder_kernel(src_ref, pos_ref,
                         wq_ref, wk_ref, wv_ref, bq_ref, bk_ref, bv_ref,
                         wo_ref, bo_ref,
                         g1_ref, be1_ref, g2_ref, be2_ref,
                         w1_ref, b1_ref, w2_ref, b2_ref,
                         o_ref, *, num_heads, eps):
    src = src_ref[0]                       # (S, C)
    pos = pos_ref[...]                     # (S, C)
    S, C = src.shape
    dh = C // num_heads
    scale = 1.0 / (dh ** 0.5)

    qk_in = src + pos
    q = jnp.dot(qk_in, wq_ref[...], preferred_element_type=jnp.float32) + bq_ref[...]
    k = jnp.dot(qk_in, wk_ref[...], preferred_element_type=jnp.float32) + bk_ref[...]
    v = jnp.dot(src,   wv_ref[...], preferred_element_type=jnp.float32) + bv_ref[...]

    wo = wo_ref[...]                       # (C, C)
    attn = jnp.zeros((S, C), dtype=jnp.float32)
    for h in range(num_heads):             # static unroll over heads
        lo, hi = h * dh, (h + 1) * dh
        qh = q[:, lo:hi] * scale           # (S, dh)
        kh = k[:, lo:hi]
        vh = v[:, lo:hi]
        # scores = qh @ kh^T   (contract head dim of both, no explicit transpose)
        s = jax.lax.dot_general(qh, kh, (((1,), (1,)), ((), ())),
                                preferred_element_type=jnp.float32)
        s = s - jnp.max(s, axis=-1, keepdims=True)
        p = jnp.exp(s)
        p = p / jnp.sum(p, axis=-1, keepdims=True)
        ctx_h = jnp.dot(p, vh, preferred_element_type=jnp.float32)        # (S, dh)
        # accumulate this head's contribution to the out-projection directly
        attn = attn + jnp.dot(ctx_h, wo[lo:hi, :],
                              preferred_element_type=jnp.float32)
    attn = attn + bo_ref[...]

    # residual + LayerNorm1
    x1 = _layer_norm(src + attn, g1_ref[...], be1_ref[...], eps)

    # feed-forward: fc1 -> GELU -> fc2, residual + LayerNorm2
    h1 = jnp.dot(x1, w1_ref[...], preferred_element_type=jnp.float32) + b1_ref[...]
    h1 = _gelu_exact(h1)
    h2 = jnp.dot(h1, w2_ref[...], preferred_element_type=jnp.float32) + b2_ref[...]
    x2 = _layer_norm(x1 + h2, g2_ref[...], be2_ref[...], eps)

    o_ref[0] = x2.astype(o_ref.dtype)


# ----------------------------- wrapper ------------------------------------- #

def aifi_forward(x, *, num_heads,
                 in_proj_w, in_proj_b, out_proj_w, out_proj_b,
                 ln1_g, ln1_b, ln2_g, ln2_b,
                 fc1_w, fc1_b, fc2_w, fc2_b, eps=1e-5):
    """x: (N, C, H, W) float32; weights in PyTorch layout. Returns (N, C, H, W)."""
    B, C, H, W = x.shape
    S = H * W
    cm = fc1_w.shape[0]
    assert C % num_heads == 0 and C % 4 == 0

    # positional embedding (tiny, wrapper glue)
    pos = build_2d_sincos_pos_embed(W, H, C).astype(x.dtype)        # (S, C)

    # NCHW -> (B, S, C)
    src = jnp.transpose(x.reshape(B, C, S), (0, 2, 1))

    # torch Linear layout (out, in) -> matmul layout (in, out)
    wq = in_proj_w[:C].T
    wk = in_proj_w[C:2 * C].T
    wv = in_proj_w[2 * C:].T
    bq = in_proj_b[:C].reshape(1, C)
    bk = in_proj_b[C:2 * C].reshape(1, C)
    bv = in_proj_b[2 * C:].reshape(1, C)
    wo = out_proj_w.T
    bo = out_proj_b.reshape(1, C)
    w1 = fc1_w.T                       # (C, cm)
    b1 = fc1_b.reshape(1, cm)
    w2 = fc2_w.T                       # (cm, C)
    b2 = fc2_b.reshape(1, C)
    g1 = ln1_g.reshape(1, C); be1 = ln1_b.reshape(1, C)
    g2 = ln2_g.reshape(1, C); be2 = ln2_b.reshape(1, C)

    kernel = functools.partial(_aifi_encoder_kernel, num_heads=num_heads, eps=eps)

    full = lambda b: (0, 0)
    out = pl.pallas_call(
        kernel,
        out_shape=jax.ShapeDtypeStruct((B, S, C), x.dtype),
        grid_spec=pltpu.PrefetchScalarGridSpec(
            num_scalar_prefetch=0,
            grid=(B,),
            in_specs=[
                pl.BlockSpec((1, S, C), lambda b: (b, 0, 0)),   # src (per batch)
                pl.BlockSpec((S, C), full),                     # pos (resident)
                pl.BlockSpec((C, C), full),                     # wq
                pl.BlockSpec((C, C), full),                     # wk
                pl.BlockSpec((C, C), full),                     # wv
                pl.BlockSpec((1, C), full),                     # bq
                pl.BlockSpec((1, C), full),                     # bk
                pl.BlockSpec((1, C), full),                     # bv
                pl.BlockSpec((C, C), full),                     # wo
                pl.BlockSpec((1, C), full),                     # bo
                pl.BlockSpec((1, C), full),                     # ln1 gamma
                pl.BlockSpec((1, C), full),                     # ln1 beta
                pl.BlockSpec((1, C), full),                     # ln2 gamma
                pl.BlockSpec((1, C), full),                     # ln2 beta
                pl.BlockSpec((C, cm), full),                    # fc1 weight
                pl.BlockSpec((1, cm), full),                    # fc1 bias
                pl.BlockSpec((cm, C), full),                    # fc2 weight
                pl.BlockSpec((1, C), full),                     # fc2 bias
            ],
            out_specs=pl.BlockSpec((1, S, C), lambda b: (b, 0, 0)),
        ),
        compiler_params=pltpu.CompilerParams(
            dimension_semantics=("parallel",)),
    )(src, pos, wq, wk, wv, bq, bk, bv, wo, bo,
      g1, be1, g2, be2, w1, b1, w2, b2)

    # (B, S, C) -> (B, C, H, W)
    return jnp.transpose(out, (0, 2, 1)).reshape(B, C, H, W)


# ----------------------------- pure-JAX reference -------------------------- #

def _aifi_reference(x, *, num_heads,
                    in_proj_w, in_proj_b, out_proj_w, out_proj_b,
                    ln1_g, ln1_b, ln2_g, ln2_b,
                    fc1_w, fc1_b, fc2_w, fc2_b, eps=1e-5):
    B, C, H, W = x.shape
    S = H * W
    dh = C // num_heads
    pos = build_2d_sincos_pos_embed(W, H, C)[None]                  # (1, S, C)
    src = jnp.transpose(x.reshape(B, C, S), (0, 2, 1))

    qk = src + pos
    q = qk @ in_proj_w[:C].T + in_proj_b[:C]
    k = qk @ in_proj_w[C:2 * C].T + in_proj_b[C:2 * C]
    v = src @ in_proj_w[2 * C:].T + in_proj_b[2 * C:]

    def split(t):
        return t.reshape(B, S, num_heads, dh).transpose(0, 2, 1, 3)

    qh, kh, vh = split(q), split(k), split(v)
    scores = jnp.einsum("bhqd,bhkd->bhqk", qh, kh) / jnp.sqrt(jnp.float32(dh))
    probs = jax.nn.softmax(scores, axis=-1)
    ctx = jnp.einsum("bhqk,bhkd->bhqd", probs, vh)
    ctx = ctx.transpose(0, 2, 1, 3).reshape(B, S, C)
    attn = ctx @ out_proj_w.T + out_proj_b

    def ln(t, g, b):
        mu = jnp.mean(t, axis=-1, keepdims=True)
        var = jnp.mean((t - mu) ** 2, axis=-1, keepdims=True)
        return (t - mu) / jnp.sqrt(var + eps) * g + b

    x1 = ln(src + attn, ln1_g, ln1_b)
    h1 = jax.nn.gelu(x1 @ fc1_w.T + fc1_b, approximate=False)
    h2 = h1 @ fc2_w.T + fc2_b
    x2 = ln(x1 + h2, ln2_g, ln2_b)
    return jnp.transpose(x2, (0, 2, 1)).reshape(B, C, H, W)


# ----------------------------- demo / test --------------------------------- #

if __name__ == "__main__":
    key = jax.random.PRNGKey(0)
    ks = jax.random.split(key, 16)

    B, C, H, W = 2, 32, 8, 8          # c1=32, S=64
    num_heads, cm = 4, 64             # head_dim=8

    x = jax.random.normal(ks[0], (B, C, H, W), dtype=jnp.float32)

    params = dict(
        num_heads=num_heads,
        in_proj_w=0.1 * jax.random.normal(ks[1], (3 * C, C), dtype=jnp.float32),
        in_proj_b=0.05 * jax.random.normal(ks[2], (3 * C,), dtype=jnp.float32),
        out_proj_w=0.1 * jax.random.normal(ks[3], (C, C), dtype=jnp.float32),
        out_proj_b=0.05 * jax.random.normal(ks[4], (C,), dtype=jnp.float32),
        ln1_g=1.0 + 0.1 * jax.random.normal(ks[5], (C,), dtype=jnp.float32),
        ln1_b=0.05 * jax.random.normal(ks[6], (C,), dtype=jnp.float32),
        ln2_g=1.0 + 0.1 * jax.random.normal(ks[7], (C,), dtype=jnp.float32),
        ln2_b=0.05 * jax.random.normal(ks[8], (C,), dtype=jnp.float32),
        fc1_w=0.1 * jax.random.normal(ks[9], (cm, C), dtype=jnp.float32),
        fc1_b=0.05 * jax.random.normal(ks[10], (cm,), dtype=jnp.float32),
        fc2_w=0.1 * jax.random.normal(ks[11], (C, cm), dtype=jnp.float32),
        fc2_b=0.05 * jax.random.normal(ks[12], (C,), dtype=jnp.float32),
    )

    out = aifi_forward(x, **params)
    out = jax.block_until_ready(out)

    ref = _aifi_reference(x, **params)
    assert out.shape == (B, C, H, W)
    assert jnp.allclose(out, ref, atol=1e-4, rtol=1e-4), (
        "mismatch vs reference: max abs err = "
        f"{float(jnp.max(jnp.abs(out - ref)))}")

    print("KERNEL_OK")
</pallas_src>

<mosaic_0001>
module attributes {stable_mosaic.version = 11 : i64} {
  func.func @_aifi_encoder_kernel(%arg0: i32, %arg1: memref<1x64x32xf32, #tpu.memory_space<vmem>>, %arg2: memref<64x32xf32, #tpu.memory_space<vmem>>, %arg3: memref<32x32xf32, #tpu.memory_space<vmem>>, %arg4: memref<32x32xf32, #tpu.memory_space<vmem>>, %arg5: memref<32x32xf32, #tpu.memory_space<vmem>>, %arg6: memref<1x32xf32, #tpu.memory_space<vmem>>, %arg7: memref<1x32xf32, #tpu.memory_space<vmem>>, %arg8: memref<1x32xf32, #tpu.memory_space<vmem>>, %arg9: memref<32x32xf32, #tpu.memory_space<vmem>>, %arg10: memref<1x32xf32, #tpu.memory_space<vmem>>, %arg11: memref<1x32xf32, #tpu.memory_space<vmem>>, %arg12: memref<1x32xf32, #tpu.memory_space<vmem>>, %arg13: memref<1x32xf32, #tpu.memory_space<vmem>>, %arg14: memref<1x32xf32, #tpu.memory_space<vmem>>, %arg15: memref<32x64xf32, #tpu.memory_space<vmem>>, %arg16: memref<1x64xf32, #tpu.memory_space<vmem>>, %arg17: memref<64x32xf32, #tpu.memory_space<vmem>>, %arg18: memref<1x32xf32, #tpu.memory_space<vmem>>, %arg19: memref<1x64x32xf32, #tpu.memory_space<vmem>>) attributes {dimension_semantics = [#tpu.dimension_semantics<parallel>], iteration_bounds = array<i64: 2>, scalar_prefetch = 0 : i64, scratch_operands = 0 : i64, tpu.core_type = #tpu.core_type<tc>, window_params = [{transform_indices = @transform_0, window_bounds = array<i64: 1, 64, 32>}, {pipeline_mode = #tpu.pipeline_mode<synchronous>, transform_indices = @transform_1, window_bounds = array<i64: 64, 32>}, {pipeline_mode = #tpu.pipeline_mode<synchronous>, transform_indices = @transform_2, window_bounds = array<i64: 32, 32>}, {pipeline_mode = #tpu.pipeline_mode<synchronous>, transform_indices = @transform_3, window_bounds = array<i64: 32, 32>}, {pipeline_mode = #tpu.pipeline_mode<synchronous>, transform_indices = @transform_4, window_bounds = array<i64: 32, 32>}, {pipeline_mode = #tpu.pipeline_mode<synchronous>, transform_indices = @transform_5, window_bounds = array<i64: 1, 32>}, {pipeline_mode = #tpu.pipeline_mode<synchronous>, transform_indices = @transform_6, window_bounds = array<i64: 1, 32>}, {pipeline_mode = #tpu.pipeline_mode<synchronous>, transform_indices = @transform_7, window_bounds = array<i64: 1, 32>}, {pipeline_mode = #tpu.pipeline_mode<synchronous>, transform_indices = @transform_8, window_bounds = array<i64: 32, 32>}, {pipeline_mode = #tpu.pipeline_mode<synchronous>, transform_indices = @transform_9, window_bounds = array<i64: 1, 32>}, {pipeline_mode = #tpu.pipeline_mode<synchronous>, transform_indices = @transform_10, window_bounds = array<i64: 1, 32>}, {pipeline_mode = #tpu.pipeline_mode<synchronous>, transform_indices = @transform_11, window_bounds = array<i64: 1, 32>}, {pipeline_mode = #tpu.pipeline_mode<synchronous>, transform_indices = @transform_12, window_bounds = array<i64: 1, 32>}, {pipeline_mode = #tpu.pipeline_mode<synchronous>, transform_indices = @transform_13, window_bounds = array<i64: 1, 32>}, {pipeline_mode = #tpu.pipeline_mode<synchronous>, transform_indices = @transform_14, window_bounds = array<i64: 32, 64>}, {pipeline_mode = #tpu.pipeline_mode<synchronous>, transform_indices = @transform_15, window_bounds = array<i64: 1, 64>}, {pipeline_mode = #tpu.pipeline_mode<synchronous>, transform_indices = @transform_16, window_bounds = array<i64: 64, 32>}, {pipeline_mode = #tpu.pipeline_mode<synchronous>, transform_indices = @transform_17, window_bounds = array<i64: 1, 32>}, {transform_indices = @transform_18, window_bounds = array<i64: 1, 64, 32>}]} {
    %c0 = arith.constant 0 : index
    %c0_0 = arith.constant 0 : index
    %c0_1 = arith.constant 0 : index
    %0 = vector.load %arg1[%c0, %c0_0, %c0_1] : memref<1x64x32xf32, #tpu.memory_space<vmem>>, vector<1x64x32xf32>
    %1 = vector.shape_cast %0 : vector<1x64x32xf32> to vector<64x32xf32>
    %c0_2 = arith.constant 0 : index
    %c0_3 = arith.constant 0 : index
    %2 = vector.load %arg2[%c0_2, %c0_3] : memref<64x32xf32, #tpu.memory_space<vmem>>, vector<64x32xf32>
    %3 = arith.addf %1, %2 : vector<64x32xf32>
    %c0_4 = arith.constant 0 : index
    %c0_5 = arith.constant 0 : index
    %4 = vector.load %arg3[%c0_4, %c0_5] : memref<32x32xf32, #tpu.memory_space<vmem>>, vector<32x32xf32>
    %cst = arith.constant dense<0.000000e+00> : vector<64x32xf32>
    %5 = tpu.matmul %3, %4, %cst {dimension_numbers = #tpu.dot_dimension_numbers<[1], [0], [0], [1], [0, 0, 1, 1], [], []>} : vector<64x32xf32>, vector<32x32xf32>, vector<64x32xf32> -> vector<64x32xf32>
    %c0_6 = arith.constant 0 : index
    %c0_7 = arith.constant 0 : index
    %6 = vector.load %arg6[%c0_6, %c0_7] : memref<1x32xf32, #tpu.memory_space<vmem>>, vector<1x32xf32>
    %7 = vector.broadcast %6 : vector<1x32xf32> to vector<64x32xf32>
    %8 = arith.addf %5, %7 : vector<64x32xf32>
    %c0_8 = arith.constant 0 : index
    %c0_9 = arith.constant 0 : index
    %9 = vector.load %arg4[%c0_8, %c0_9] : memref<32x32xf32, #tpu.memory_space<vmem>>, vector<32x32xf32>
    %cst_10 = arith.constant dense<0.000000e+00> : vector<64x32xf32>
    %10 = tpu.matmul %3, %9, %cst_10 {dimension_numbers = #tpu.dot_dimension_numbers<[1], [0], [0], [1], [0, 0, 1, 1], [], []>} : vector<64x32xf32>, vector<32x32xf32>, vector<64x32xf32> -> vector<64x32xf32>
    %c0_11 = arith.constant 0 : index
    %c0_12 = arith.constant 0 : index
    %11 = vector.load %arg7[%c0_11, %c0_12] : memref<1x32xf32, #tpu.memory_space<vmem>>, vector<1x32xf32>
    %12 = vector.broadcast %11 : vector<1x32xf32> to vector<64x32xf32>
    %13 = arith.addf %10, %12 : vector<64x32xf32>
    %c0_13 = arith.constant 0 : index
    %c0_14 = arith.constant 0 : index
    %14 = vector.load %arg5[%c0_13, %c0_14] : memref<32x32xf32, #tpu.memory_space<vmem>>, vector<32x32xf32>
    %cst_15 = arith.constant dense<0.000000e+00> : vector<64x32xf32>
    %15 = tpu.matmul %1, %14, %cst_15 {dimension_numbers = #tpu.dot_dimension_numbers<[1], [0], [0], [1], [0, 0, 1, 1], [], []>} : vector<64x32xf32>, vector<32x32xf32>, vector<64x32xf32> -> vector<64x32xf32>
    %c0_16 = arith.constant 0 : index
    %c0_17 = arith.constant 0 : index
    %16 = vector.load %arg8[%c0_16, %c0_17] : memref<1x32xf32, #tpu.memory_space<vmem>>, vector<1x32xf32>
    %17 = vector.broadcast %16 : vector<1x32xf32> to vector<64x32xf32>
    %18 = arith.addf %15, %17 : vector<64x32xf32>
    %c0_18 = arith.constant 0 : index
    %c0_19 = arith.constant 0 : index
    %19 = vector.load %arg9[%c0_18, %c0_19] : memref<32x32xf32, #tpu.memory_space<vmem>>, vector<32x32xf32>
    %cst_20 = arith.constant 0.000000e+00 : f32
    %20 = vector.broadcast %cst_20 : f32 to vector<64x32xf32>
    %21 = vector.extract_strided_slice %8 {offsets = [0, 0], sizes = [64, 8], strides = [1, 1]} : vector<64x32xf32> to vector<64x8xf32>
    %cst_21 = arith.constant 0.353553385 : f32
    %22 = vector.broadcast %cst_21 : f32 to vector<64x8xf32>
    %23 = arith.mulf %21, %22 : vector<64x8xf32>
    %24 = vector.extract_strided_slice %13 {offsets = [0, 0], sizes = [64, 8], strides = [1, 1]} : vector<64x32xf32> to vector<64x8xf32>
    %25 = vector.extract_strided_slice %18 {offsets = [0, 0], sizes = [64, 8], strides = [1, 1]} : vector<64x32xf32> to vector<64x8xf32>
    %cst_22 = arith.constant dense<0.000000e+00> : vector<64x64xf32>
    %26 = tpu.matmul %23, %24, %cst_22 {dimension_numbers = #tpu.dot_dimension_numbers<[1], [1], [0], [0], [0, 0, 1, 0], [], []>} : vector<64x8xf32>, vector<64x8xf32>, vector<64x64xf32> -> vector<64x64xf32>
    %cst_23 = arith.constant dense<0xFF800000> : vector<64xf32>
    %27 = vector.multi_reduction <maximumf>, %26, %cst_23 [1] : vector<64x64xf32> to vector<64xf32>
    %28 = vector.shape_cast %27 : vector<64xf32> to vector<64x1xf32>
    %29 = vector.broadcast %28 : vector<64x1xf32> to vector<64x64xf32>
    %30 = arith.subf %26, %29 : vector<64x64xf32>
    %31 = math.exp %30 : vector<64x64xf32>
    %cst_24 = arith.constant dense<0.000000e+00> : vector<64xf32>
    %32 = vector.multi_reduction <add>, %31, %cst_24 [1] : vector<64x64xf32> to vector<64xf32>
    %33 = vector.shape_cast %32 : vector<64xf32> to vector<64x1xf32>
    %34 = vector.broadcast %33 : vector<64x1xf32> to vector<64x64xf32>
    %35 = arith.divf %31, %34 : vector<64x64xf32>
    %cst_25 = arith.constant dense<0.000000e+00> : vector<64x8xf32>
    %36 = tpu.matmul %35, %25, %cst_25 {dimension_numbers = #tpu.dot_dimension_numbers<[1], [0], [0], [1], [0, 0, 1, 1], [], []>} : vector<64x64xf32>, vector<64x8xf32>, vector<64x8xf32> -> vector<64x8xf32>
    %37 = vector.extract_strided_slice %19 {offsets = [0, 0], sizes = [8, 32], strides = [1, 1]} : vector<32x32xf32> to vector<8x32xf32>
    %cst_26 = arith.constant dense<0.000000e+00> : vector<64x32xf32>
    %38 = tpu.matmul %36, %37, %cst_26 {dimension_numbers = #tpu.dot_dimension_numbers<[1], [0], [0], [1], [0, 0, 1, 1], [], []>} : vector<64x8xf32>, vector<8x32xf32>, vector<64x32xf32> -> vector<64x32xf32>
    %39 = arith.addf %20, %38 : vector<64x32xf32>
    %40 = vector.extract_strided_slice %8 {offsets = [0, 8], sizes = [64, 8], strides = [1, 1]} : vector<64x32xf32> to vector<64x8xf32>
    %cst_27 = arith.constant 0.353553385 : f32
    %41 = vector.broadcast %cst_27 : f32 to vector<64x8xf32>
    %42 = arith.mulf %40, %41 : vector<64x8xf32>
    %43 = vector.extract_strided_slice %13 {offsets = [0, 8], sizes = [64, 8], strides = [1, 1]} : vector<64x32xf32> to vector<64x8xf32>
    %44 = vector.extract_strided_slice %18 {offsets = [0, 8], sizes = [64, 8], strides = [1, 1]} : vector<64x32xf32> to vector<64x8xf32>
    %cst_28 = arith.constant dense<0.000000e+00> : vector<64x64xf32>
    %45 = tpu.matmul %42, %43, %cst_28 {dimension_numbers = #tpu.dot_dimension_numbers<[1], [1], [0], [0], [0, 0, 1, 0], [], []>} : vector<64x8xf32>, vector<64x8xf32>, vector<64x64xf32> -> vector<64x64xf32>
    %cst_29 = arith.constant dense<0xFF800000> : vector<64xf32>
    %46 = vector.multi_reduction <maximumf>, %45, %cst_29 [1] : vector<64x64xf32> to vector<64xf32>
    %47 = vector.shape_cast %46 : vector<64xf32> to vector<64x1xf32>
    %48 = vector.broadcast %47 : vector<64x1xf32> to vector<64x64xf32>
    %49 = arith.subf %45, %48 : vector<64x64xf32>
    %50 = math.exp %49 : vector<64x64xf32>
    %cst_30 = arith.constant dense<0.000000e+00> : vector<64xf32>
    %51 = vector.multi_reduction <add>, %50, %cst_30 [1] : vector<64x64xf32> to vector<64xf32>
    %52 = vector.shape_cast %51 : vector<64xf32> to vector<64x1xf32>
    %53 = vector.broadcast %52 : vector<64x1xf32> to vector<64x64xf32>
    %54 = arith.divf %50, %53 : vector<64x64xf32>
    %cst_31 = arith.constant dense<0.000000e+00> : vector<64x8xf32>
    %55 = tpu.matmul %54, %44, %cst_31 {dimension_numbers = #tpu.dot_dimension_numbers<[1], [0], [0], [1], [0, 0, 1, 1], [], []>} : vector<64x64xf32>, vector<64x8xf32>, vector<64x8xf32> -> vector<64x8xf32>
    %56 = vector.extract_strided_slice %19 {offsets = [8, 0], sizes = [8, 32], strides = [1, 1]} : vector<32x32xf32> to vector<8x32xf32>
    %cst_32 = arith.constant dense<0.000000e+00> : vector<64x32xf32>
    %57 = tpu.matmul %55, %56, %cst_32 {dimension_numbers = #tpu.dot_dimension_numbers<[1], [0], [0], [1], [0, 0, 1, 1], [], []>} : vector<64x8xf32>, vector<8x32xf32>, vector<64x32xf32> -> vector<64x32xf32>
    %58 = arith.addf %39, %57 : vector<64x32xf32>
    %59 = vector.extract_strided_slice %8 {offsets = [0, 16], sizes = [64, 8], strides = [1, 1]} : vector<64x32xf32> to vector<64x8xf32>
    %cst_33 = arith.constant 0.353553385 : f32
    %60 = vector.broadcast %cst_33 : f32 to vector<64x8xf32>
    %61 = arith.mulf %59, %60 : vector<64x8xf32>
    %62 = vector.extract_strided_slice %13 {offsets = [0, 16], sizes = [64, 8], strides = [1, 1]} : vector<64x32xf32> to vector<64x8xf32>
    %63 = vector.extract_strided_slice %18 {offsets = [0, 16], sizes = [64, 8], strides = [1, 1]} : vector<64x32xf32> to vector<64x8xf32>
    %cst_34 = arith.constant dense<0.000000e+00> : vector<64x64xf32>
    %64 = tpu.matmul %61, %62, %cst_34 {dimension_numbers = #tpu.dot_dimension_numbers<[1], [1], [0], [0], [0, 0, 1, 0], [], []>} : vector<64x8xf32>, vector<64x8xf32>, vector<64x64xf32> -> vector<64x64xf32>
    %cst_35 = arith.constant dense<0xFF800000> : vector<64xf32>
    %65 = vector.multi_reduction <maximumf>, %64, %cst_35 [1] : vector<64x64xf32> to vector<64xf32>
    %66 = vector.shape_cast %65 : vector<64xf32> to vector<64x1xf32>
    %67 = vector.broadcast %66 : vector<64x1xf32> to vector<64x64xf32>
    %68 = arith.subf %64, %67 : vector<64x64xf32>
    %69 = math.exp %68 : vector<64x64xf32>
    %cst_36 = arith.constant dense<0.000000e+00> : vector<64xf32>
    %70 = vector.multi_reduction <add>, %69, %cst_36 [1] : vector<64x64xf32> to vector<64xf32>
    %71 = vector.shape_cast %70 : vector<64xf32> to vector<64x1xf32>
    %72 = vector.broadcast %71 : vector<64x1xf32> to vector<64x64xf32>
    %73 = arith.divf %69, %72 : vector<64x64xf32>
    %cst_37 = arith.constant dense<0.000000e+00> : vector<64x8xf32>
    %74 = tpu.matmul %73, %63, %cst_37 {dimension_numbers = #tpu.dot_dimension_numbers<[1], [0], [0], [1], [0, 0, 1, 1], [], []>} : vector<64x64xf32>, vector<64x8xf32>, vector<64x8xf32> -> vector<64x8xf32>
    %75 = vector.extract_strided_slice %19 {offsets = [16, 0], sizes = [8, 32], strides = [1, 1]} : vector<32x32xf32> to vector<8x32xf32>
    %cst_38 = arith.constant dense<0.000000e+00> : vector<64x32xf32>
    %76 = tpu.matmul %74, %75, %cst_38 {dimension_numbers = #tpu.dot_dimension_numbers<[1], [0], [0], [1], [0, 0, 1, 1], [], []>} : vector<64x8xf32>, vector<8x32xf32>, vector<64x32xf32> -> vector<64x32xf32>
    %77 = arith.addf %58, %76 : vector<64x32xf32>
    %78 = vector.extract_strided_slice %8 {offsets = [0, 24], sizes = [64, 8], strides = [1, 1]} : vector<64x32xf32> to vector<64x8xf32>
    %cst_39 = arith.constant 0.353553385 : f32
    %79 = vector.broadcast %cst_39 : f32 to vector<64x8xf32>
    %80 = arith.mulf %78, %79 : vector<64x8xf32>
    %81 = vector.extract_strided_slice %13 {offsets = [0, 24], sizes = [64, 8], strides = [1, 1]} : vector<64x32xf32> to vector<64x8xf32>
    %82 = vector.extract_strided_slice %18 {offsets = [0, 24], sizes = [64, 8], strides = [1, 1]} : vector<64x32xf32> to vector<64x8xf32>
    %cst_40 = arith.constant dense<0.000000e+00> : vector<64x64xf32>
    %83 = tpu.matmul %80, %81, %cst_40 {dimension_numbers = #tpu.dot_dimension_numbers<[1], [1], [0], [0], [0, 0, 1, 0], [], []>} : vector<64x8xf32>, vector<64x8xf32>, vector<64x64xf32> -> vector<64x64xf32>
    %cst_41 = arith.constant dense<0xFF800000> : vector<64xf32>
    %84 = vector.multi_reduction <maximumf>, %83, %cst_41 [1] : vector<64x64xf32> to vector<64xf32>
    %85 = vector.shape_cast %84 : vector<64xf32> to vector<64x1xf32>
    %86 = vector.broadcast %85 : vector<64x1xf32> to vector<64x64xf32>
    %87 = arith.subf %83, %86 : vector<64x64xf32>
    %88 = math.exp %87 : vector<64x64xf32>
    %cst_42 = arith.constant dense<0.000000e+00> : vector<64xf32>
    %89 = vector.multi_reduction <add>, %88, %cst_42 [1] : vector<64x64xf32> to vector<64xf32>
    %90 = vector.shape_cast %89 : vector<64xf32> to vector<64x1xf32>
    %91 = vector.broadcast %90 : vector<64x1xf32> to vector<64x64xf32>
    %92 = arith.divf %88, %91 : vector<64x64xf32>
    %cst_43 = arith.constant dense<0.000000e+00> : vector<64x8xf32>
    %93 = tpu.matmul %92, %82, %cst_43 {dimension_numbers = #tpu.dot_dimension_numbers<[1], [0], [0], [1], [0, 0, 1, 1], [], []>} : vector<64x64xf32>, vector<64x8xf32>, vector<64x8xf32> -> vector<64x8xf32>
    %94 = vector.extract_strided_slice %19 {offsets = [24, 0], sizes = [8, 32], strides = [1, 1]} : vector<32x32xf32> to vector<8x32xf32>
    %cst_44 = arith.constant dense<0.000000e+00> : vector<64x32xf32>
    %95 = tpu.matmul %93, %94, %cst_44 {dimension_numbers = #tpu.dot_dimension_numbers<[1], [0], [0], [1], [0, 0, 1, 1], [], []>} : vector<64x8xf32>, vector<8x32xf32>, vector<64x32xf32> -> vector<64x32xf32>
    %96 = arith.addf %77, %95 : vector<64x32xf32>
    %c0_45 = arith.constant 0 : index
    %c0_46 = arith.constant 0 : index
    %97 = vector.load %arg10[%c0_45, %c0_46] : memref<1x32xf32, #tpu.memory_space<vmem>>, vector<1x32xf32>
    %98 = vector.broadcast %97 : vector<1x32xf32> to vector<64x32xf32>
    %99 = arith.addf %96, %98 : vector<64x32xf32>
    %100 = arith.addf %1, %99 : vector<64x32xf32>
    %c0_47 = arith.constant 0 : index
    %c0_48 = arith.constant 0 : index
    %101 = vector.load %arg11[%c0_47, %c0_48] : memref<1x32xf32, #tpu.memory_space<vmem>>, vector<1x32xf32>
    %c0_49 = arith.constant 0 : index
    %c0_50 = arith.constant 0 : index
    %102 = vector.load %arg12[%c0_49, %c0_50] : memref<1x32xf32, #tpu.memory_space<vmem>>, vector<1x32xf32>
    %cst_51 = arith.constant dense<0.000000e+00> : vector<64xf32>
    %103 = vector.multi_reduction <add>, %100, %cst_51 [1] : vector<64x32xf32> to vector<64xf32>
    %104 = vector.shape_cast %103 : vector<64xf32> to vector<64x1xf32>
    %cst_52 = arith.constant 3.200000e+01 : f32
    %105 = vector.broadcast %cst_52 : f32 to vector<64x1xf32>
    %106 = arith.divf %104, %105 : vector<64x1xf32>
    %107 = vector.broadcast %106 : vector<64x1xf32> to vector<64x32xf32>
    %108 = arith.subf %100, %107 : vector<64x32xf32>
    %109 = arith.mulf %108, %108 : vector<64x32xf32>
    %cst_53 = arith.constant dense<0.000000e+00> : vector<64xf32>
    %110 = vector.multi_reduction <add>, %109, %cst_53 [1] : vector<64x32xf32> to vector<64xf32>
    %111 = vector.shape_cast %110 : vector<64xf32> to vector<64x1xf32>
    %cst_54 = arith.constant 3.200000e+01 : f32
    %112 = vector.broadcast %cst_54 : f32 to vector<64x1xf32>
    %113 = arith.divf %111, %112 : vector<64x1xf32>
    %cst_55 = arith.constant 9.99999974E-6 : f32
    %114 = vector.broadcast %cst_55 : f32 to vector<64x1xf32>
    %115 = arith.addf %113, %114 : vector<64x1xf32>
    %116 = math.rsqrt %115 : vector<64x1xf32>
    %117 = vector.broadcast %116 : vector<64x1xf32> to vector<64x32xf32>
    %118 = arith.mulf %108, %117 : vector<64x32xf32>
    %119 = vector.broadcast %101 : vector<1x32xf32> to vector<64x32xf32>
    %120 = arith.mulf %118, %119 : vector<64x32xf32>
    %121 = vector.broadcast %102 : vector<1x32xf32> to vector<64x32xf32>
    %122 = arith.addf %120, %121 : vector<64x32xf32>
    %c0_56 = arith.constant 0 : index
    %c0_57 = arith.constant 0 : index
    %123 = vector.load %arg15[%c0_56, %c0_57] : memref<32x64xf32, #tpu.memory_space<vmem>>, vector<32x64xf32>
    %cst_58 = arith.constant dense<0.000000e+00> : vector<64x64xf32>
    %124 = tpu.matmul %122, %123, %cst_58 {dimension_numbers = #tpu.dot_dimension_numbers<[1], [0], [0], [1], [0, 0, 1, 1], [], []>} : vector<64x32xf32>, vector<32x64xf32>, vector<64x64xf32> -> vector<64x64xf32>
    %c0_59 = arith.constant 0 : index
    %c0_60 = arith.constant 0 : index
    %125 = vector.load %arg16[%c0_59, %c0_60] : memref<1x64xf32, #tpu.memory_space<vmem>>, vector<1x64xf32>
    %126 = vector.broadcast %125 : vector<1x64xf32> to vector<64x64xf32>
    %127 = arith.addf %124, %126 : vector<64x64xf32>
    %cst_61 = arith.constant 5.000000e-01 : f32
    %128 = vector.broadcast %cst_61 : f32 to vector<64x64xf32>
    %129 = arith.mulf %128, %127 : vector<64x64xf32>
    %cst_62 = arith.constant 0.707106769 : f32
    %130 = vector.broadcast %cst_62 : f32 to vector<64x64xf32>
    %131 = arith.mulf %127, %130 : vector<64x64xf32>
    %132 = math.absf %131 : vector<64x64xf32>
    %cst_63 = arith.constant 0.327591091 : f32
    %133 = vector.broadcast %cst_63 : f32 to vector<64x64xf32>
    %134 = arith.mulf %133, %132 : vector<64x64xf32>
    %cst_64 = arith.constant 1.000000e+00 : f32
    %135 = vector.broadcast %cst_64 : f32 to vector<64x64xf32>
    %136 = arith.addf %135, %134 : vector<64x64xf32>
    %cst_65 = arith.constant 1.000000e+00 : f32
    %137 = vector.broadcast %cst_65 : f32 to vector<64x64xf32>
    %138 = arith.divf %137, %136 : vector<64x64xf32>
    %cst_66 = arith.constant 1.06140542 : f32
    %139 = vector.broadcast %cst_66 : f32 to vector<64x64xf32>
    %140 = arith.mulf %138, %139 : vector<64x64xf32>
    %cst_67 = arith.constant -1.45315206 : f32
    %141 = vector.broadcast %cst_67 : f32 to vector<64x64xf32>
    %142 = arith.addf %141, %140 : vector<64x64xf32>
    %143 = arith.mulf %138, %142 : vector<64x64xf32>
    %cst_68 = arith.constant 1.42141378 : f32
    %144 = vector.broadcast %cst_68 : f32 to vector<64x64xf32>
    %145 = arith.addf %144, %143 : vector<64x64xf32>
    %146 = arith.mulf %138, %145 : vector<64x64xf32>
    %cst_69 = arith.constant -0.284496725 : f32
    %147 = vector.broadcast %cst_69 : f32 to vector<64x64xf32>
    %148 = arith.addf %147, %146 : vector<64x64xf32>
    %149 = arith.mulf %138, %148 : vector<64x64xf32>
    %cst_70 = arith.constant 0.254829586 : f32
    %150 = vector.broadcast %cst_70 : f32 to vector<64x64xf32>
    %151 = arith.addf %150, %149 : vector<64x64xf32>
    %152 = arith.mulf %138, %151 : vector<64x64xf32>
    %cst_71 = arith.constant 0.000000e+00 : f32
    %153 = vector.broadcast %cst_71 : f32 to vector<64x64xf32>
    %154 = arith.subf %153, %132 : vector<64x64xf32>
    %155 = arith.mulf %154, %132 : vector<64x64xf32>
    %156 = math.exp %155 : vector<64x64xf32>
    %157 = arith.mulf %152, %156 : vector<64x64xf32>
    %cst_72 = arith.constant 1.000000e+00 : f32
    %158 = vector.broadcast %cst_72 : f32 to vector<64x64xf32>
    %159 = arith.subf %158, %157 : vector<64x64xf32>
    %cst_73 = arith.constant 0.000000e+00 : f32
    %160 = vector.broadcast %cst_73 : f32 to vector<64x64xf32>
    %161 = arith.cmpf olt, %131, %160 : vector<64x64xf32>
    %cst_74 = arith.constant 0.000000e+00 : f32
    %162 = vector.broadcast %cst_74 : f32 to vector<64x64xf32>
    %163 = arith.subf %162, %159 : vector<64x64xf32>
    %164 = arith.select %161, %163, %159 : vector<64x64xi1>, vector<64x64xf32>
    %cst_75 = arith.constant 1.000000e+00 : f32
    %165 = vector.broadcast %cst_75 : f32 to vector<64x64xf32>
    %166 = arith.addf %165, %164 : vector<64x64xf32>
    %167 = arith.mulf %129, %166 : vector<64x64xf32>
    %c0_76 = arith.constant 0 : index
    %c0_77 = arith.constant 0 : index
    %168 = vector.load %arg17[%c0_76, %c0_77] : memref<64x32xf32, #tpu.memory_space<vmem>>, vector<64x32xf32>
    %cst_78 = arith.constant dense<0.000000e+00> : vector<64x32xf32>
    %169 = tpu.matmul %167, %168, %cst_78 {dimension_numbers = #tpu.dot_dimension_numbers<[1], [0], [0], [1], [0, 0, 1, 1], [], []>} : vector<64x64xf32>, vector<64x32xf32>, vector<64x32xf32> -> vector<64x32xf32>
    %c0_79 = arith.constant 0 : index
    %c0_80 = arith.constant 0 : index
    %170 = vector.load %arg18[%c0_79, %c0_80] : memref<1x32xf32, #tpu.memory_space<vmem>>, vector<1x32xf32>
    %171 = vector.broadcast %170 : vector<1x32xf32> to vector<64x32xf32>
    %172 = arith.addf %169, %171 : vector<64x32xf32>
    %173 = arith.addf %122, %172 : vector<64x32xf32>
    %c0_81 = arith.constant 0 : index
    %c0_82 = arith.constant 0 : index
    %174 = vector.load %arg13[%c0_81, %c0_82] : memref<1x32xf32, #tpu.memory_space<vmem>>, vector<1x32xf32>
    %c0_83 = arith.constant 0 : index
    %c0_84 = arith.constant 0 : index
    %175 = vector.load %arg14[%c0_83, %c0_84] : memref<1x32xf32, #tpu.memory_space<vmem>>, vector<1x32xf32>
    %cst_85 = arith.constant dense<0.000000e+00> : vector<64xf32>
    %176 = vector.multi_reduction <add>, %173, %cst_85 [1] : vector<64x32xf32> to vector<64xf32>
    %177 = vector.shape_cast %176 : vector<64xf32> to vector<64x1xf32>
    %cst_86 = arith.constant 3.200000e+01 : f32
    %178 = vector.broadcast %cst_86 : f32 to vector<64x1xf32>
    %179 = arith.divf %177, %178 : vector<64x1xf32>
    %180 = vector.broadcast %179 : vector<64x1xf32> to vector<64x32xf32>
    %181 = arith.subf %173, %180 : vector<64x32xf32>
    %182 = arith.mulf %181, %181 : vector<64x32xf32>
    %cst_87 = arith.constant dense<0.000000e+00> : vector<64xf32>
    %183 = vector.multi_reduction <add>, %182, %cst_87 [1] : vector<64x32xf32> to vector<64xf32>
    %184 = vector.shape_cast %183 : vector<64xf32> to vector<64x1xf32>
    %cst_88 = arith.constant 3.200000e+01 : f32
    %185 = vector.broadcast %cst_88 : f32 to vector<64x1xf32>
    %186 = arith.divf %184, %185 : vector<64x1xf32>
    %cst_89 = arith.constant 9.99999974E-6 : f32
    %187 = vector.broadcast %cst_89 : f32 to vector<64x1xf32>
    %188 = arith.addf %186, %187 : vector<64x1xf32>
    %189 = math.rsqrt %188 : vector<64x1xf32>
    %190 = vector.broadcast %189 : vector<64x1xf32> to vector<64x32xf32>
    %191 = arith.mulf %181, %190 : vector<64x32xf32>
    %192 = vector.broadcast %174 : vector<1x32xf32> to vector<64x32xf32>
    %193 = arith.mulf %191, %192 : vector<64x32xf32>
    %194 = vector.broadcast %175 : vector<1x32xf32> to vector<64x32xf32>
    %195 = arith.addf %193, %194 : vector<64x32xf32>
    %c0_90 = arith.constant 0 : index
    %c0_91 = arith.constant 0 : index
    %c0_92 = arith.constant 0 : index
    %196 = vector.load %arg19[%c0_90, %c0_91, %c0_92] : memref<1x64x32xf32, #tpu.memory_space<vmem>>, vector<1x64x32xf32>
    %197 = vector.shape_cast %196 : vector<1x64x32xf32> to vector<64x32xf32>
    %198 = vector.shape_cast %195 : vector<64x32xf32> to vector<1x64x32xf32>
    tpu.vector_store %arg19[%c0_90, %c0_91, %c0_92], %198 {strides = array<i32>} : memref<1x64x32xf32, #tpu.memory_space<vmem>>, vector<1x64x32xf32>,
    return
  }
  func.func @transform_0(%arg0: i32) -> (i32, i32, i32) {
    %c0_i32 = arith.constant 0 : i32
    %c0_i32_0 = arith.constant 0 : i32
    %c0_i32_1 = arith.constant 0 : i32
    return %arg0, %c0_i32, %c0_i32_0 : i32, i32, i32
  }
  func.func @transform_1(%arg0: i32) -> (i32, i32) {
    %c0_i32 = arith.constant 0 : i32
    %c0_i32_0 = arith.constant 0 : i32
    %c0_i32_1 = arith.constant 0 : i32
    return %c0_i32, %c0_i32_0 : i32, i32
  }
  func.func @transform_2(%arg0: i32) -> (i32, i32) {
    %c0_i32 = arith.constant 0 : i32
    %c0_i32_0 = arith.constant 0 : i32
    %c0_i32_1 = arith.constant 0 : i32
    return %c0_i32, %c0_i32_0 : i32, i32
  }
  func.func @transform_3(%arg0: i32) -> (i32, i32) {
    %c0_i32 = arith.constant 0 : i32
    %c0_i32_0 = arith.constant 0 : i32
    %c0_i32_1 = arith.constant 0 : i32
    return %c0_i32, %c0_i32_0 : i32, i32
  }
  func.func @transform_4(%arg0: i32) -> (i32, i32) {
    %c0_i32 = arith.constant 0 : i32
    %c0_i32_0 = arith.constant 0 : i32
    %c0_i32_1 = arith.constant 0 : i32
    return %c0_i32, %c0_i32_0 : i32, i32
  }
  func.func @transform_5(%arg0: i32) -> (i32, i32) {
    %c0_i32 = arith.constant 0 : i32
    %c0_i32_0 = arith.constant 0 : i32
    %c0_i32_1 = arith.constant 0 : i32
    return %c0_i32, %c0_i32_0 : i32, i32
  }
  func.func @transform_6(%arg0: i32) -> (i32, i32) {
    %c0_i32 = arith.constant 0 : i32
    %c0_i32_0 = arith.constant 0 : i32
    %c0_i32_1 = arith.constant 0 : i32
    return %c0_i32, %c0_i32_0 : i32, i32
  }
  func.func @transform_7(%arg0: i32) -> (i32, i32) {
    %c0_i32 = arith.constant 0 : i32
    %c0_i32_0 = arith.constant 0 : i32
    %c0_i32_1 = arith.constant 0 : i32
    return %c0_i32, %c0_i32_0 : i32, i32
  }
  func.func @transform_8(%arg0: i32) -> (i32, i32) {
    %c0_i32 = arith.constant 0 : i32
    %c0_i32_0 = arith.constant 0 : i32
    %c0_i32_1 = arith.constant 0 : i32
    return %c0_i32, %c0_i32_0 : i32, i32
  }
  func.func @transform_9(%arg0: i32) -> (i32, i32) {
    %c0_i32 = arith.constant 0 : i32
    %c0_i32_0 = arith.constant 0 : i32
    %c0_i32_1 = arith.constant 0 : i32
    return %c0_i32, %c0_i32_0 : i32, i32
  }
  func.func @transform_10(%arg0: i32) -> (i32, i32) {
    %c0_i32 = arith.constant 0 : i32
    %c0_i32_0 = arith.constant 0 : i32
    %c0_i32_1 = arith.constant 0 : i32
    return %c0_i32, %c0_i32_0 : i32, i32
  }
  func.func @transform_11(%arg0: i32) -> (i32, i32) {
    %c0_i32 = arith.constant 0 : i32
    %c0_i32_0 = arith.constant 0 : i32
    %c0_i32_1 = arith.constant 0 : i32
    return %c0_i32, %c0_i32_0 : i32, i32
  }
  func.func @transform_12(%arg0: i32) -> (i32, i32) {
    %c0_i32 = arith.constant 0 : i32
    %c0_i32_0 = arith.constant 0 : i32
    %c0_i32_1 = arith.constant 0 : i32
    return %c0_i32, %c0_i32_0 : i32, i32
  }
  func.func @transform_13(%arg0: i32) -> (i32, i32) {
    %c0_i32 = arith.constant 0 : i32
    %c0_i32_0 = arith.constant 0 : i32
    %c0_i32_1 = arith.constant 0 : i32
    return %c0_i32, %c0_i32_0 : i32, i32
  }
  func.func @transform_14(%arg0: i32) -> (i32, i32) {
    %c0_i32 = arith.constant 0 : i32
    %c0_i32_0 = arith.constant 0 : i32
    %c0_i32_1 = arith.constant 0 : i32
    return %c0_i32, %c0_i32_0 : i32, i32
  }
  func.func @transform_15(%arg0: i32) -> (i32, i32) {
    %c0_i32 = arith.constant 0 : i32
    %c0_i32_0 = arith.constant 0 : i32
    %c0_i32_1 = arith.constant 0 : i32
    return %c0_i32, %c0_i32_0 : i32, i32
  }
  func.func @transform_16(%arg0: i32) -> (i32, i32) {
    %c0_i32 = arith.constant 0 : i32
    %c0_i32_0 = arith.constant 0 : i32
    %c0_i32_1 = arith.constant 0 : i32
    return %c0_i32, %c0_i32_0 : i32, i32
  }
  func.func @transform_17(%arg0: i32) -> (i32, i32) {
    %c0_i32 = arith.constant 0 : i32
    %c0_i32_0 = arith.constant 0 : i32
    %c0_i32_1 = arith.constant 0 : i32
    return %c0_i32, %c0_i32_0 : i32, i32
  }
  func.func @transform_18(%arg0: i32) -> (i32, i32, i32) {
    %c0_i32 = arith.constant 0 : i32
    %c0_i32_0 = arith.constant 0 : i32
    %c0_i32_1 = arith.constant 0 : i32
    return %arg0, %c0_i32, %c0_i32_0 : i32, i32, i32
  }
}

</mosaic_0001>

<bundles_post_ra>
// kernel: tpu_custom_call.1
= control target key start
LH: loop header
LB: loop body
LE: loop exit
PB: predicated region body
PF: predicated region fallthrough
CT: control target
= control target key end

     0   :  { %s5494_s27 = smov 0   ;;  %s6657_s0 = inlined_call_operand.vmem [shape: f32[2,64,32], index: 0, kind: input, shape index: {}]   ;;  %s6658_s1 = inlined_call_operand.vmem [shape: f32[64,32], index: 1, kind: input, shape index: {}]   ;;  %s6659_s2 = inlined_call_operand.vmem [shape: f32[32,32], index: 2, kind: input, shape index: {}]   ;;  %s6660_s3 = inlined_call_operand.vmem [shape: f32[32,32], index: 3, kind: input, shape index: {}]   ;;  %s6661_s4 = inlined_call_operand.vmem [shape: f32[32,32], index: 4, kind: input, shape index: {}]   ;;  %s6662_s5 = inlined_call_operand.vmem [shape: f32[1,32], index: 5, kind: input, shape index: {}]   ;;  %s6663_s6 = inlined_call_operand.vmem [shape: f32[1,32], index: 6, kind: input, shape index: {}]   ;;  %s6664_s7 = inlined_call_operand.vmem [shape: f32[1,32], index: 7, kind: input, shape index: {}]   ;;  %s6665_s8 = inlined_call_operand.vmem [shape: f32[32,32], index: 8, kind: input, shape index: {}]   ;;  %s6666_s9 = inlined_call_operand.vmem [shape: f32[1,32], index: 9, kind: input, shape index: {}]   ;;  %s6667_s10 = inlined_call_operand.vmem [shape: f32[1,32], index: 10, kind: input, shape index: {}]   ;;  %s6668_s11 = inlined_call_operand.vmem [shape: f32[1,32], index: 11, kind: input, shape index: {}]   ;;  %s6669_s12 = inlined_call_operand.vmem [shape: f32[1,32], index: 12, kind: input, shape index: {}]   ;;  %s6670_s13 = inlined_call_operand.vmem [shape: f32[1,32], index: 13, kind: input, shape index: {}]   ;;  %s6671_s14 = inlined_call_operand.vmem [shape: f32[32,64], index: 14, kind: input, shape index: {}]   ;;  %s6672_s15 = inlined_call_operand.vmem [shape: f32[1,64], index: 15, kind: input, shape index: {}]   ;;  %s6673_s16 = inlined_call_operand.vmem [shape: f32[64,32], index: 16, kind: input, shape index: {}]   ;;  %s6674_s17 = inlined_call_operand.vmem [shape: f32[1,32], index: 17, kind: input, shape index: {}]   ;;  %s6675_s18 = inlined_call_operand.vmem [shape: f32[2,64,32], index: 18, kind: output, shape index: {}]  }
   0x1   :  { %6678 = sst [smem:[#allocation2_spill]] %s6657_s0 }
   0x2   :  { %6679 = sst [smem:[#allocation3_spill]] %s6658_s1 }
   0x3   :  { %6680 = sst [smem:[#allocation4_spill]] %s6659_s2 }
   0x4 LB: > { %s4014_s28 = sadd.s32 4294967295, %s5394_s27   ;;  %p4018_p0 = scmp.ge.s32.totalorder %s5394_s27, 1  ;;  %s5394_s27 = sphi %s5494_s27, %s28_s27  }
   0x5   : > { %p512_p1 = scmp.lt.s32.totalorder %s5394_s27, 3 }
   0x7   : > { %p513_p2 = pnand %p4018_p0, %p512_p1 }
   0x8   : > { %s6681_s0 = sld [smem:[#allocation4_spill]] (!%p513_p2)  ;;  %p566_p3 = scmp.lt.s32.totalorder (!%p513_p2), %s4014_s28, 1  ;;  %v741_v6 = vld [vmem:[%s6660_s3] sm:$0xff] (!%p513_p2)  ;;  %v742_v7 = vld [vmem:[%s6660_s3 + $0x8] sm:$0xff] (!%p513_p2)  ;;  %v743_v11 = vld [vmem:[%s6660_s3 + $0x10] sm:$0xff] (!%p513_p2)  ;;  %vm611_vm0 = vcmask (!%p513_p2), 261120  }
   0x9   : > { %516 = sbr.rel (%p513_p2) target bundleno = 3615 (0xe1f), region = 92  ;;  %s6682_s19 = sld [smem:[#allocation3_spill]] (!%p513_p2)  ;;  %v4829_v12 = vpack.c.bf16 (!%p513_p2), %v742_v7, %v741_v6  ;;  %v744_v13 = vld [vmem:[%s6660_s3 + $0x18] sm:$0xff] (!%p513_p2)  ;;  %v4023_v38 = vld [vmem:[%s6662_s5] ss:$0 sm:$0xff] (!%p513_p2)  ;;  %vm1009_vm1 = vcmask (!%p513_p2), 64512  }
   0xa   : > { %s6683_s29 = sld [smem:[#allocation2_spill]] (!%p513_p2)  ;;  %v4833_v29 = vpack.c.bf16 (!%p513_p2), %v744_v13, %v743_v11  ;;  %v4032_v47 = vld [vmem:[%s6663_s6] ss:$0 sm:$0xff] (!%p513_p2)  ;;  %vm5618_vm2 = vmpackc.low (!%p513_p2), %vm1009_vm1, %vm1009_vm1  ;;  %vm1163_vm3 = vcmask (!%p513_p2), 523264   ;;  %s5397_s20 = smov (!%p513_p2), 112  }
   0xb   : > { %s5398_s21 = smov (!%p513_p2), 104  }
   0xe   : > { %v600_v0 = vld [vmem:[%s6681_s0] sm:$0xff] (!%p513_p2)  ;;  %v601_v1 = vld [vmem:[%s6681_s0 + $0x8] sm:$0xff] (!%p513_p2)  ;;  %v602_v2 = vld [vmem:[%s6681_s0 + $0x10] sm:$0xff] (!%p513_p2) }
   0xf   : > { %v4821_v3 = vpack.c.bf16 (!%p513_p2), %v601_v1, %v600_v0  ;;  %v603_v4 = vld [vmem:[%s6681_s0 + $0x18] sm:$0xff] (!%p513_p2)  ;;  %v588_v8 = vld [vmem:[%s6682_s19 + $0x20] sm:$0xff] (!%p513_p2)  ;;  %v589_v9 = vld [vmem:[%s6682_s19 + $0x28] sm:$0xff] (!%p513_p2) }
  0x10   : > { %v4825_v5 = vpack.c.bf16 %v603_v4, %v602_v2  ;;  %s6687_s28 = smov (!%p566_p3, %s4014_s28), 1  ;;  %v590_v10 = vld [vmem:[%s6682_s19 + $0x30] sm:$0xff]  ;;  %v584_v14 = vld [vmem:[%s6682_s19] sm:$0xff]  ;;  %v585_v15 = vld [vmem:[%s6682_s19 + $0x8] sm:$0xff] }
  0x11   : > { %5029 = vmatprep.subr.bf16.mxu1 %v4821_v3  ;;  %4822 = vmatprep.subr.bf16.mxu0 %v4821_v3  ;;  %s4203_s1 = sshll.u32 %s6687_s28, 6  ;;  %v591_v21 = vld [vmem:[%s6682_s19 + $0x38] sm:$0xff]  ;;  %v586_v28 = vld [vmem:[%s6682_s19 + $0x10] sm:$0xff] }
  0x12   : > { %5031 = vmatpush3.bf16.msra.mxu1 %v4821_v3  ;;  %4824 = vmatpush3.bf16.msra.mxu0 %v4821_v3  ;;  %s5540_s30 = scalar_lea.vmem %s6683_s29, %s4203_s1  ;;  %v587_v32 = vld [vmem:[%s6682_s19 + $0x18] sm:$0xff]  ;;  %s5396_s29 = smov 120  }
  0x13   : > { %5030 = vmatprep.subr.bf16.mxu1 %v4825_v5  ;;  %4826 = vmatprep.subr.bf16.mxu0 %v4825_v5  ;;  %v5552_v16 = vld [vmem:[%s5540_s30 + $0x20] sm:$0xff]  ;;  %v5555_v17 = vld [vmem:[%s5540_s30 + $0x28] sm:$0xff]  ;;  %v5558_v18 = vld [vmem:[%s5540_s30 + $0x30] sm:$0xff] }
  0x14   : > { %v596_v19 = vadd.f32 %v588_v8, %v5552_v16  ;;  %v597_v20 = vadd.f32 %v589_v9, %v5555_v17  ;;  %v576_v22 = vld [vmem:[%s5540_s30] sm:$0xff]  ;;  %v5567_v23 = vld [vmem:[%s5540_s30 + $0x8] sm:$0xff]  ;;  %v598_v24 = vadd.f32 %v590_v10, %v5558_v18  ;;  %v5571_v25 = vld [vmem:[%s5540_s30 + $0x38] sm:$0xff] }
  0x15   : > { %v592_v26 = vadd.f32 %v584_v14, %v576_v22  ;;  %v5574_v27 = vld [vmem:[%s5540_s30 + $0x10] sm:$0xff]  ;;  %v593_v30 = vadd.f32 %v585_v15, %v5567_v23  ;;  %v5582_v31 = vld [vmem:[%s5540_s30 + $0x18] sm:$0xff]  ;;  %v599_v33 = vadd.f32 %v591_v21, %v5571_v25 }
  0x16   : > { %5032 = vmatpush3.bf16.msra.mxu1 %v4825_v5  ;;  %4828 = vmatpush3.bf16.msra.mxu0 %v4825_v5  ;;  %v594_v34 = vadd.f32 %v586_v28, %v5574_v27  ;;  %v595_v35 = vadd.f32 %v587_v32, %v5582_v31  ;;  %v859_v32 = vld [vmem:[%s6661_s4 + $0x10] sm:$0xff] }
  0x17   : > { %4447 = vmatprep.mubr.msk.f32.mxu1 %vm611_vm0, %v596_v19  ;;  %4830 = vmatprep.subr.bf16.mxu1 %v4829_v12 }
  0x18   : > { %4441 = vmatprep.mubr.msk.f32.mxu0 %vm611_vm0, %v592_v26 }
  0x19   : > { %4448 = vmatmul.mubr.msk.f32.vlgmr.msra.gmra.mrb[0].mxu1 %vm611_vm0, %v597_v20  ;;  %4442 = vmatmul.mubr.msk.f32.vlgmr.msra.gmra.mrb[0].mxu0 %vm611_vm0, %v593_v30 }
  0x1a   : > { %4832 = vmatpush3.bf16.msra.mxu1 %v4829_v12  ;;  %4450 = vmatprep.mubr.msk.f32.mxu1 %vm611_vm0, %v598_v24 }
  0x1b   : > { %4834 = vmatprep.subr.bf16.mxu1 %v4833_v29  ;;  %4444 = vmatprep.mubr.msk.f32.mxu0 %vm611_vm0, %v594_v34 }
  0x1d   : > { %4451 = vmatmul.mubr.msk.f32.gmra.mrb[2].mxu1 %vm611_vm0, %v599_v33  ;;  %4445 = vmatmul.mubr.msk.f32.gmra.mrb[2].mxu0 %vm611_vm0, %v595_v35 }
  0x1e   : > { %4836 = vmatpush3.bf16.msra.mxu1 %v4833_v29  ;;  %4461 = vmatprep.mubr.msk.f32.mxu1 %vm611_vm0, %v592_v26  ;;  %v857_v29 = vld [vmem:[%s6661_s4] sm:$0xff] }
  0x1f   : > { %4481 = vmatprep.mubr.msk.f32.mxu0 %vm611_vm0, %v576_v22 }
  0x21   : > { %4462 = vmatmul.mubr.msk.f32.vlgmr.msra.gmra.mrb[4].mxu1 %vm611_vm0, %v593_v30  ;;  %v858_v30 = vld [vmem:[%s6661_s4 + $0x8] sm:$0xff] }
  0x22   : > { %4464 = vmatprep.mubr.msk.f32.mxu1 %vm611_vm0, %v594_v34  ;;  %v860_v34 = vld [vmem:[%s6661_s4 + $0x18] sm:$0xff] }
  0x25   : > { %4465 = vmatmul.mubr.msk.f32.gmra.mrb[6].mxu1 %vm611_vm0, %v595_v35  ;;  %v4841_v35 = vpack.c.bf16 %v860_v34, %v859_v32 }
  0x26   : > { %4467 = vmatprep.mubr.msk.f32.mxu1 %vm611_vm0, %v596_v19 }
  0x29   : > { %4468 = vmatmul.mubr.msk.f32.gmra.mrb[8].mxu1 %vm611_vm0, %v597_v20 }
  0x2a   : > { %4470 = vmatprep.mubr.msk.f32.mxu1 %vm611_vm0, %v598_v24 }
  0x2d   : > { %4471 = vmatmul.mubr.msk.f32.gmra.mrb[10].mxu1 %vm611_vm0, %v599_v33  ;;  %v4837_v33 = vpack.c.bf16 %v858_v30, %v857_v29 }
  0x2f   : > { %4838 = vmatprep.subr.bf16.mxu0 %v4837_v33 }
  0x30   : > { %4840 = vmatpush3.bf16.msra.mxu0 %v4837_v33 }
  0x31   : > { %4842 = vmatprep.subr.bf16.mxu0 %v4841_v35 }
  0x34   : > { %4844 = vmatpush3.bf16.msra.mxu0 %v4841_v35 }
  0x37   : > { %4482 = vmatmul.mubr.msk.f32.vlgmr.msra.gmra.mrb[4].mxu0 %vm611_vm0, %v5567_v23 }
  0x38   : > { %4484 = vmatprep.mubr.msk.f32.mxu0 %vm611_vm0, %v5574_v27 }
  0x3b   : > { %4485 = vmatmul.mubr.msk.f32.gmra.mrb[6].mxu0 %vm611_vm0, %v5582_v31 }
  0x3c   : > { %4487 = vmatprep.mubr.msk.f32.mxu0 %vm611_vm0, %v5552_v16 }
  0x3f   : > { %4488 = vmatmul.mubr.msk.f32.gmra.mrb[8].mxu0 %vm611_vm0, %v5555_v17 }
  0x40   : > { %4490 = vmatprep.mubr.msk.f32.mxu0 %vm611_vm0, %v5558_v18 }
  0x43   : > { %4491 = vmatmul.mubr.msk.f32.gmra.mrb[10].mxu0 %vm611_vm0, %v5571_v25 }
  0xec   : > { %v4449_v36 = vpop.f32.mrb[0].mxu1  ;;  %v4443_v37 = vpop.f32.mrb[0].mxu0 }
  0xed   : > { %v722_v39 = vpop.f32.mrb[1].mxu1  ;;  %v702_v40 = vpop.f32.mrb[1].mxu0  ;;  %v708_v10 = vadd.f32 %v4443_v37, %v4023_v38  ;;  %v728_v19 = vadd.f32 %v4449_v36, %v4023_v38 }
  0xee   : > { %v703_v41 = vadd.f32 %v4023_v38, %v702_v40  ;;  %v723_v14 = vadd.f32 %v4023_v38, %v722_v39 }
  0xef   : > { %v5648_v13 = vmul.f32 0.35355338, %v708_v10  ;;  %v5662_v22 = vmul.f32 0.35355338, %v728_v19 }
  0xf0   : > { %v4452_v42 = vpop.f32.mrb[2].mxu1  ;;  %v5609_v43 = vmul.f32 0.35355338, %v703_v41  ;;  %v4446_v44 = vpop.f32.mrb[2].mxu0  ;;  %v5656_v20 = vmul.f32 0.35355338, %v723_v14 }
  0xf1   : > { %v732_v45 = vpop.f32.mrb[3].mxu1  ;;  %v712_v46 = vpop.f32.mrb[3].mxu0  ;;  %v718_v11 = vadd.f32 %v4446_v44, %v4023_v38  ;;  %v738_v24 = vadd.f32 %v4452_v42, %v4023_v38 }
  0xf2   : > { %4509 = vmatprep.mubr.msk.f32.mxu1 %vm1009_vm1, %v5609_v43  ;;  %v713_v9 = vadd.f32 %v4023_v38, %v712_v46  ;;  %v733_v21 = vadd.f32 %v4023_v38, %v732_v45 }
  0xf3   : > { %v5650_v15 = vmul.f32 0.35355338, %v718_v11  ;;  %v5670_v28 = vmul.f32 0.35355338, %v738_v24 }
  0xf4   : > { %v4463_v48 = vpop.f32.mrb[4].mxu1  ;;  %v5646_v12 = vmul.f32 0.35355338, %v713_v9  ;;  %v5664_v26 = vmul.f32 0.35355338, %v733_v21 }
  0xf5   : > { %v824_v49 = vadd.f32 %v4463_v48, %v4032_v47  ;;  %v818_v50 = vpop.f32.mrb[5].mxu1 }
  0xf6   : > { %v819_v51 = vadd.f32 %v4032_v47, %v818_v50 }
  0xf8   : > { %v4845_v53 = vpack.c.bf16 %v824_v49, %v819_v51  ;;  %v4466_v54 = vpop.f32.mrb[6].mxu1  ;;  %v5622_v55 = vpack.i.bf16 %v824_v49, %v819_v51 }
  0xf9   : > { %v834_v56 = vadd.f32 %v4466_v54, %v4032_v47  ;;  %v828_v57 = vpop.f32.mrb[7].mxu1  ;;  %v4041_v54 = vld [vmem:[%s6664_s7] ss:$0 sm:$0xff] }
  0xfa   : > { %4847 = vmatprep.subr.msk.bf16.mxu1 %vm5618_vm2, %v4845_v53  ;;  %v829_v58 = vadd.f32 %v4032_v47, %v828_v57 }
  0xfb   : > { %4850 = vmatpush3.bf16.xpose.msk.msra.mxu1 %vm5618_vm2, %v4845_v53 }
  0xfc   : > { %v4851_v59 = vpack.c.bf16 %v834_v56, %v829_v58  ;;  %v4469_v60 = vpop.f32.mrb[8].mxu1  ;;  %v5628_v61 = vpack.i.bf16 %v834_v56, %v829_v58 }
  0xfd   : > { %v844_v62 = vadd.f32 %v4469_v60, %v4032_v47  ;;  %v838_v63 = vpop.f32.mrb[9].mxu1 }
  0xfe   : > { %4853 = vmatprep.subr.msk.bf16.mxu1 %vm5618_vm2, %v4851_v59  ;;  %v839_v0 = vadd.f32 %v4032_v47, %v838_v63 }
 0x100   : > { %v4857_v1 = vpack.c.bf16 %v844_v62, %v839_v0  ;;  %v4472_v2 = vpop.f32.mrb[10].mxu1  ;;  %v5632_v3 = vpack.i.bf16 %v844_v62, %v839_v0 }
 0x101   : > { %v854_v4 = vadd.f32 %v4472_v2, %v4032_v47  ;;  %v848_v5 = vpop.f32.mrb[11].mxu1 }
 0x102   : > { %v849_v6 = vadd.f32 %v4032_v47, %v848_v5 }
 0x103   : > { %4856 = vmatpush3.bf16.xpose.msk.msra.mxu1 %vm5618_vm2, %v4851_v59 }
 0x104   : > { %4859 = vmatprep.subr.msk.bf16.mxu1 %vm5618_vm2, %v4857_v1  ;;  %v4863_v7 = vpack.c.bf16 %v854_v4, %v849_v6  ;;  %v5638_v8 = vpack.i.bf16 %v854_v4, %v849_v6 }
 0x10a   : > { %v4483_v53 = vpop.f32.mrb[4].mxu0 }
 0x10b   : > { %4862 = vmatpush3.bf16.xpose.msk.msra.mxu1 %vm5618_vm2, %v4857_v1  ;;  %v5729_v56 = vadd.f32 %v4483_v53, %v4041_v54  ;;  %v958_v57 = vpop.f32.mrb[5].mxu0 }
 0x10c   : > { %4865 = vmatprep.subr.msk.bf16.mxu1 %vm5618_vm2, %v4863_v7  ;;  %v5731_v58 = vadd.f32 %v4041_v54, %v958_v57 }
 0x10e   : > { %v4486_v59 = vpop.f32.mrb[6].mxu0  ;;  %v4869_v63 = vpack.c.bf16 %v5729_v56, %v5731_v58 }
 0x10f   : > { %v968_v60 = vpop.f32.mrb[7].mxu0  ;;  %v5743_v6 = vadd.f32 %v4486_v59, %v4041_v54 }
 0x110   : > { %4870 = vmatprep.subr.bf16.mxu0 %v4869_v63 }
 0x111   : > { %4872 = vmatpush3.bf16.msra.mxu0 %v4869_v63 }
 0x112   : > { %v4489_v0 = vpop.f32.mrb[8].mxu0 }
 0x113   : > { %4868 = vmatpush3.bf16.xpose.msk.msra.mxu1 %vm5618_vm2, %v4863_v7  ;;  %v978_v2 = vpop.f32.mrb[9].mxu0  ;;  %v5745_v7 = vadd.f32 %v4041_v54, %v968_v60  ;;  %v5747_v9 = vadd.f32 %v4489_v0, %v4041_v54 }
 0x114   : > { %v5749_v10 = vadd.f32 %v4041_v54, %v978_v2 }
 0x115   : > { %v4873_v11 = vpack.c.bf16 %v5743_v6, %v5745_v7 }
 0x116   : > { %v4492_v14 = vpop.f32.mrb[10].mxu0  ;;  %v4877_v19 = vpack.c.bf16 %v5747_v9, %v5749_v10 }
 0x117   : > { %4874 = vmatprep.subr.bf16.mxu0 %v4873_v11  ;;  %v5755_v21 = vadd.f32 %v4492_v14, %v4041_v54  ;;  %v988_v24 = vpop.f32.mrb[11].mxu0 }
 0x118   : > { %4876 = vmatpush3.bf16.msra.mxu0 %v4873_v11  ;;  %v5757_v29 = vadd.f32 %v4041_v54, %v988_v24 }
 0x119   : > { %4878 = vmatprep.subr.bf16.mxu0 %v4877_v19 }
 0x11a   : > { %4510 = vmatmul.mubr.msk.f32.vlgmr.msra.gmra.mrb[12].mxu1 %vm1009_vm1, %v5648_v13  ;;  %v4881_v30 = vpack.c.bf16 %v5755_v21, %v5757_v29 }
 0x11b   : > { %4512 = vmatprep.mubr.msk.f32.mxu1 %vm1009_vm1, %v5646_v12 }
 0x11c   : > { %4880 = vmatpush3.bf16.msra.mxu0 %v4877_v19 }
 0x11d   : > { %4882 = vmatprep.subr.bf16.mxu0 %v4881_v30 }
 0x11e   : > { %4513 = vmatmul.mubr.msk.f32.gmra.mrb[14].mxu1 %vm1009_vm1, %v5650_v15 }
 0x11f   : > { %4515 = vmatprep.mubr.msk.f32.mxu1 %vm1009_vm1, %v5656_v20 }
 0x120   : > { %4884 = vmatpush3.bf16.msra.mxu0 %v4881_v30 }
 0x122   : > { %4516 = vmatmul.mubr.msk.f32.gmra.mrb[16].mxu1 %vm1009_vm1, %v5662_v22 }
 0x123   : > { %4518 = vmatprep.mubr.msk.f32.mxu1 %vm1009_vm1, %v5664_v26 }
 0x126   : > { %4519 = vmatmul.mubr.msk.f32.gmra.mrb[18].mxu1 %vm1009_vm1, %v5670_v28 }
 0x1ed   : > { %v4511_v23 = vpop.f32.mrb[12].mxu1 }
 0x1ee   : > { %v1124_v36 = vpop.f32.mrb[13].mxu1  ;;  %v1167_v17 = vsel %vm1163_vm3, %v4511_v23, -inf }
 0x1ef   : > { %v1164_v27 = vsel %vm1163_vm3, %v1124_v36, -inf }
 0x1f0   : > { %1165 = vmax.xlane.f32.xlu0 %v1164_v27 }
 0x1f1   : > { %v5701_v37 = vpop.f32.mrb[14].mxu1 }
 0x1f2   : > { %v1173_v16 = vsel %vm1163_vm3, %v5701_v37, -inf  ;;  %v5705_v31 = vpop.f32.mrb[15].mxu1 }
 0x1f3   : > { %1174 = vmax.xlane.f32.xlu1 %v1173_v16  ;;  %v1170_v18 = vsel %vm1163_vm3, %v5705_v31, -inf }
 0x1f4   : > { %1168 = vmax.xlane.f32.xlu0 %v1167_v17 }
 0x1f5   : > { %v5710_v25 = vpop.f32.mrb[16].mxu1 }
 0x1f6   : > { %v5712_v38 = vpop.f32.mrb[17].mxu1  ;;  %v1179_v42 = vsel %vm1163_vm3, %v5710_v25, -inf }
 0x1f7   : > { %1171 = vmax.xlane.f32.xlu1 %v1170_v18  ;;  %v1176_v39 = vsel %vm1163_vm3, %v5712_v38, -inf }
 0x1f8   : > { %1177 = vmax.xlane.f32.xlu0 %v1176_v39 }
 0x1f9   : > { %v5716_v40 = vpop.f32.mrb[18].mxu1 }
 0x1fa   : > { %v5718_v41 = vpop.f32.mrb[19].mxu1  ;;  %v1185_v45 = vsel %vm1163_vm3, %v5716_v40, -inf }
 0x1fb   : > { %1180 = vmax.xlane.f32.xlu1 %v1179_v42  ;;  %v1182_v44 = vsel %vm1163_vm3, %v5718_v41, -inf }
 0x1fc   : > { %1183 = vmax.xlane.f32.xlu0 %v1182_v44 }
 0x1ff   : > { %1186 = vmax.xlane.f32.xlu1 %v1185_v45 }
 0x27d   : > { %v1166_v46 = vpop.xlane.xlu0 %1165 }
 0x27e   : > { %v1188_v47 = vsub.f32 %v1124_v36, %v1166_v46 }
 0x280   : > { %v1196_v48 = vmul.f32 1.442695, %v1188_v47  ;;  %v1175_v32 = vpop.xlane.xlu1 %1174 }
 0x281   : > { %v1169_v49 = vpop.xlane.xlu0 %1168 }
 0x282   : > { %5188 = vpow2.f32 %v1196_v48  ;;  %v1189_v50 = vsub.f32 %v4511_v23, %v1169_v49  ;;  %v1191_v23 = vsub.f32 %v5701_v37, %v1175_v32 }
 0x284   : > { %v1198_v51 = vmul.f32 1.442695, %v1189_v50  ;;  %v1172_v33 = vpop.xlane.xlu1 %1171  ;;  %v1202_v17 = vmul.f32 1.442695, %v1191_v23 }
 0x285   : > { %v1190_v34 = vsub.f32 %v5705_v31, %v1172_v33  ;;  %v1178_v35 = vpop.xlane.xlu0 %1177 }
 0x286   : > { %5190 = vpow2.f32 %v1198_v51  ;;  %v1192_v27 = vsub.f32 %v5712_v38, %v1178_v35 }
 0x287   : > { %v1200_v36 = vmul.f32 1.442695, %v1190_v34 }
 0x288   : > { %v1181_v16 = vpop.xlane.xlu1 %1180  ;;  %v1204_v18 = vmul.f32 1.442695, %v1192_v27 }
 0x289   : > { %5192 = vpow2.f32 %v1200_v36  ;;  %v1193_v39 = vsub.f32 %v5710_v25, %v1181_v16  ;;  %v1184_v50 = vpop.xlane.xlu0 %1183 }
 0x28a   : > { %5194 = vpow2.f32 %v1202_v17  ;;  %v1194_v51 = vsub.f32 %v5718_v41, %v1184_v50 }
 0x28b   : > { %5196 = vpow2.f32 %v1204_v18  ;;  %v1206_v42 = vmul.f32 1.442695, %v1193_v39 }
 0x28c   : > { %v5733_v62 = vpop.eup %5188  ;;  %v1187_v48 = vpop.xlane.xlu1 %1186  ;;  %v1208_v54 = vmul.f32 1.442695, %v1194_v51 }
 0x28d   : > { %v1212_v1 = vsel %vm1163_vm3, %v5733_v62, 0.0  ;;  %5198 = vpow2.f32 %v1206_v42  ;;  %v1195_v49 = vsub.f32 %v5716_v40, %v1187_v48 }
 0x28e   : > { %1213 = vadd.xlane.f32.xlu0 %v1212_v1 }
 0x28f   : > { %v1210_v53 = vmul.f32 1.442695, %v1195_v49 }
 0x290   : > { %v5739_v4 = vpop.eup %5190 }
 0x291   : > { %v1215_v5 = vsel %vm1163_vm3, %v5739_v4, 0.0  ;;  %5200 = vpow2.f32 %v1210_v53 }
 0x292   : > { %1216 = vadd.xlane.f32.xlu1 %v1215_v5  ;;  %5202 = vpow2.f32 %v1208_v54 }
 0x293   : > { %v5769_v44 = vpop.eup %5192 }
 0x294   : > { %v5771_v45 = vpop.eup %5194  ;;  %v1218_v37 = vsel %vm1163_vm3, %v5769_v44, 0.0 }
 0x295   : > { %v5775_v31 = vpop.eup %5196  ;;  %v1221_v38 = vsel %vm1163_vm3, %v5771_v45, 0.0 }
 0x296   : > { %v1224_v25 = vsel %vm1163_vm3, %v5775_v31, 0.0 }
 0x297   : > { %v5781_v46 = vpop.eup %5198 }
 0x298   : > { %v1227_v47 = vsel %vm1163_vm3, %v5781_v46, 0.0 }
 0x29b   : > { %v5809_v40 = vpop.eup %5200 }
 0x29c   : > { %v1233_v41 = vsel %vm1163_vm3, %v5809_v40, 0.0  ;;  %v5815_v57 = vpop.eup %5202 }
 0x29d   : > { %v1230_v59 = vsel %vm1163_vm3, %v5815_v57, 0.0 }
 0x2a3   : > { %5074 = vrot.lane.b32.xlu1 %v5628_v61, %s5396_s29 }
 0x2a4   : > { %5069 = vrot.lane.b32.xlu0 %v5622_v55, %s5396_s29 }
 0x2c3   : > { %1219 = vadd.xlane.f32.xlu0 %v1218_v37 }
 0x2c7   : > { %1222 = vadd.xlane.f32.xlu1 %v1221_v38  ;;  %1225 = vadd.xlane.f32.xlu0 %v1224_v25 }
 0x2cb   : > { %1228 = vadd.xlane.f32.xlu1 %v1227_v47 }
 0x2dc   : > { %5084 = vrot.lane.b32.xlu1 %v5638_v8, %s5396_s29 }
 0x2dd   : > { %5079 = vrot.lane.b32.xlu0 %v5632_v3, %s5396_s29 }
 0x2e0   : > { %1383 = vrot.lane.b32.xlu1 %v5648_v13, %s5396_s29 }
 0x2e1   : > { %1381 = vrot.lane.b32.xlu0 %v5609_v43, %s5396_s29 }
 0x2e5   : > { %1385 = vrot.lane.b32.xlu0 %v5646_v12, %s5396_s29 }
 0x2e9   : > { %1389 = vrot.lane.b32.xlu0 %v5656_v20, %s5396_s29 }
 0x2ed   : > { %1393 = vrot.lane.b32.xlu0 %v5664_v26, %s5396_s29 }
 0x2f1   : > { %5089 = vrot.lane.b32.xlu0 %v5622_v55, %s5397_s20 }
 0x2f5   : > { %5099 = vrot.lane.b32.xlu0 %v5632_v3, %s5397_s20 }
 0x2f9   : > { %2057 = vrot.lane.b32.xlu0 %v5609_v43, %s5397_s20 }
 0x2fd   : > { %2061 = vrot.lane.b32.xlu0 %v5646_v12, %s5397_s20 }
 0x301   : > { %2065 = vrot.lane.b32.xlu0 %v5656_v20, %s5397_s20 }
 0x304   : > { %1234 = vadd.xlane.f32.xlu1 %v1233_v41 }
 0x305   : > { %2069 = vrot.lane.b32.xlu0 %v5664_v26, %s5397_s20 }
 0x308   : > { %1231 = vadd.xlane.f32.xlu1 %v1230_v59 }
 0x319   : > { %1387 = vrot.lane.b32.xlu1 %v5650_v15, %s5396_s29 }
 0x31b   : > { %v1214_v60 = vpop.xlane.xlu0 %1213 }
 0x31c   : > { %5204 = vrcp.f32 %v1214_v60 }
 0x31d   : > { %1391 = vrot.lane.b32.xlu1 %v5662_v22, %s5396_s29 }
 0x31f   : > { %v1217_v63 = vpop.xlane.xlu1 %1216  ;;  %v5070_v0 = vpop.permute.xlu0 %5069 }
 0x320   : > { %5206 = vrcp.f32 %v1217_v63  ;;  %v5072_v1 = vunpack.i.h.bf16 %v5070_v0  ;;  %v5071_v2 = vunpack.i.l.bf16 %v5070_v0 }
 0x321   : > { %1395 = vrot.lane.b32.xlu1 %v5670_v28, %s5396_s29 }
 0x322   : > { %v4885_v5 = vpack.c.bf16 %v5072_v1, %v5071_v2 }
 0x323   : > { %v5075_v14 = vpop.permute.xlu1 %5074 }
 0x324   : > { %4887 = vmatprep.subr.msk.bf16.mxu0 %vm5618_vm2, %v4885_v5  ;;  %v5077_v24 = vunpack.i.h.bf16 %v5075_v14  ;;  %v5076_v30 = vunpack.i.l.bf16 %v5075_v14 }
 0x325   : > { %5094 = vrot.lane.b32.xlu1 %v5628_v61, %s5397_s20 }
 0x326   : > { %v5205_v11 = vpop.eup %5204  ;;  %v4891_v34 = vpack.c.bf16 %v5077_v24, %v5076_v30 }
 0x327   : > { %v1237_v19 = vmul.f32 %v5205_v11, %v5733_v62 }
 0x329   : > { %5104 = vrot.lane.b32.xlu1 %v5638_v8, %s5397_s20  ;;  %4537 = vmatprep.mubr.msk.f32.mxu0 %vm1163_vm3, %v1237_v19 }
 0x32a   : > { %v5207_v32 = vpop.eup %5206 }
 0x32b   : > { %v1239_v33 = vmul.f32 %v5207_v32, %v5739_v4 }
 0x32d   : > { %2059 = vrot.lane.b32.xlu1 %v5648_v13, %s5397_s20  ;;  %4538 = vmatmul.mubr.msk.f32.vlgmr.msra.gmra.mrb[12].mxu0 %vm1163_vm3, %v1239_v33 }
 0x32e   : > { %4890 = vmatpush3.bf16.xpose.msk.msra.mxu0 %vm5618_vm2, %v4885_v5 }
 0x32f   : > { %4893 = vmatprep.subr.msk.bf16.mxu0 %vm5618_vm2, %v4891_v34 }
 0x331   : > { %2063 = vrot.lane.b32.xlu1 %v5650_v15, %s5397_s20 }
 0x335   : > { %2067 = vrot.lane.b32.xlu1 %v5662_v22, %s5397_s20 }
 0x336   : > { %4896 = vmatpush3.bf16.xpose.msk.msra.mxu0 %vm5618_vm2, %v4891_v34 }
 0x339   : > { %2071 = vrot.lane.b32.xlu1 %v5670_v28, %s5397_s20 }
 0x350   : > { %v1220_v62 = vpop.xlane.xlu0 %1219 }
 0x351   : > { %5208 = vrcp.f32 %v1220_v62 }
 0x354   : > { %v1223_v4 = vpop.xlane.xlu1 %1222  ;;  %v1226_v35 = vpop.xlane.xlu0 %1225 }
 0x355   : > { %5210 = vrcp.f32 %v1223_v4 }
 0x356   : > { %5212 = vrcp.f32 %v1226_v35 }
 0x358   : > { %v1229_v23 = vpop.xlane.xlu1 %1228  ;;  %v5080_v36 = vpop.permute.xlu0 %5079 }
 0x359   : > { %5214 = vrcp.f32 %v1229_v23  ;;  %v5082_v27 = vunpack.i.h.bf16 %v5080_v36  ;;  %v5081_v16 = vunpack.i.l.bf16 %v5080_v36 }
 0x35b   : > { %v5209_v17 = vpop.eup %5208  ;;  %v4897_v18 = vpack.c.bf16 %v5082_v27, %v5081_v16 }
 0x35c   : > { %v5085_v39 = vpop.permute.xlu1 %5084  ;;  %v1382_v42 = vpop.permute.xlu0 %1381  ;;  %v1241_v37 = vmul.f32 %v5209_v17, %v5769_v44 }
 0x35d   : > { %v5087_v38 = vunpack.i.h.bf16 %v5085_v39  ;;  %v5086_v25 = vunpack.i.l.bf16 %v5085_v39  ;;  %4899 = vmatprep.subr.msk.bf16.mxu0 %vm5618_vm2, %v4897_v18 }
 0x35e   : > { %4540 = vmatprep.mubr.msk.f32.mxu0 %vm1163_vm3, %v1241_v37  ;;  %4902 = vmatpush3.bf16.xpose.msk.msra.mxu0 %vm5618_vm2, %v4897_v18 }
 0x35f   : > { %v5211_v47 = vpop.eup %5210  ;;  %v4903_v48 = vpack.c.bf16 %v5087_v38, %v5086_v25 }
 0x360   : > { %v5213_v49 = vpop.eup %5212  ;;  %v1386_v50 = vpop.permute.xlu0 %1385  ;;  %v1243_v51 = vmul.f32 %v5211_v47, %v5771_v45 }
 0x361   : > { %4905 = vmatprep.subr.msk.bf16.mxu0 %vm5618_vm2, %v4903_v48  ;;  %v1245_v44 = vmul.f32 %v5213_v49, %v5775_v31  ;;  %v1384_v31 = vpop.permute.xlu1 %1383 }
 0x362   : > { %4541 = vmatmul.mubr.msk.f32.gmra.mrb[14].mxu0 %vm1163_vm3, %v1243_v51 }
 0x363   : > { %v5215_v53 = vpop.eup %5214  ;;  %4543 = vmatprep.mubr.msk.f32.mxu0 %vm1163_vm3, %v1245_v44 }
 0x364   : > { %v1390_v54 = vpop.permute.xlu0 %1389  ;;  %v1247_v41 = vmul.f32 %v5215_v53, %v5781_v46 }
 0x366   : > { %4544 = vmatmul.mubr.msk.f32.gmra.mrb[16].mxu0 %vm1163_vm3, %v1247_v41 }
 0x367   : > { %4908 = vmatpush3.bf16.xpose.msk.msra.mxu0 %vm5618_vm2, %v4903_v48 }
 0x368   : > { %v1394_v59 = vpop.permute.xlu0 %1393 }
 0x36c   : > { %v5090_v45 = vpop.permute.xlu0 %5089 }
 0x36d   : > { %v5092_v60 = vunpack.i.h.bf16 %v5090_v45  ;;  %v5091_v63 = vunpack.i.l.bf16 %v5090_v45 }
 0x36f   : > { %v4925_v0 = vpack.c.bf16 %v5092_v60, %v5091_v63 }
 0x370   : > { %v5100_v4 = vpop.permute.xlu0 %5099 }
 0x371   : > { %4927 = vmatprep.subr.msk.bf16.mxu0 %vm5618_vm2, %v4925_v0 }
 0x374   : > { %v2058_v36 = vpop.permute.xlu0 %2057 }
 0x378   : > { %v2062_v39 = vpop.permute.xlu0 %2061 }
 0x37c   : > { %v2066_v37 = vpop.permute.xlu0 %2065 }
 0x380   : > { %v2070_v25 = vpop.permute.xlu0 %2069 }
 0x391   : > { %v1235_v1 = vpop.xlane.xlu1 %1234 }
 0x392   : > { %5216 = vrcp.f32 %v1235_v1 }
 0x395   : > { %v1232_v2 = vpop.xlane.xlu1 %1231 }
 0x396   : > { %5218 = vrcp.f32 %v1232_v2 }
 0x399   : > { %v1388_v5 = vpop.permute.xlu1 %1387 }
 0x39c   : > { %v5217_v11 = vpop.eup %5216 }
 0x39d   : > { %v1392_v46 = vpop.permute.xlu1 %1391  ;;  %v1251_v30 = vmul.f32 %v5217_v11, %v5809_v40  ;;  %v5102_v40 = vunpack.i.h.bf16 %v5100_v4 }
 0x3a0   : > { %v5219_v14 = vpop.eup %5218 }
 0x3a1   : > { %v1396_v19 = vpop.permute.xlu1 %1395  ;;  %v1249_v24 = vmul.f32 %v5219_v14, %v5815_v57  ;;  %v5101_v57 = vunpack.i.l.bf16 %v5100_v4 }
 0x3a3   : > { %4546 = vmatprep.mubr.msk.f32.mxu0 %vm1163_vm3, %v1249_v24  ;;  %v4937_v35 = vpack.c.bf16 %v5102_v40, %v5101_v57  ;;  %v5943_v57 = vpack.i.bf16 %v5729_v56, %v5731_v58 }
 0x3a4   : > { %4547 = vmatmul.mubr.msk.f32.gmra.mrb[18].mxu0 %vm1163_vm3, %v1251_v30 }
 0x3a5   : > { %v5095_v32 = vpop.permute.xlu1 %5094  ;;  %4565 = vmatprep.mubr.msk.f32.mxu0 %vm1009_vm1, %v1382_v42 }
 0x3a6   : > { %v5097_v33 = vunpack.i.h.bf16 %v5095_v32  ;;  %v5096_v34 = vunpack.i.l.bf16 %v5095_v32 }
 0x3a8   : > { %v4931_v62 = vpack.c.bf16 %v5097_v33, %v5096_v34  ;;  %4566 = vmatmul.mubr.msk.f32.vlgmr.msra.gmra.mrb[20].mxu0 %vm1009_vm1, %v1384_v31  ;;  %v5929_v33 = vpack.i.bf16 %v5743_v6, %v5745_v7 }
 0x3a9   : > { %4930 = vmatpush3.bf16.xpose.msk.msra.mxu0 %vm5618_vm2, %v4925_v0  ;;  %4568 = vmatprep.mubr.msk.f32.mxu0 %vm1009_vm1, %v1386_v50  ;;  %v5105_v23 = vpop.permute.xlu1 %5104 }
 0x3aa   : > { %4933 = vmatprep.subr.msk.bf16.mxu0 %vm5618_vm2, %v4931_v62  ;;  %v5107_v27 = vunpack.i.h.bf16 %v5105_v23  ;;  %v5106_v16 = vunpack.i.l.bf16 %v5105_v23 }
 0x3ac   : > { %4569 = vmatmul.mubr.msk.f32.gmra.mrb[22].mxu0 %vm1009_vm1, %v1388_v5  ;;  %v4943_v17 = vpack.c.bf16 %v5107_v27, %v5106_v16 }
 0x3ad   : > { %4571 = vmatprep.mubr.msk.f32.mxu0 %vm1009_vm1, %v1390_v54  ;;  %v2060_v18 = vpop.permute.xlu1 %2059 }
 0x3b0   : > { %4572 = vmatmul.mubr.msk.f32.gmra.mrb[24].mxu0 %vm1009_vm1, %v1392_v46 }
 0x3b1   : > { %4936 = vmatpush3.bf16.xpose.msk.msra.mxu0 %vm5618_vm2, %v4931_v62  ;;  %4574 = vmatprep.mubr.msk.f32.mxu0 %vm1009_vm1, %v1394_v59  ;;  %v2064_v42 = vpop.permute.xlu1 %2063 }
 0x3b2   : > { %4939 = vmatprep.subr.msk.bf16.mxu0 %vm5618_vm2, %v4937_v35 }
 0x3b4   : > { %4575 = vmatmul.mubr.msk.f32.gmra.mrb[26].mxu0 %vm1009_vm1, %v1396_v19 }
 0x3b5   : > { %4649 = vmatprep.mubr.msk.f32.mxu0 %vm1009_vm1, %v2058_v36  ;;  %v2068_v38 = vpop.permute.xlu1 %2067 }
 0x3b9   : > { %4942 = vmatpush3.bf16.xpose.msk.msra.mxu0 %vm5618_vm2, %v4937_v35  ;;  %v2072_v47 = vpop.permute.xlu1 %2071 }
 0x3ba   : > { %4945 = vmatprep.subr.msk.bf16.mxu0 %vm5618_vm2, %v4943_v17 }
 0x3c1   : > { %4948 = vmatpush3.bf16.xpose.msk.msra.mxu0 %vm5618_vm2, %v4943_v17 }
 0x3c8   : > { %4650 = vmatmul.mubr.msk.f32.vlgmr.msra.gmra.mrb[28].mxu0 %vm1009_vm1, %v2060_v18 }
 0x3c9   : > { %4652 = vmatprep.mubr.msk.f32.mxu0 %vm1009_vm1, %v2062_v39 }
 0x3cc   : > { %4653 = vmatmul.mubr.msk.f32.gmra.mrb[30].mxu0 %vm1009_vm1, %v2064_v42 }
 0x3cd   : > { %4655 = vmatprep.mubr.msk.f32.mxu0 %vm1009_vm1, %v2066_v37 }
 0x3d0   : > { %4656 = vmatmul.mubr.msk.f32.gmra.mrb[32].mxu0 %vm1009_vm1, %v2068_v38 }
 0x3d1   : > { %4658 = vmatprep.mubr.msk.f32.mxu0 %vm1009_vm1, %v2070_v25 }
 0x3d4   : > { %4659 = vmatmul.mubr.msk.f32.gmra.mrb[34].mxu0 %vm1009_vm1, %v2072_v47 }
 0x400   : > { %v5903_v48 = vpop.f32.mrb[12].mxu0 }
 0x401   : > { %v5905_v49 = vpop.f32.mrb[13].mxu0 }
 0x435   : > { %v5907_v50 = vpop.f32.mrb[14].mxu0 }
 0x436   : > { %v5909_v51 = vpop.f32.mrb[15].mxu0 }
 0x439   : > { %v5911_v44 = vpop.f32.mrb[16].mxu0 }
 0x43a   : > { %v5913_v53 = vpop.f32.mrb[17].mxu0 }
 0x477   : > { %v5915_v54 = vpop.f32.mrb[18].mxu0 }
 0x478   : > { %v5917_v41 = vpop.f32.mrb[19].mxu0 }
 0x47b   : > { %v4567_v59 = vpop.f32.mrb[20].mxu0 }
 0x47c   : > { %v1511_v45 = vpop.f32.mrb[21].mxu0  ;;  %v1553_v60 = vsel %vm1163_vm3, %v4567_v59, -inf }
 0x47d   : > { %1554 = vmax.xlane.f32.xlu1 %v1553_v60  ;;  %v1550_v63 = vsel %vm1163_vm3, %v1511_v45, -inf }
 0x47e   : > { %1551 = vmax.xlane.f32.xlu0 %v1550_v63 }
 0x47f   : > { %v4570_v0 = vpop.f32.mrb[22].mxu0 }
 0x480   : > { %v1521_v31 = vpop.f32.mrb[23].mxu0  ;;  %v1559_v1 = vsel %vm1163_vm3, %v4570_v0, -inf }
 0x481   : > { %v1556_v11 = vsel %vm1163_vm3, %v1521_v31, -inf }
 0x482   : > { %1560 = vmax.xlane.f32.xlu0 %v1559_v1 }
 0x483   : > { %v4573_v2 = vpop.f32.mrb[24].mxu0 }
 0x484   : > { %v1531_v5 = vpop.f32.mrb[25].mxu0  ;;  %v1565_v46 = vsel %vm1163_vm3, %v4573_v2, -inf }
 0x485   : > { %1566 = vmax.xlane.f32.xlu1 %v1565_v46  ;;  %v1562_v30 = vsel %vm1163_vm3, %v1531_v5, -inf }
 0x486   : > { %1557 = vmax.xlane.f32.xlu0 %v1556_v11 }
 0x487   : > { %v4576_v14 = vpop.f32.mrb[26].mxu0 }
 0x488   : > { %v1541_v19 = vpop.f32.mrb[27].mxu0  ;;  %v1571_v24 = vsel %vm1163_vm3, %v4576_v14, -inf }
 0x489   : > { %1572 = vmax.xlane.f32.xlu1 %v1571_v24  ;;  %v1568_v32 = vsel %vm1163_vm3, %v1541_v19, -inf }
 0x48a   : > { %1563 = vmax.xlane.f32.xlu0 %v1562_v30 }
 0x48e   : > { %1569 = vmax.xlane.f32.xlu0 %v1568_v32 }
 0x49a   : > { %5114 = vrot.lane.b32.xlu1 %v5929_v33, %s5396_s29 }
 0x49b   : > { %v5933_v34 = vpop.f32.mrb[28].mxu0 }
 0x49c   : > { %v5935_v62 = vpop.f32.mrb[29].mxu0 }
 0x49f   : > { %v5937_v4 = vpop.f32.mrb[30].mxu0 }
 0x4a0   : > { %v5939_v40 = vpop.f32.mrb[31].mxu0 }
 0x4a3   : > { %v5945_v35 = vpop.f32.mrb[32].mxu0 }
 0x4a4   : > { %v5947_v23 = vpop.f32.mrb[33].mxu0  ;;  %5109 = vrot.lane.b32.xlu0 %v5943_v57, %s5396_s29 }
 0x4a7   : > { %v5951_v6 = vpop.f32.mrb[34].mxu0 }
 0x4a8   : > { %v5953_v7 = vpop.f32.mrb[35].mxu0 }
 0x50a   : > { %v1555_v36 = vpop.xlane.xlu1 %1554 }
 0x50b   : > { %v1575_v27 = vsub.f32 %v4567_v59, %v1555_v36  ;;  %v1552_v16 = vpop.xlane.xlu0 %1551 }
 0x50c   : > { %v1574_v17 = vsub.f32 %v1511_v45, %v1552_v16 }
 0x50d   : > { %v1584_v18 = vmul.f32 1.442695, %v1575_v27 }
 0x50e   : > { %v1582_v39 = vmul.f32 1.442695, %v1574_v17 }
 0x50f   : > { %5220 = vpow2.f32 %v1584_v18  ;;  %v1561_v56 = vpop.xlane.xlu0 %1560 }
 0x510   : > { %5222 = vpow2.f32 %v1582_v39  ;;  %v1577_v58 = vsub.f32 %v4570_v0, %v1561_v56 }
 0x512   : > { %v1588_v42 = vmul.f32 1.442695, %v1577_v58  ;;  %v1567_v37 = vpop.xlane.xlu1 %1566 }
 0x513   : > { %v1579_v38 = vsub.f32 %v4573_v2, %v1567_v37  ;;  %v1558_v25 = vpop.xlane.xlu0 %1557 }
 0x514   : > { %5224 = vpow2.f32 %v1588_v42  ;;  %v1576_v47 = vsub.f32 %v1521_v31, %v1558_v25 }
 0x515   : > { %v1592_v60 = vmul.f32 1.442695, %v1579_v38 }
 0x516   : > { %v1586_v63 = vmul.f32 1.442695, %v1576_v47  ;;  %v1573_v1 = vpop.xlane.xlu1 %1572 }
 0x517   : > { %5226 = vpow2.f32 %v1592_v60  ;;  %v1581_v46 = vsub.f32 %v4576_v14, %v1573_v1  ;;  %v1564_v59 = vpop.xlane.xlu0 %1563 }
 0x518   : > { %5228 = vpow2.f32 %v1586_v63  ;;  %v1578_v45 = vsub.f32 %v1531_v5, %v1564_v59 }
 0x519   : > { %v5955_v11 = vpop.eup %5220  ;;  %v1596_v24 = vmul.f32 1.442695, %v1581_v46 }
 0x51a   : > { %v5957_v30 = vpop.eup %5222  ;;  %v1590_v0 = vmul.f32 1.442695, %v1578_v45  ;;  %v1601_v2 = vsel %vm1163_vm3, %v5955_v11, 0.0  ;;  %v5115_v5 = vpop.permute.xlu1 %5114 }
 0x51b   : > { %5230 = vpow2.f32 %v1596_v24  ;;  %1602 = vadd.xlane.f32.xlu1 %v1601_v2  ;;  %v1570_v31 = vpop.xlane.xlu0 %1569  ;;  %v1598_v32 = vsel %vm1163_vm3, %v5957_v30, 0.0  ;;  %v5117_v58 = vunpack.i.h.bf16 %v5115_v5  ;;  %v5116_v42 = vunpack.i.l.bf16 %v5115_v5 }
 0x51c   : > { %5232 = vpow2.f32 %v1590_v0  ;;  %v1580_v14 = vsub.f32 %v1541_v19, %v1570_v31  ;;  %1599 = vadd.xlane.f32.xlu0 %v1598_v32  ;;  %v5989_v24 = vpack.i.bf16 %v5755_v21, %v5757_v29  ;;  %v5993_v0 = vpack.i.bf16 %v5747_v9, %v5749_v10 }
 0x51d   : > { %v4913_v60 = vpack.c.bf16 %v5117_v58, %v5116_v42 }
 0x51e   : > { %v5963_v36 = vpop.eup %5224  ;;  %v1594_v27 = vmul.f32 1.442695, %v1580_v14 }
 0x51f   : > { %v5110_v16 = vpop.permute.xlu0 %5109  ;;  %v1607_v17 = vsel %vm1163_vm3, %v5963_v36, 0.0 }
 0x520   : > { %5234 = vpow2.f32 %v1594_v27  ;;  %v5112_v18 = vunpack.i.h.bf16 %v5110_v16  ;;  %v5111_v39 = vunpack.i.l.bf16 %v5110_v16  ;;  %1608 = vadd.xlane.f32.xlu1 %v1607_v17 }
 0x521   : > { %v5967_v56 = vpop.eup %5226 }
 0x522   : > { %v5969_v37 = vpop.eup %5228  ;;  %v4909_v19 = vpack.c.bf16 %v5112_v18, %v5111_v39  ;;  %v1613_v38 = vsel %vm1163_vm3, %v5967_v56, 0.0 }
 0x523   : > { %v1604_v25 = vsel %vm1163_vm3, %v5969_v37, 0.0 }
 0x524   : > { %1614 = vadd.xlane.f32.xlu1 %v1613_v38  ;;  %1605 = vadd.xlane.f32.xlu0 %v1604_v25 }
 0x525   : > { %v5975_v47 = vpop.eup %5230  ;;  %4910 = vmatprep.subr.bf16.mxu1 %v4909_v19 }
 0x526   : > { %v5977_v63 = vpop.eup %5232  ;;  %4912 = vmatpush3.bf16.msra.mxu1 %v4909_v19  ;;  %v1619_v1 = vsel %vm1163_vm3, %v5975_v47, 0.0 }
 0x527   : > { %4914 = vmatprep.subr.bf16.mxu1 %v4913_v60  ;;  %v1610_v46 = vsel %vm1163_vm3, %v5977_v63, 0.0 }
 0x528   : > { %1620 = vadd.xlane.f32.xlu1 %v1619_v1  ;;  %1611 = vadd.xlane.f32.xlu0 %v1610_v46 }
 0x52a   : > { %v5983_v59 = vpop.eup %5234  ;;  %4916 = vmatpush3.bf16.msra.mxu1 %v4913_v60 }
 0x52b   : > { %v1616_v45 = vsel %vm1163_vm3, %v5983_v59, 0.0 }
 0x52c   : > { %1617 = vadd.xlane.f32.xlu1 %v1616_v45 }
 0x53d   : > { %5124 = vrot.lane.b32.xlu1 %v5989_v24, %s5396_s29 }
 0x53e   : > { %5119 = vrot.lane.b32.xlu0 %v5993_v0, %s5396_s29 }
 0x541   : > { %5134 = vrot.lane.b32.xlu1 %v5628_v61, %s5398_s21  ;;  %v2229_v61 = vsel %vm1163_vm3, %v5933_v34, -inf }
 0x542   : > { %5129 = vrot.lane.b32.xlu0 %v5622_v55, %s5398_s21  ;;  %v2232_v55 = vsel %vm1163_vm3, %v5939_v40, -inf }
 0x545   : > { %5144 = vrot.lane.b32.xlu1 %v5638_v8, %s5398_s21  ;;  %v2241_v8 = vsel %vm1163_vm3, %v5945_v35, -inf }
 0x546   : > { %5139 = vrot.lane.b32.xlu0 %v5632_v3, %s5398_s21  ;;  %v2235_v3 = vsel %vm1163_vm3, %v5937_v4, -inf }
 0x549   : > { %2606 = vrot.lane.b32.xlu1 %v5648_v13, %s5398_s21  ;;  %v2247_v13 = vsel %vm1163_vm3, %v5951_v6, -inf }
 0x54a   : > { %2604 = vrot.lane.b32.xlu0 %v5609_v43, %s5398_s21  ;;  %v2226_v43 = vsel %vm1163_vm3, %v5935_v62, -inf }
 0x54d   : > { %2610 = vrot.lane.b32.xlu1 %v5650_v15, %s5398_s21  ;;  %v2244_v15 = vsel %vm1163_vm3, %v5953_v7, -inf }
 0x54e   : > { %2608 = vrot.lane.b32.xlu0 %v5646_v12, %s5398_s21  ;;  %v2238_v12 = vsel %vm1163_vm3, %v5947_v23, -inf }
 0x551   : > { %2614 = vrot.lane.b32.xlu1 %v5662_v22, %s5398_s21 }
 0x552   : > { %2612 = vrot.lane.b32.xlu0 %v5656_v20, %s5398_s21 }
 0x555   : > { %2618 = vrot.lane.b32.xlu1 %v5670_v28, %s5398_s21 }
 0x556   : > { %2616 = vrot.lane.b32.xlu0 %v5664_v26, %s5398_s21 }
 0x575   : > { %2227 = vmax.xlane.f32.xlu0 %v2226_v43 }
 0x579   : > { %2233 = vmax.xlane.f32.xlu0 %v2232_v55  ;;  %2230 = vmax.xlane.f32.xlu1 %v2229_v61 }
 0x57d   : > { %2236 = vmax.xlane.f32.xlu0 %v2235_v3  ;;  %2242 = vmax.xlane.f32.xlu1 %v2241_v8 }
 0x581   : > { %2239 = vmax.xlane.f32.xlu0 %v2238_v12  ;;  %2248 = vmax.xlane.f32.xlu1 %v2247_v13 }
 0x585   : > { %2245 = vmax.xlane.f32.xlu0 %v2244_v15 }
 0x592   : > { %5154 = vrot.lane.b32.xlu1 %v5929_v33, %s5397_s20 }
 0x59b   : > { %5149 = vrot.lane.b32.xlu0 %v5943_v57, %s5397_s20 }
 0x5a8   : > { %v1603_v20 = vpop.xlane.xlu1 %1602 }
 0x5a9   : > { %v1600_v22 = vpop.xlane.xlu0 %1599 }
 0x5aa   : > { %5236 = vrcp.f32 %v1600_v22 }
 0x5ab   : > { %5238 = vrcp.f32 %v1603_v20 }
 0x5ad   : > { %v1609_v26 = vpop.xlane.xlu1 %1608 }
 0x5b1   : > { %v1615_v28 = vpop.xlane.xlu1 %1614  ;;  %v1606_v9 = vpop.xlane.xlu0 %1605 }
 0x5b2   : > { %5240 = vrcp.f32 %v1606_v9 }
 0x5b3   : > { %5242 = vrcp.f32 %v1609_v26 }
 0x5b4   : > { %v5237_v10 = vpop.eup %5236 }
 0x5b5   : > { %v1621_v21 = vpop.xlane.xlu1 %1620  ;;  %v1612_v29 = vpop.xlane.xlu0 %1611  ;;  %v1623_v2 = vmul.f32 %v5237_v10, %v5957_v30 }
 0x5b6   : > { %5244 = vrcp.f32 %v1612_v29  ;;  %v5239_v38 = vpop.eup %5238 }
 0x5b7   : > { %4593 = vmatprep.mubr.msk.f32.mxu1 %vm1163_vm3, %v1623_v2  ;;  %5246 = vrcp.f32 %v1615_v28  ;;  %v1625_v43 = vmul.f32 %v5239_v38, %v5955_v11 }
 0x5b9   : > { %v1618_v31 = vpop.xlane.xlu1 %1617  ;;  %v5120_v32 = vpop.permute.xlu0 %5119 }
 0x5ba   : > { %v5122_v14 = vunpack.i.h.bf16 %v5120_v32  ;;  %v5121_v5 = vunpack.i.l.bf16 %v5120_v32  ;;  %5248 = vrcp.f32 %v1618_v31 }
 0x5bb   : > { %5250 = vrcp.f32 %v1621_v21 }
 0x5bc   : > { %v4917_v27 = vpack.c.bf16 %v5122_v14, %v5121_v5  ;;  %v5241_v1 = vpop.eup %5240 }
 0x5bd   : > { %v5125_v16 = vpop.permute.xlu1 %5124  ;;  %v5130_v17 = vpop.permute.xlu0 %5129  ;;  %v1627_v8 = vmul.f32 %v5241_v1, %v5969_v37 }
 0x5be   : > { %v5127_v18 = vunpack.i.h.bf16 %v5125_v16  ;;  %v5126_v39 = vunpack.i.l.bf16 %v5125_v16  ;;  %v5132_v58 = vunpack.i.h.bf16 %v5130_v17  ;;  %v5131_v42 = vunpack.i.l.bf16 %v5130_v17  ;;  %4918 = vmatprep.subr.bf16.mxu1 %v4917_v27  ;;  %v5243_v61 = vpop.eup %5242 }
 0x5bf   : > { %4920 = vmatpush3.bf16.msra.mxu1 %v4917_v27  ;;  %v1629_v20 = vmul.f32 %v5243_v61, %v5963_v36 }
 0x5c0   : > { %v4921_v30 = vpack.c.bf16 %v5127_v18, %v5126_v39  ;;  %v4965_v19 = vpack.c.bf16 %v5132_v58, %v5131_v42  ;;  %v5245_v12 = vpop.eup %5244 }
 0x5c1   : > { %v5135_v25 = vpop.permute.xlu1 %5134  ;;  %v5140_v60 = vpop.permute.xlu0 %5139  ;;  %v1631_v22 = vmul.f32 %v5245_v12, %v5977_v63 }
 0x5c2   : > { %v5137_v46 = vunpack.i.h.bf16 %v5135_v25  ;;  %v5136_v45 = vunpack.i.l.bf16 %v5135_v25  ;;  %4922 = vmatprep.subr.bf16.mxu1 %v4921_v30  ;;  %4967 = vmatprep.subr.msk.bf16.mxu0 %vm5618_vm2, %v4965_v19  ;;  %v5142_v13 = vunpack.i.h.bf16 %v5140_v60  ;;  %v5141_v15 = vunpack.i.l.bf16 %v5140_v60  ;;  %v5247_v11 = vpop.eup %5246 }
 0x5c3   : > { %4924 = vmatpush3.bf16.msra.mxu1 %v4921_v30  ;;  %4970 = vmatpush3.bf16.xpose.msk.msra.mxu0 %vm5618_vm2, %v4965_v19  ;;  %v1633_v9 = vmul.f32 %v5247_v11, %v5967_v56  ;;  %v997_v11 = vld [vmem:[%s6665_s8] sm:$0xff] }
 0x5c4   : > { %v4971_v55 = vpack.c.bf16 %v5137_v46, %v5136_v45  ;;  %v5249_v26 = vpop.eup %5248  ;;  %v4977_v28 = vpack.c.bf16 %v5142_v13, %v5141_v15 }
 0x5c5   : > { %v2605_v3 = vpop.permute.xlu0 %2604  ;;  %v5145_v37 = vpop.permute.xlu1 %5144  ;;  %v1635_v36 = vmul.f32 %v5249_v26, %v5983_v59 }
 0x5c6   : > { %4594 = vmatmul.mubr.msk.f32.vlgmr.msra.gmra.mrb[20].mxu1 %vm1163_vm3, %v1625_v43  ;;  %4973 = vmatprep.subr.msk.bf16.mxu0 %vm5618_vm2, %v4971_v55  ;;  %v5251_v10 = vpop.eup %5250  ;;  %v5147_v21 = vunpack.i.h.bf16 %v5145_v37  ;;  %v5146_v63 = vunpack.i.l.bf16 %v5145_v37 }
 0x5c7   : > { %4719 = vmatprep.mubr.msk.f32.mxu0 %vm1009_vm1, %v2605_v3  ;;  %4596 = vmatprep.mubr.msk.f32.mxu1 %vm1163_vm3, %v1627_v8  ;;  %v1637_v29 = vmul.f32 %v5251_v10, %v5975_v47 }
 0x5c8   : > { %v4983_v2 = vpack.c.bf16 %v5147_v21, %v5146_v63 }
 0x5c9   : > { %v2607_v56 = vpop.permute.xlu1 %2606  ;;  %v2609_v59 = vpop.permute.xlu0 %2608 }
 0x5ca   : > { %4597 = vmatmul.mubr.msk.f32.gmra.mrb[22].mxu1 %vm1163_vm3, %v1629_v20 }
 0x5cb   : > { %4599 = vmatprep.mubr.msk.f32.mxu1 %vm1163_vm3, %v1631_v22  ;;  %4976 = vmatpush3.bf16.xpose.msk.msra.mxu0 %vm5618_vm2, %v4971_v55 }
 0x5cc   : > { %4979 = vmatprep.subr.msk.bf16.mxu0 %vm5618_vm2, %v4977_v28 }
 0x5cd   : > { %v2611_v31 = vpop.permute.xlu1 %2610  ;;  %v2613_v47 = vpop.permute.xlu0 %2612 }
 0x5ce   : > { %4600 = vmatmul.mubr.msk.f32.gmra.mrb[24].mxu1 %vm1163_vm3, %v1633_v9 }
 0x5cf   : > { %4602 = vmatprep.mubr.msk.f32.mxu1 %vm1163_vm3, %v1635_v36 }
 0x5d1   : > { %v2615_v32 = vpop.permute.xlu1 %2614  ;;  %v2617_v14 = vpop.permute.xlu0 %2616 }
 0x5d2   : > { %4603 = vmatmul.mubr.msk.f32.gmra.mrb[26].mxu1 %vm1163_vm3, %v1637_v29 }
 0x5d3   : > { %4982 = vmatpush3.bf16.xpose.msk.msra.mxu0 %vm5618_vm2, %v4977_v28 }
 0x5d4   : > { %4985 = vmatprep.subr.msk.bf16.mxu0 %vm5618_vm2, %v4983_v2 }
 0x5d5   : > { %v2619_v5 = vpop.permute.xlu1 %2618 }
 0x5db   : > { %4988 = vmatpush3.bf16.xpose.msk.msra.mxu0 %vm5618_vm2, %v4983_v2 }
 0x5e2   : > { %4720 = vmatmul.mubr.msk.f32.vlgmr.msra.gmra.mrb[36].mxu0 %vm1009_vm1, %v2607_v56 }
 0x5e3   : > { %4722 = vmatprep.mubr.msk.f32.mxu0 %vm1009_vm1, %v2609_v59 }
 0x5e6   : > { %4723 = vmatmul.mubr.msk.f32.gmra.mrb[38].mxu0 %vm1009_vm1, %v2611_v31 }
 0x5e7   : > { %4725 = vmatprep.mubr.msk.f32.mxu0 %vm1009_vm1, %v2613_v47 }
 0x5ea   : > { %4726 = vmatmul.mubr.msk.f32.gmra.mrb[40].mxu0 %vm1009_vm1, %v2615_v32 }
 0x5eb   : > { %4728 = vmatprep.mubr.msk.f32.mxu0 %vm1009_vm1, %v2617_v14 }
 0x5ee   : > { %4729 = vmatmul.mubr.msk.f32.gmra.mrb[42].mxu0 %vm1009_vm1, %v2619_v5 }
 0x602   : > { %v2228_v52 = vpop.xlane.xlu0 %2227 }
 0x603   : > { %v2250_v27 = vsub.f32 %v5935_v62, %v2228_v52 }
 0x605   : > { %v2258_v16 = vmul.f32 1.442695, %v2250_v27 }
 0x606   : > { %v2231_v17 = vpop.xlane.xlu1 %2230  ;;  %v2234_v18 = vpop.xlane.xlu0 %2233 }
 0x607   : > { %5252 = vpow2.f32 %v2258_v16  ;;  %v2251_v39 = vsub.f32 %v5933_v34, %v2231_v17  ;;  %v2252_v58 = vsub.f32 %v5939_v40, %v2234_v18 }
 0x609   : > { %v2260_v42 = vmul.f32 1.442695, %v2251_v39  ;;  %v2262_v30 = vmul.f32 1.442695, %v2252_v58 }
 0x60a   : > { %v2243_v19 = vpop.xlane.xlu1 %2242  ;;  %v2237_v38 = vpop.xlane.xlu0 %2236 }
 0x60b   : > { %5254 = vpow2.f32 %v2260_v42  ;;  %v2255_v25 = vsub.f32 %v5945_v35, %v2243_v19  ;;  %v2253_v60 = vsub.f32 %v5937_v4, %v2237_v38 }
 0x60c   : > { %5256 = vpow2.f32 %v2262_v30 }
 0x60d   : > { %v2264_v1 = vmul.f32 1.442695, %v2253_v60  ;;  %v2268_v62 = vmul.f32 1.442695, %v2255_v25 }
 0x60e   : > { %v2249_v46 = vpop.xlane.xlu1 %2248  ;;  %v2240_v45 = vpop.xlane.xlu0 %2239 }
 0x60f   : > { %v2257_v43 = vsub.f32 %v5951_v6, %v2249_v46  ;;  %v2254_v34 = vsub.f32 %v5947_v23, %v2240_v45  ;;  %5258 = vpow2.f32 %v2264_v1 }
 0x610   : > { %5260 = vpow2.f32 %v2268_v62 }
 0x611   : > { %v6090_v40 = vpop.eup %5252  ;;  %v2266_v55 = vmul.f32 1.442695, %v2254_v34  ;;  %v2272_v61 = vmul.f32 1.442695, %v2257_v43 }
 0x612   : > { %v2246_v3 = vpop.xlane.xlu0 %2245  ;;  %v2274_v35 = vsel %vm1163_vm3, %v6090_v40, 0.0  ;;  %v5155_v14 = vpop.permute.xlu1 %5154 }
 0x613   : > { %v2256_v4 = vsub.f32 %v5953_v7, %v2246_v3  ;;  %2275 = vadd.xlane.f32.xlu0 %v2274_v35  ;;  %5262 = vpow2.f32 %v2266_v55  ;;  %v998_v7 = vld [vmem:[%s6665_s8 + $0x8] sm:$0xff]  ;;  %v5157_v39 = vunpack.i.h.bf16 %v5155_v14  ;;  %v5156_v58 = vunpack.i.l.bf16 %v5155_v14 }
 0x614   : > { %5264 = vpow2.f32 %v2272_v61  ;;  %4605 = vmatprep.subr.mxu1 %v998_v7 }
 0x615   : > { %v6095_v8 = vpop.eup %5254  ;;  %v2270_v23 = vmul.f32 1.442695, %v2256_v4  ;;  %4606 = vmatpush3.msra.mxu1 %v998_v7  ;;  %v4953_v19 = vpack.c.bf16 %v5157_v39, %v5156_v58 }
 0x616   : > { %v6097_v12 = vpop.eup %5256  ;;  %v2277_v6 = vsel %vm1163_vm3, %v6095_v8, 0.0  ;;  %4619 = vmatprep.subr.mxu1 %v997_v11  ;;  %v5150_v63 = vpop.permute.xlu0 %5149 }
 0x617   : > { %2278 = vadd.xlane.f32.xlu1 %v2277_v6  ;;  %v2280_v13 = vsel %vm1163_vm3, %v6097_v12, 0.0  ;;  %5266 = vpow2.f32 %v2270_v23  ;;  %v5152_v29 = vunpack.i.h.bf16 %v5150_v63  ;;  %v5151_v2 = vunpack.i.l.bf16 %v5150_v63 }
 0x618   : > { %2281 = vadd.xlane.f32.xlu0 %v2280_v13 }
 0x619   : > { %v6106_v15 = vpop.eup %5258  ;;  %v4949_v31 = vpack.c.bf16 %v5152_v29, %v5151_v2 }
 0x61a   : > { %v2283_v20 = vsel %vm1163_vm3, %v6106_v15, 0.0  ;;  %v6113_v22 = vpop.eup %5260 }
 0x61b   : > { %2284 = vadd.xlane.f32.xlu1 %v2283_v20  ;;  %v2289_v28 = vsel %vm1163_vm3, %v6113_v22, 0.0 }
 0x61d   : > { %v6115_v26 = vpop.eup %5262 }
 0x61e   : > { %v2286_v37 = vsel %vm1163_vm3, %v6115_v26, 0.0  ;;  %v6121_v9 = vpop.eup %5264 }
 0x61f   : > { %2290 = vadd.xlane.f32.xlu1 %v2289_v28  ;;  %2287 = vadd.xlane.f32.xlu0 %v2286_v37  ;;  %v2295_v10 = vsel %vm1163_vm3, %v6121_v9, 0.0 }
 0x621   : > { %v6125_v36 = vpop.eup %5266 }
 0x622   : > { %v2292_v21 = vsel %vm1163_vm3, %v6125_v36, 0.0 }
 0x623   : > { %2296 = vadd.xlane.f32.xlu1 %v2295_v10 }
 0x627   : > { %2293 = vadd.xlane.f32.xlu1 %v2292_v21 }
 0x635   : > { %5159 = vrot.lane.b32.xlu0 %v5993_v0, %s5397_s20 }
 0x638   : > { %5164 = vrot.lane.b32.xlu1 %v5989_v24, %s5397_s20 }
 0x699   : > { %v4595_v56 = vpop.f32.mrb[20].mxu1 }
 0x69a   : > { %v1760_v59 = vpop.f32.mrb[21].mxu1 }
 0x69b   : > { %4607 = vmatprep.mubr.msk.f32.mxu1 %vm1009_vm1, %v1760_v59 }
 0x69c   : > { %4608 = vmatmul.mubr.msk.f32.vlgmr.msra.gmra.mrb[28].mxu1 %vm1009_vm1, %v4595_v56 }
 0x69d   : > { %4620 = vmatpush3.msra.mxu1 %v997_v11  ;;  %v4598_v47 = vpop.f32.mrb[22].mxu1 }
 0x69e   : > { %4950 = vmatprep.subr.bf16.mxu1 %v4949_v31  ;;  %v1770_v32 = vpop.f32.mrb[23].mxu1 }
 0x69f   : > { %4610 = vmatprep.mubr.msk.f32.mxu1 %vm1009_vm1, %v1770_v32 }
 0x6a0   : > { %4611 = vmatmul.mubr.msk.f32.gmra.mrb[30].mxu1 %vm1009_vm1, %v4598_v47  ;;  %v2276_v27 = vpop.xlane.xlu0 %2275 }
 0x6a1   : > { %v4601_v5 = vpop.f32.mrb[24].mxu1  ;;  %5268 = vrcp.f32 %v2276_v27 }
 0x6a2   : > { %v1780_v52 = vpop.f32.mrb[25].mxu1 }
 0x6a3   : > { %4613 = vmatprep.mubr.msk.f32.mxu1 %vm1009_vm1, %v1780_v52 }
 0x6a4   : > { %v2279_v16 = vpop.xlane.xlu1 %2278  ;;  %4614 = vmatmul.mubr.msk.f32.gmra.mrb[32].mxu1 %vm1009_vm1, %v4601_v5 }
 0x6a5   : > { %v4604_v17 = vpop.f32.mrb[26].mxu1  ;;  %v2282_v42 = vpop.xlane.xlu0 %2281  ;;  %5270 = vrcp.f32 %v2279_v16 }
 0x6a6   : > { %v1790_v18 = vpop.f32.mrb[27].mxu1  ;;  %5272 = vrcp.f32 %v2282_v42 }
 0x6a7   : > { %4616 = vmatprep.mubr.msk.f32.mxu1 %vm1009_vm1, %v1790_v18 }
 0x6a8   : > { %4617 = vmatmul.mubr.msk.f32.gmra.mrb[34].mxu1 %vm1009_vm1, %v4604_v17  ;;  %v2285_v30 = vpop.xlane.xlu1 %2284 }
 0x6a9   : > { %4621 = vmatprep.mubr.msk.f32.mxu1 %vm1009_vm1, %v5905_v49  ;;  %5274 = vrcp.f32 %v2285_v30 }
 0x6ac   : > { %4622 = vmatmul.mubr.msk.f32.vlgmr.msra.gmra.mrb[28].mxu1 %vm1009_vm1, %v5903_v48  ;;  %v2291_v38 = vpop.xlane.xlu1 %2290  ;;  %v2288_v25 = vpop.xlane.xlu0 %2287 }
 0x6ad   : > { %4952 = vmatpush3.bf16.msra.mxu1 %v4949_v31  ;;  %4624 = vmatprep.mubr.msk.f32.mxu1 %vm1009_vm1, %v5909_v51  ;;  %v5269_v48 = vpop.eup %5268  ;;  %5276 = vrcp.f32 %v2288_v25 }
 0x6ae   : > { %4954 = vmatprep.subr.bf16.mxu1 %v4953_v19  ;;  %5278 = vrcp.f32 %v2291_v38 }
 0x6b0   : > { %4625 = vmatmul.mubr.msk.f32.gmra.mrb[30].mxu1 %vm1009_vm1, %v5907_v50  ;;  %v2297_v60 = vpop.xlane.xlu1 %2296  ;;  %v5160_v1 = vpop.permute.xlu0 %5159 }
 0x6b1   : > { %4956 = vmatpush3.bf16.msra.mxu1 %v4953_v19  ;;  %4627 = vmatprep.mubr.msk.f32.mxu1 %vm1009_vm1, %v5913_v53  ;;  %v5162_v49 = vunpack.i.h.bf16 %v5160_v1  ;;  %v5161_v62 = vunpack.i.l.bf16 %v5160_v1 }
 0x6b3   : > { %v4957_v46 = vpack.c.bf16 %v5162_v49, %v5161_v62 }
 0x6b4   : > { %4628 = vmatmul.mubr.msk.f32.gmra.mrb[32].mxu1 %vm1009_vm1, %v5911_v44  ;;  %v2294_v51 = vpop.xlane.xlu1 %2293  ;;  %v2299_v44 = vmul.f32 %v5269_v48, %v6090_v40  ;;  %v5271_v40 = vpop.eup %5270 }
 0x6b5   : > { %4630 = vmatprep.mubr.msk.f32.mxu1 %vm1009_vm1, %v5917_v41  ;;  %v6155_v50 = vpop.f32.mrb[36].mxu0  ;;  %4958 = vmatprep.subr.bf16.mxu1 %v4957_v46  ;;  %5280 = vrcp.f32 %v2294_v51  ;;  %v5273_v6 = vpop.eup %5272  ;;  %v2301_v20 = vmul.f32 %v5271_v40, %v6095_v8 }
 0x6b6   : > { %v6157_v45 = vpop.f32.mrb[37].mxu0  ;;  %v2776_v53 = vsel %vm1163_vm3, %v6155_v50, -inf  ;;  %4960 = vmatpush3.bf16.msra.mxu1 %v4957_v46  ;;  %5282 = vrcp.f32 %v2297_v60  ;;  %v5275_v11 = vpop.eup %5274  ;;  %v2303_v37 = vmul.f32 %v5273_v6, %v6097_v12 }
 0x6b7   : > { %2777 = vmax.xlane.f32.xlu1 %v2776_v53  ;;  %v2773_v43 = vsel %vm1163_vm3, %v6157_v45, -inf  ;;  %v5277_v10 = vpop.eup %5276  ;;  %v2305_v8 = vmul.f32 %v5275_v11, %v6106_v15 }
 0x6b8   : > { %2774 = vmax.xlane.f32.xlu0 %v2773_v43  ;;  %4631 = vmatmul.mubr.msk.f32.gmra.mrb[34].mxu1 %vm1009_vm1, %v5915_v54  ;;  %v5165_v41 = vpop.permute.xlu1 %5164  ;;  %v5279_v2 = vpop.eup %5278  ;;  %v2307_v56 = vmul.f32 %v5277_v10, %v6115_v26  ;;  %v999_v26 = vld [vmem:[%s6665_s8 + $0x10] sm:$0xff] }
 0x6b9   : > { %4677 = vmatprep.mubr.msk.f32.mxu1 %vm1163_vm3, %v2299_v44  ;;  %v6167_v34 = vpop.f32.mrb[38].mxu0  ;;  %v5167_v55 = vunpack.i.h.bf16 %v5165_v41  ;;  %v5166_v61 = vunpack.i.l.bf16 %v5165_v41  ;;  %v2309_v31 = vmul.f32 %v5279_v2, %v6113_v22 }
 0x6ba   : > { %v2744_v3 = vpop.f32.mrb[39].mxu0  ;;  %v2782_v7 = vsel %vm1163_vm3, %v6167_v34, -inf }
 0x6bb   : > { %v2779_v35 = vsel %vm1163_vm3, %v2744_v3, -inf  ;;  %v4961_v4 = vpack.c.bf16 %v5167_v55, %v5166_v61 }
 0x6bc   : > { %2780 = vmax.xlane.f32.xlu0 %v2779_v35 }
 0x6bd   : > { %v4727_v23 = vpop.f32.mrb[40].mxu0  ;;  %4962 = vmatprep.subr.bf16.mxu1 %v4961_v4 }
 0x6be   : > { %v6170_v13 = vpop.f32.mrb[41].mxu0  ;;  %v2788_v54 = vsel %vm1163_vm3, %v4727_v23, -inf  ;;  %4964 = vmatpush3.bf16.msra.mxu1 %v4961_v4 }
 0x6bf   : > { %2789 = vmax.xlane.f32.xlu1 %v2788_v54  ;;  %v2785_v29 = vsel %vm1163_vm3, %v6170_v13, -inf  ;;  %v5281_v12 = vpop.eup %5280  ;;  %4689 = vmatprep.subr.mxu1 %v999_v26 }
 0x6c0   : > { %2783 = vmax.xlane.f32.xlu0 %v2782_v7  ;;  %v5283_v47 = vpop.eup %5282  ;;  %v2311_v32 = vmul.f32 %v5281_v12, %v6125_v36 }
 0x6c1   : > { %v4730_v28 = vpop.f32.mrb[42].mxu0  ;;  %4678 = vmatmul.mubr.msk.f32.vlgmr.msra.gmra.mrb[36].mxu1 %vm1163_vm3, %v2301_v20  ;;  %v2313_v15 = vmul.f32 %v5283_v47, %v6121_v9 }
 0x6c2   : > { %v6178_v21 = vpop.f32.mrb[43].mxu0  ;;  %v2794_v63 = vsel %vm1163_vm3, %v4730_v28, -inf  ;;  %4680 = vmatprep.mubr.msk.f32.mxu1 %vm1163_vm3, %v2303_v37  ;;  %4690 = vmatpush3.msra.mxu1 %v999_v26 }
 0x6c3   : > { %2795 = vmax.xlane.f32.xlu1 %v2794_v63  ;;  %v2791_v59 = vsel %vm1163_vm3, %v6178_v21, -inf }
 0x6c4   : > { %2786 = vmax.xlane.f32.xlu0 %v2785_v29 }
 0x6c5   : > { %4681 = vmatmul.mubr.msk.f32.gmra.mrb[38].mxu1 %vm1163_vm3, %v2305_v8 }
 0x6c6   : > { %4683 = vmatprep.mubr.msk.f32.mxu1 %vm1163_vm3, %v2307_v56 }
 0x6c8   : > { %2792 = vmax.xlane.f32.xlu0 %v2791_v59 }
 0x6c9   : > { %4684 = vmatmul.mubr.msk.f32.gmra.mrb[40].mxu1 %vm1163_vm3, %v2309_v31 }
 0x6ca   : > { %4686 = vmatprep.mubr.msk.f32.mxu1 %vm1163_vm3, %v2311_v32 }
 0x6cd   : > { %4687 = vmatmul.mubr.msk.f32.gmra.mrb[42].mxu1 %vm1163_vm3, %v2313_v15 }
 0x6d4   : > { %5174 = vrot.lane.b32.xlu1 %v5929_v33, %s5398_s21 }
 0x6de   : > { %5169 = vrot.lane.b32.xlu0 %v5943_v57, %s5398_s21 }
 0x744   : > { %v2778_v22 = vpop.xlane.xlu1 %2777 }
 0x745   : > { %v2798_v36 = vsub.f32 %v6155_v50, %v2778_v22  ;;  %v2775_v14 = vpop.xlane.xlu0 %2774 }
 0x746   : > { %v2797_v9 = vsub.f32 %v6157_v45, %v2775_v14 }
 0x747   : > { %v2807_v5 = vmul.f32 1.442695, %v2798_v36 }
 0x748   : > { %v2805_v52 = vmul.f32 1.442695, %v2797_v9 }
 0x749   : > { %5284 = vpow2.f32 %v2807_v5  ;;  %v2781_v27 = vpop.xlane.xlu0 %2780 }
 0x74a   : > { %5286 = vpow2.f32 %v2805_v52  ;;  %v2799_v33 = vsub.f32 %v2744_v3, %v2781_v27 }
 0x74c   : > { %v2809_v16 = vmul.f32 1.442695, %v2799_v33  ;;  %v2790_v17 = vpop.xlane.xlu1 %2789 }
 0x74d   : > { %v2802_v18 = vsub.f32 %v4727_v23, %v2790_v17  ;;  %v2784_v39 = vpop.xlane.xlu0 %2783 }
 0x74e   : > { %5288 = vpow2.f32 %v2809_v16  ;;  %v2800_v57 = vsub.f32 %v6167_v34, %v2784_v39  ;;  %v1000_v39 = vld [vmem:[%s6665_s8 + $0x18] sm:$0xff] }
 0x74f   : > { %v2815_v58 = vmul.f32 1.442695, %v2802_v18 }
 0x750   : > { %v2811_v42 = vmul.f32 1.442695, %v2800_v57  ;;  %v2796_v30 = vpop.xlane.xlu1 %2795 }
 0x751   : > { %v2804_v19 = vsub.f32 %v4730_v28, %v2796_v30  ;;  %v2787_v38 = vpop.xlane.xlu0 %2786 }
 0x752   : > { %5290 = vpow2.f32 %v2811_v42  ;;  %v2801_v25 = vsub.f32 %v6170_v13, %v2787_v38 }
 0x753   : > { %v6207_v60 = vpop.eup %5284  ;;  %5292 = vpow2.f32 %v2815_v58  ;;  %v2819_v49 = vmul.f32 1.442695, %v2804_v19 }
 0x754   : > { %v6209_v1 = vpop.eup %5286  ;;  %v2813_v62 = vmul.f32 1.442695, %v2801_v25  ;;  %v2824_v48 = vsel %vm1163_vm3, %v6207_v60, 0.0  ;;  %v5175_v20 = vpop.permute.xlu1 %5174 }
 0x755   : > { %2825 = vadd.xlane.f32.xlu1 %v2824_v48  ;;  %v2793_v46 = vpop.xlane.xlu0 %2792  ;;  %v2821_v51 = vsel %vm1163_vm3, %v6209_v1, 0.0  ;;  %v5177_v11 = vunpack.i.h.bf16 %v5175_v20  ;;  %v5176_v28 = vunpack.i.l.bf16 %v5175_v20 }
 0x756   : > { %5294 = vpow2.f32 %v2813_v62  ;;  %v2803_v50 = vsub.f32 %v6178_v21, %v2793_v46  ;;  %2822 = vadd.xlane.f32.xlu0 %v2821_v51 }
 0x757   : > { %5296 = vpow2.f32 %v2819_v49  ;;  %v4993_v21 = vpack.c.bf16 %v5177_v11, %v5176_v28 }
 0x758   : > { %v6216_v45 = vpop.eup %5288  ;;  %v2817_v53 = vmul.f32 1.442695, %v2803_v50 }
 0x759   : > { %v5170_v43 = vpop.permute.xlu0 %5169  ;;  %v2827_v44 = vsel %vm1163_vm3, %v6216_v45, 0.0 }
 0x75a   : > { %v5172_v41 = vunpack.i.h.bf16 %v5170_v43  ;;  %v5171_v34 = vunpack.i.l.bf16 %v5170_v43  ;;  %2828 = vadd.xlane.f32.xlu0 %v2827_v44  ;;  %5298 = vpow2.f32 %v2817_v53 }
 0x75c   : > { %v6220_v55 = vpop.eup %5290  ;;  %v4989_v61 = vpack.c.bf16 %v5172_v41, %v5171_v34 }
 0x75d   : > { %v2830_v3 = vsel %vm1163_vm3, %v6220_v55, 0.0  ;;  %v6224_v35 = vpop.eup %5292 }
 0x75e   : > { %2831 = vadd.xlane.f32.xlu1 %v2830_v3  ;;  %4990 = vmatprep.subr.bf16.mxu1 %v4989_v61  ;;  %v2836_v40 = vsel %vm1163_vm3, %v6224_v35, 0.0 }
 0x760   : > { %v6226_v4 = vpop.eup %5294 }
 0x761   : > { %v2833_v23 = vsel %vm1163_vm3, %v6226_v4, 0.0  ;;  %v6232_v6 = vpop.eup %5296 }
 0x762   : > { %2837 = vadd.xlane.f32.xlu1 %v2836_v40  ;;  %2834 = vadd.xlane.f32.xlu0 %v2833_v23  ;;  %v2842_v13 = vsel %vm1163_vm3, %v6232_v6, 0.0  ;;  %v5380_v40 = vld [vmem:[%s5540_s30 + $0x8] sm:$0xff] }
 0x764   : > { %v6236_v54 = vpop.eup %5298 }
 0x765   : > { %v2839_v7 = vsel %vm1163_vm3, %v6236_v54, 0.0 }
 0x766   : > { %2843 = vadd.xlane.f32.xlu1 %v2842_v13 }
 0x76a   : > { %2840 = vadd.xlane.f32.xlu1 %v2839_v7 }
 0x778   : > { %5179 = vrot.lane.b32.xlu0 %v5993_v0, %s5398_s21 }
 0x77b   : > { %5184 = vrot.lane.b32.xlu1 %v5989_v24, %s5398_s21  ;;  %s6630_s21 = scalar_lea.vmem %s6675_s18, %s4203_s1 }
 0x794   : > { %v4679_v37 = vpop.f32.mrb[36].mxu1 }
 0x795   : > { %v2428_v10 = vpop.f32.mrb[37].mxu1 }
 0x796   : > { %4691 = vmatprep.mubr.msk.f32.mxu1 %vm1009_vm1, %v2428_v10  ;;  %v5382_v10 = vld [vmem:[%s5540_s30 + $0x18] sm:$0xff] }
 0x797   : > { %4692 = vmatmul.mubr.msk.f32.vlgmr.msra.gmra.mrb[28].mxu1 %vm1009_vm1, %v4679_v37 }
 0x798   : > { %4992 = vmatpush3.bf16.msra.mxu1 %v4989_v61  ;;  %v4682_v63 = vpop.f32.mrb[38].mxu1 }
 0x799   : > { %4994 = vmatprep.subr.bf16.mxu1 %v4993_v21  ;;  %v2438_v29 = vpop.f32.mrb[39].mxu1 }
 0x79a   : > { %4694 = vmatprep.mubr.msk.f32.mxu1 %vm1009_vm1, %v2438_v29 }
 0x79b   : > { %4695 = vmatmul.mubr.msk.f32.gmra.mrb[30].mxu1 %vm1009_vm1, %v4682_v63 }
 0x79c   : > { %4996 = vmatpush3.bf16.msra.mxu1 %v4993_v21  ;;  %v4685_v24 = vpop.f32.mrb[40].mxu1 }
 0x79d   : > { %v2448_v0 = vpop.f32.mrb[41].mxu1 }
 0x79e   : > { %4697 = vmatprep.mubr.msk.f32.mxu1 %vm1009_vm1, %v2448_v0 }
 0x79f   : > { %4698 = vmatmul.mubr.msk.f32.gmra.mrb[32].mxu1 %vm1009_vm1, %v4685_v24 }
 0x7a0   : > { %v4688_v8 = vpop.f32.mrb[42].mxu1 }
 0x7a1   : > { %v2458_v2 = vpop.f32.mrb[43].mxu1 }
 0x7a2   : > { %4700 = vmatprep.mubr.msk.f32.mxu1 %vm1009_vm1, %v2458_v2 }
 0x7a3   : > { %4701 = vmatmul.mubr.msk.f32.gmra.mrb[34].mxu1 %vm1009_vm1, %v4688_v8  ;;  %v5383_v8 = vld [vmem:[%s5540_s30 + $0x10] sm:$0xff] }
 0x7e2   : > { %v2826_v12 = vpop.xlane.xlu1 %2825 }
 0x7e3   : > { %v2823_v56 = vpop.xlane.xlu0 %2822 }
 0x7e4   : > { %5300 = vrcp.f32 %v2823_v56 }
 0x7e5   : > { %5302 = vrcp.f32 %v2826_v12  ;;  %v5384_v12 = vld [vmem:[%s5540_s30 + $0x28] sm:$0xff] }
 0x7e7   : > { %v2829_v59 = vpop.xlane.xlu0 %2828 }
 0x7e8   : > { %5304 = vrcp.f32 %v2829_v59 }
 0x7eb   : > { %v2832_v31 = vpop.xlane.xlu1 %2831 }
 0x7ec   : > { %5306 = vrcp.f32 %v2832_v31 }
 0x7ee   : > { %v5301_v47 = vpop.eup %5300 }
 0x7ef   : > { %v2838_v32 = vpop.xlane.xlu1 %2837  ;;  %v2835_v15 = vpop.xlane.xlu0 %2834  ;;  %v2846_v26 = vmul.f32 %v5301_v47, %v6209_v1 }
 0x7f0   : > { %5308 = vrcp.f32 %v2835_v15  ;;  %v5303_v18 = vpop.eup %5302 }
 0x7f1   : > { %4747 = vmatprep.mubr.msk.f32.mxu1 %vm1163_vm3, %v2846_v26  ;;  %5310 = vrcp.f32 %v2838_v32  ;;  %v2848_v58 = vmul.f32 %v5303_v18, %v6207_v60  ;;  %v5385_v26 = vld [vmem:[%s5540_s30 + $0x20] sm:$0xff] }
 0x7f2   : > { %v5305_v57 = vpop.eup %5304 }
 0x7f3   : > { %v2844_v22 = vpop.xlane.xlu1 %2843  ;;  %v5180_v36 = vpop.permute.xlu0 %5179  ;;  %v2850_v30 = vmul.f32 %v5305_v57, %v6216_v45 }
 0x7f4   : > { %v5182_v14 = vunpack.i.h.bf16 %v5180_v36  ;;  %v5181_v9 = vunpack.i.l.bf16 %v5180_v36 }
 0x7f6   : > { %v4997_v5 = vpack.c.bf16 %v5182_v14, %v5181_v9  ;;  %v5307_v42 = vpop.eup %5306  ;;  %v5386_v9 = vld [vmem:[%s5540_s30 + $0x38] sm:$0xff] }
 0x7f7   : > { %v2841_v52 = vpop.xlane.xlu1 %2840  ;;  %v2852_v38 = vmul.f32 %v5307_v42, %v6220_v55  ;;  %v4178_v55 = vld [vmem:[%s6666_s9] ss:$0 sm:$0xff] }
 0x7f8   : > { %4998 = vmatprep.subr.bf16.mxu1 %v4997_v5  ;;  %5312 = vrcp.f32 %v2841_v52 }
 0x7f9   : > { %5000 = vmatpush3.bf16.msra.mxu1 %v4997_v5  ;;  %5314 = vrcp.f32 %v2844_v22 }
 0x7fa   : > { %v5309_v19 = vpop.eup %5308 }
 0x7fb   : > { %v5185_v27 = vpop.permute.xlu1 %5184  ;;  %v5311_v25 = vpop.eup %5310  ;;  %v2854_v1 = vmul.f32 %v5309_v19, %v6226_v4 }
 0x7fc   : > { %v5187_v33 = vunpack.i.h.bf16 %v5185_v27  ;;  %v5186_v16 = vunpack.i.l.bf16 %v5185_v27  ;;  %v2856_v60 = vmul.f32 %v5311_v25, %v6224_v35  ;;  %v5387_v27 = vld [vmem:[%s5540_s30 + $0x30] sm:$0xff] }
 0x7fe   : > { %v5001_v17 = vpack.c.bf16 %v5187_v33, %v5186_v16 }
 0x800   : > { %5002 = vmatprep.subr.bf16.mxu1 %v5001_v17 }
 0x801   : > { %5004 = vmatpush3.bf16.msra.mxu1 %v5001_v17 }
 0x802   : > { %4759 = vmatprep.subr.mxu1 %v1000_v39  ;;  %v5313_v49 = vpop.eup %5312 }
 0x803   : > { %v5315_v62 = vpop.eup %5314  ;;  %v2858_v48 = vmul.f32 %v5313_v49, %v6236_v54 }
 0x804   : > { %4748 = vmatmul.mubr.msk.f32.vlgmr.msra.gmra.mrb[44].mxu1 %vm1163_vm3, %v2848_v58  ;;  %v2860_v46 = vmul.f32 %v5315_v62, %v6232_v6  ;;  %v5381_v6 = vld [vmem:[%s5540_s30] sm:$0xff] }
 0x805   : > { %4750 = vmatprep.mubr.msk.f32.mxu1 %vm1163_vm3, %v2850_v30  ;;  %4760 = vmatpush3.msra.mxu1 %v1000_v39 }
 0x808   : > { %4751 = vmatmul.mubr.msk.f32.gmra.mrb[46].mxu1 %vm1163_vm3, %v2852_v38 }
 0x809   : > { %4753 = vmatprep.mubr.msk.f32.mxu1 %vm1163_vm3, %v2854_v1 }
 0x80c   : > { %4754 = vmatmul.mubr.msk.f32.gmra.mrb[48].mxu1 %vm1163_vm3, %v2856_v60 }
 0x80d   : > { %4756 = vmatprep.mubr.msk.f32.mxu1 %vm1163_vm3, %v2858_v48 }
 0x810   : > { %4757 = vmatmul.mubr.msk.f32.gmra.mrb[50].mxu1 %vm1163_vm3, %v2860_v46 }
 0x8d7   : > { %v4749_v51 = vpop.f32.mrb[44].mxu1 }
 0x8d8   : > { %v2975_v50 = vpop.f32.mrb[45].mxu1 }
 0x8d9   : > { %4761 = vmatprep.mubr.msk.f32.mxu1 %vm1009_vm1, %v2975_v50 }
 0x8da   : > { %4762 = vmatmul.mubr.msk.f32.vlgmr.msra.gmra.mrb[28].mxu1 %vm1009_vm1, %v4749_v51 }
 0x8db   : > { %v4752_v45 = vpop.f32.mrb[46].mxu1 }
 0x8dc   : > { %v2985_v53 = vpop.f32.mrb[47].mxu1 }
 0x8dd   : > { %4764 = vmatprep.mubr.msk.f32.mxu1 %vm1009_vm1, %v2985_v53 }
 0x8de   : > { %4765 = vmatmul.mubr.msk.f32.gmra.mrb[30].mxu1 %vm1009_vm1, %v4752_v45 }
 0x8df   : > { %v4755_v43 = vpop.f32.mrb[48].mxu1 }
 0x8e0   : > { %v2995_v44 = vpop.f32.mrb[49].mxu1 }
 0x8e1   : > { %4767 = vmatprep.mubr.msk.f32.mxu1 %vm1009_vm1, %v2995_v44 }
 0x8e2   : > { %4768 = vmatmul.mubr.msk.f32.gmra.mrb[32].mxu1 %vm1009_vm1, %v4755_v43 }
 0x8e3   : > { %v4758_v41 = vpop.f32.mrb[50].mxu1 }
 0x8e4   : > { %v3005_v34 = vpop.f32.mrb[51].mxu1 }
 0x8e5   : > { %4770 = vmatprep.mubr.msk.f32.mxu1 %vm1009_vm1, %v3005_v34 }
 0x8e6   : > { %4771 = vmatmul.mubr.msk.f32.gmra.mrb[34].mxu1 %vm1009_vm1, %v4758_v41 }
 0x9ad   : > { %v4763_v61 = vpop.f32.mrb[28].mxu1 }
 0x9ae   : > { %v3159_v3 = vadd.f32 %v4763_v61, %v4178_v55  ;;  %v3104_v35 = vpop.f32.mrb[29].mxu1 }
 0x9af   : > { %v3158_v4 = vadd.f32 %v4178_v55, %v3104_v35 }
 0x9b0   : > { %v3167_v23 = vadd.f32 %v5380_v40, %v3159_v3 }
 0x9b1   : > { %v3166_v13 = vadd.f32 %v5381_v6, %v3158_v4  ;;  %v4766_v54 = vpop.f32.mrb[30].mxu1 }
 0x9b2   : > { %v3161_v7 = vadd.f32 %v4766_v54, %v4178_v55  ;;  %v3114_v20 = vpop.f32.mrb[31].mxu1  ;;  %v3179_v11 = vsel %vm611_vm0, %v3167_v23, 0.0 }
 0x9b3   : > { %v3160_v28 = vadd.f32 %v4178_v55, %v3114_v20  ;;  %3180 = vadd.xlane.f32.xlu1 %v3179_v11  ;;  %v3176_v37 = vsel %vm611_vm0, %v3166_v13, 0.0 }
 0x9b4   : > { %v3169_v21 = vadd.f32 %v5382_v10, %v3161_v7  ;;  %3177 = vadd.xlane.f32.xlu0 %v3176_v37 }
 0x9b5   : > { %v4769_v63 = vpop.f32.mrb[32].mxu1  ;;  %v3168_v2 = vadd.f32 %v5383_v8, %v3160_v28  ;;  %v3312_v8 = vld [vmem:[%s6671_s14 + $0x18] sm:$0xff] }
 0x9b6   : > { %v3163_v29 = vadd.f32 %v4769_v63, %v4178_v55  ;;  %v3124_v24 = vpop.f32.mrb[33].mxu1  ;;  %v3185_v0 = vsel %vm611_vm0, %v3169_v21, 0.0  ;;  %v3309_v63 = vld [vmem:[%s6671_s14] sm:$0xff] }
 0x9b7   : > { %v3162_v56 = vadd.f32 %v4178_v55, %v3124_v24  ;;  %v3182_v14 = vsel %vm611_vm0, %v3168_v2, 0.0 }
 0x9b8   : > { %v3171_v59 = vadd.f32 %v5384_v12, %v3163_v29  ;;  %3186 = vadd.xlane.f32.xlu0 %v3185_v0  ;;  %v3310_v29 = vld [vmem:[%s6671_s14 + $0x8] sm:$0xff]  ;;  %v3311_v0 = vld [vmem:[%s6671_s14 + $0x10] sm:$0xff] }
 0x9b9   : > { %v4772_v31 = vpop.f32.mrb[34].mxu1  ;;  %v3170_v22 = vadd.f32 %v5385_v26, %v3162_v56  ;;  %v5005_v24 = vpack.c.bf16 %v3310_v29, %v3309_v63  ;;  %v3666_v29 = vld [vmem:[%s6673_s16 + $0x8] sm:$0xff] }
 0x9ba   : > { %v3165_v47 = vadd.f32 %v4772_v31, %v4178_v55  ;;  %v3134_v32 = vpop.f32.mrb[35].mxu1  ;;  %v3191_v15 = vsel %vm611_vm0, %v3171_v59, 0.0 }
 0x9bb   : > { %v3164_v36 = vadd.f32 %v4178_v55, %v3134_v32  ;;  %3192 = vadd.xlane.f32.xlu1 %v3191_v15  ;;  %v3188_v16 = vsel %vm611_vm0, %v3170_v22, 0.0  ;;  %5006 = vmatprep.subr.bf16.mxu0 %v5005_v24 }
 0x9bc   : > { %v3173_v5 = vadd.f32 %v5386_v9, %v3165_v47  ;;  %3183 = vadd.xlane.f32.xlu0 %v3182_v14  ;;  %5008 = vmatpush3.bf16.msra.mxu0 %v5005_v24 }
 0x9bd   : > { %v3172_v33 = vadd.f32 %v5387_v27, %v3164_v36 }
 0x9be   : > { %v3197_v52 = vsel %vm611_vm0, %v3173_v5, 0.0 }
 0x9bf   : > { %3198 = vadd.xlane.f32.xlu1 %v3197_v52  ;;  %v3194_v17 = vsel %vm611_vm0, %v3172_v33, 0.0 }
 0x9c0   : > { %3189 = vadd.xlane.f32.xlu0 %v3188_v16 }
 0x9c4   : > { %3195 = vadd.xlane.f32.xlu0 %v3194_v17 }
 0xa40   : > { %v3181_v18 = vpop.xlane.xlu1 %3180 }
 0xa41   : > { %v3202_v39 = vmul.f32 0.03125, %v3181_v18  ;;  %v3178_v57 = vpop.xlane.xlu0 %3177 }
 0xa42   : > { %v3201_v58 = vmul.f32 0.03125, %v3178_v57  ;;  %v4179_v57 = vld [vmem:[%s6667_s10] ss:$0 sm:$0xff] }
 0xa43   : > { %v6298_v42 = vsub.f32 %v3167_v23, %v3202_v39 }
 0xa44   : > { %v6300_v30 = vsub.f32 %v3166_v13, %v3201_v58 }
 0xa45   : > { %v3187_v19 = vpop.xlane.xlu0 %3186  ;;  %v3218_v38 = vmul.f32 %v6298_v42, %v6298_v42 }
 0xa46   : > { %v3204_v25 = vmul.f32 0.03125, %v3187_v19  ;;  %v3217_v1 = vmul.f32 %v6300_v30, %v6300_v30 }
 0xa47   : > { %v3228_v49 = vsel %vm611_vm0, %v3218_v38, 0.0 }
 0xa48   : > { %v6307_v60 = vsub.f32 %v3169_v21, %v3204_v25  ;;  %v3193_v62 = vpop.xlane.xlu1 %3192  ;;  %3229 = vadd.xlane.f32.xlu1 %v3228_v49  ;;  %v3225_v48 = vsel %vm611_vm0, %v3217_v1, 0.0 }
 0xa49   : > { %v3206_v46 = vmul.f32 0.03125, %v3193_v62  ;;  %v3184_v51 = vpop.xlane.xlu0 %3183  ;;  %3226 = vadd.xlane.f32.xlu0 %v3225_v48  ;;  %v4180_v62 = vld [vmem:[%s6668_s11] ss:$0 sm:$0xff] }
 0xa4a   : > { %v3203_v50 = vmul.f32 0.03125, %v3184_v51  ;;  %v3220_v45 = vmul.f32 %v6307_v60, %v6307_v60 }
 0xa4b   : > { %v6312_v53 = vsub.f32 %v3171_v59, %v3206_v46 }
 0xa4c   : > { %v6314_v43 = vsub.f32 %v3168_v2, %v3203_v50  ;;  %v3199_v44 = vpop.xlane.xlu1 %3198  ;;  %v3234_v41 = vsel %vm611_vm0, %v3220_v45, 0.0  ;;  %v5009_v2 = vpack.c.bf16 %v3312_v8, %v3311_v0  ;;  %v3667_v0 = vld [vmem:[%s6673_s16 + $0x10] sm:$0xff]  ;;  %v3668_v8 = vld [vmem:[%s6673_s16 + $0x18] sm:$0xff] }
 0xa4d   : > { %v3208_v34 = vmul.f32 0.03125, %v3199_v44  ;;  %v3190_v55 = vpop.xlane.xlu0 %3189  ;;  %3235 = vadd.xlane.f32.xlu1 %v3234_v41  ;;  %v3222_v61 = vmul.f32 %v6312_v53, %v6312_v53 }
 0xa4e   : > { %v3205_v3 = vmul.f32 0.03125, %v3190_v55  ;;  %v3219_v35 = vmul.f32 %v6314_v43, %v6314_v43  ;;  %5010 = vmatprep.subr.bf16.mxu0 %v5009_v2 }
 0xa4f   : > { %v6321_v4 = vsub.f32 %v3173_v5, %v3208_v34  ;;  %v3240_v40 = vsel %vm611_vm0, %v3222_v61, 0.0  ;;  %5012 = vmatpush3.bf16.msra.mxu0 %v5009_v2  ;;  %v5017_v2 = vpack.c.bf16 %v3668_v8, %v3667_v0 }
 0xa50   : > { %v6324_v23 = vsub.f32 %v3170_v22, %v3205_v3  ;;  %v3231_v6 = vsel %vm611_vm0, %v3219_v35, 0.0 }
 0xa51   : > { %3241 = vadd.xlane.f32.xlu1 %v3240_v40  ;;  %3232 = vadd.xlane.f32.xlu0 %v3231_v6  ;;  %v3196_v13 = vpop.xlane.xlu0 %3195  ;;  %v3224_v54 = vmul.f32 %v6321_v4, %v6321_v4 }
 0xa52   : > { %v3207_v7 = vmul.f32 0.03125, %v3196_v13  ;;  %v3221_v20 = vmul.f32 %v6324_v23, %v6324_v23 }
 0xa53   : > { %v3246_v11 = vsel %vm611_vm0, %v3224_v54, 0.0 }
 0xa54   : > { %v6332_v28 = vsub.f32 %v3172_v33, %v3207_v7  ;;  %v3237_v37 = vsel %vm611_vm0, %v3221_v20, 0.0 }
 0xa55   : > { %3247 = vadd.xlane.f32.xlu1 %v3246_v11  ;;  %3238 = vadd.xlane.f32.xlu0 %v3237_v37 }
 0xa56   : > { %v3223_v10 = vmul.f32 %v6332_v28, %v6332_v28 }
 0xa58   : > { %v3243_v21 = vsel %vm611_vm0, %v3223_v10, 0.0 }
 0xa59   : > { %3244 = vadd.xlane.f32.xlu0 %v3243_v21 }
 0xad5   : > { %v3230_v56 = vpop.xlane.xlu1 %3229 }
 0xad6   : > { %v3250_v12 = vmul.f32 0.03125, %v3230_v56  ;;  %v3227_v59 = vpop.xlane.xlu0 %3226  ;;  %v3669_v56 = vld [vmem:[%s6673_s16 + $0x20] sm:$0xff] }
 0xad7   : > { %v3249_v31 = vmul.f32 0.03125, %v3227_v59 }
 0xad8   : > { %v3258_v47 = vadd.f32 1e-05, %v3250_v12  ;;  %v3670_v12 = vld [vmem:[%s6673_s16 + $0x28] sm:$0xff] }
 0xad9   : > { %v3257_v32 = vadd.f32 1e-05, %v3249_v31  ;;  %v5021_v59 = vpack.c.bf16 %v3670_v12, %v3669_v56  ;;  %v3671_v31 = vld [vmem:[%s6673_s16 + $0x30] sm:$0xff] }
 0xada   : > { %5316 = vrsqrt.f32 %v3258_v47  ;;  %v3236_v15 = vpop.xlane.xlu1 %3235  ;;  %v3672_v47 = vld [vmem:[%s6673_s16 + $0x38] sm:$0xff] }
 0xadb   : > { %5318 = vrsqrt.f32 %v3257_v32  ;;  %v3252_v26 = vmul.f32 0.03125, %v3236_v15  ;;  %v5025_v32 = vpack.c.bf16 %v3672_v47, %v3671_v31  ;;  %v4181_v15 = vld [vmem:[%s6672_s15] ss:$0 sm:$0xff] }
 0xadd   : > { %v3260_v22 = vadd.f32 1e-05, %v3252_v26 }
 0xade   : > { %v3242_v36 = vpop.xlane.xlu1 %3241  ;;  %v3233_v14 = vpop.xlane.xlu0 %3232 }
 0xadf   : > { %5320 = vrsqrt.f32 %v3260_v22  ;;  %v3254_v9 = vmul.f32 0.03125, %v3242_v36  ;;  %v3251_v5 = vmul.f32 0.03125, %v3233_v14 }
 0xae1   : > { %v3262_v52 = vadd.f32 1e-05, %v3254_v9  ;;  %v3259_v27 = vadd.f32 1e-05, %v3251_v5 }
 0xae2   : > { %v3248_v33 = vpop.xlane.xlu1 %3247  ;;  %v3239_v16 = vpop.xlane.xlu0 %3238 }
 0xae3   : > { %5322 = vrsqrt.f32 %v3262_v52  ;;  %v3256_v17 = vmul.f32 0.03125, %v3248_v33  ;;  %v3253_v18 = vmul.f32 0.03125, %v3239_v16 }
 0xae4   : > { %v5317_v39 = vpop.eup %5316  ;;  %5324 = vrsqrt.f32 %v3259_v27 }
 0xae5   : > { %v5319_v58 = vpop.eup %5318  ;;  %v3274_v19 = vmul.f32 %v5317_v39, %v6298_v42  ;;  %v3264_v38 = vadd.f32 1e-05, %v3256_v17  ;;  %v3261_v25 = vadd.f32 1e-05, %v3253_v18 }
 0xae6   : > { %v3245_v1 = vpop.xlane.xlu0 %3244  ;;  %v3273_v49 = vmul.f32 %v5319_v58, %v6300_v30 }
 0xae7   : > { %v3288_v48 = vmul.f32 %v4179_v57, %v3274_v19  ;;  %5326 = vrsqrt.f32 %v3264_v38  ;;  %v3255_v46 = vmul.f32 0.03125, %v3245_v1 }
 0xae8   : > { %5328 = vrsqrt.f32 %v3261_v25  ;;  %v3287_v51 = vmul.f32 %v4179_v57, %v3273_v49 }
 0xae9   : > { %v5321_v50 = vpop.eup %5320  ;;  %v3263_v45 = vadd.f32 1e-05, %v3255_v46  ;;  %v6360_v41 = vadd.f32 %v4180_v62, %v3288_v48 }
 0xaea   : > { %v6358_v44 = vadd.f32 %v4180_v62, %v3287_v51  ;;  %v3276_v42 = vmul.f32 %v5321_v50, %v6307_v60 }
 0xaeb   : > { %5330 = vrsqrt.f32 %v3263_v45 }
 0xaec   : > { %4781 = vmatprep.mubr.msk.f32.mxu0 %vm611_vm0, %v6358_v44  ;;  %v3290_v61 = vmul.f32 %v4179_v57, %v3276_v42 }
 0xaed   : > { %v5323_v30 = vpop.eup %5322  ;;  %4782 = vmatmul.mubr.msk.f32.vlgmr.msra.gmra.mrb[44].mxu0 %vm611_vm0, %v6360_v41 }
 0xaee   : > { %v5325_v34 = vpop.eup %5324  ;;  %v3278_v3 = vmul.f32 %v5323_v30, %v6312_v53  ;;  %v6372_v7 = vadd.f32 %v4180_v62, %v3290_v61 }
 0xaef   : > { %v3275_v55 = vmul.f32 %v5325_v34, %v6314_v43 }
 0xaf0   : > { %v3292_v60 = vmul.f32 %v4179_v57, %v3278_v3 }
 0xaf1   : > { %v5327_v35 = vpop.eup %5326  ;;  %v3289_v40 = vmul.f32 %v4179_v57, %v3275_v55 }
 0xaf2   : > { %v5329_v6 = vpop.eup %5328  ;;  %v3280_v20 = vmul.f32 %v5327_v35, %v6321_v4  ;;  %v6382_v10 = vadd.f32 %v4180_v62, %v3292_v60 }
 0xaf3   : > { %v6369_v13 = vadd.f32 %v4180_v62, %v3289_v40  ;;  %v3277_v54 = vmul.f32 %v5329_v6, %v6324_v23 }
 0xaf4   : > { %v3294_v21 = vmul.f32 %v4179_v57, %v3280_v20 }
 0xaf5   : > { %v5331_v11 = vpop.eup %5330  ;;  %4784 = vmatprep.mubr.msk.f32.mxu0 %vm611_vm0, %v6369_v13  ;;  %v3291_v43 = vmul.f32 %v4179_v57, %v3277_v54 }
 0xaf6   : > { %4785 = vmatmul.mubr.msk.f32.gmra.mrb[46].mxu0 %vm611_vm0, %v6372_v7  ;;  %v3279_v53 = vmul.f32 %v5331_v11, %v6332_v28  ;;  %v6392_v63 = vadd.f32 %v4180_v62, %v3294_v21  ;;  %v3665_v28 = vld [vmem:[%s6673_s16] sm:$0xff] }
 0xaf7   : > { %v6380_v37 = vadd.f32 %v4180_v62, %v3291_v43  ;;  %v5013_v24 = vpack.c.bf16 %v3666_v29, %v3665_v28 }
 0xaf8   : > { %v3293_v23 = vmul.f32 %v4179_v57, %v3279_v53 }
 0xaf9   : > { %4787 = vmatprep.mubr.msk.f32.mxu0 %vm611_vm0, %v6380_v37  ;;  %5014 = vmatprep.subr.bf16.mxu0 %v5013_v24 }
 0xafa   : > { %4788 = vmatmul.mubr.msk.f32.gmra.mrb[48].mxu0 %vm611_vm0, %v6382_v10  ;;  %v6388_v4 = vadd.f32 %v4180_v62, %v3293_v23 }
 0xafb   : > { %5016 = vmatpush3.bf16.msra.mxu0 %v5013_v24 }
 0xafc   : > { %4790 = vmatprep.mubr.msk.f32.mxu0 %vm611_vm0, %v6388_v4  ;;  %5018 = vmatprep.subr.bf16.mxu0 %v5017_v2 }
 0xafe   : > { %4791 = vmatmul.mubr.msk.f32.gmra.mrb[50].mxu0 %vm611_vm0, %v6392_v63 }
 0xaff   : > { %5020 = vmatpush3.bf16.msra.mxu0 %v5017_v2 }
 0xb00   : > { %5022 = vmatprep.subr.bf16.mxu0 %v5021_v59 }
 0xb03   : > { %5024 = vmatpush3.bf16.msra.mxu0 %v5021_v59 }
 0xb04   : > { %5026 = vmatprep.subr.bf16.mxu0 %v5025_v32 }
 0xb07   : > { %5028 = vmatpush3.bf16.msra.mxu0 %v5025_v32 }
 0xbc0   : > { %v4783_v26 = vpop.f32.mrb[44].mxu0 }
 0xbc1   : > { %v3416_v22 = vadd.f32 %v4783_v26, %v4181_v15  ;;  %v3410_v36 = vpop.f32.mrb[45].mxu0 }
 0xbc2   : > { %v3411_v14 = vadd.f32 %v4181_v15, %v3410_v36 }
 0xbc3   : > { %v6423_v9 = vmul.f32 0.70710677, %v3416_v22  ;;  %v6463_v32 = vmul.f32 0.5, %v3416_v22 }
 0xbc4   : > { %v6425_v5 = vmul.f32 0.70710677, %v3411_v14 }
 0xbc5   : > { %v3466_v52 = vand.u32 2147483647, %v6423_v9  ;;  %vm3626_vm4 = vcmp.lt.f32.partialorder %v6423_v9, 0.0 }
 0xbc6   : > { %v3465_v27 = vand.u32 2147483647, %v6425_v5  ;;  %vm3625_vm5 = vcmp.lt.f32.partialorder %v6425_v5, 0.0 }
 0xbc7   : > { %v3474_v33 = vmul.f32 0.3275911, %v3466_v52  ;;  %v3578_v42 = vsub.f32 0.0, %v3466_v52 }
 0xbc8   : > { %v3473_v16 = vmul.f32 0.3275911, %v3465_v27  ;;  %v3577_v55 = vsub.f32 0.0, %v3465_v27 }
 0xbc9   : > { %v3482_v17 = vadd.f32 1.0, %v3474_v33  ;;  %v4786_v18 = vpop.f32.mrb[46].mxu0  ;;  %v3586_v43 = vmul.f32 %v3578_v42, %v3466_v52 }
 0xbca   : > { %v3481_v39 = vadd.f32 1.0, %v3473_v16  ;;  %v6429_v57 = vadd.f32 %v4786_v18, %v4181_v15  ;;  %v3420_v58 = vpop.f32.mrb[47].mxu0  ;;  %v3585_v28 = vmul.f32 %v3577_v55, %v3465_v27  ;;  %v6469_v27 = vmul.f32 0.5, %v3411_v14 }
 0xbcb   : > { %5332 = vrcp.f32 %v3482_v17  ;;  %v6431_v19 = vadd.f32 %v4181_v15, %v3420_v58  ;;  %v3595_v59 = vmul.f32 1.442695, %v3586_v43 }
 0xbcc   : > { %5334 = vrcp.f32 %v3481_v39  ;;  %v6434_v38 = vmul.f32 0.70710677, %v6429_v57  ;;  %v3593_v36 = vmul.f32 1.442695, %v3585_v28 }
 0xbcd   : > { %v6437_v25 = vmul.f32 0.70710677, %v6431_v19  ;;  %v4789_v1 = vpop.f32.mrb[48].mxu0 }
 0xbce   : > { %v3468_v49 = vand.u32 2147483647, %v6434_v38  ;;  %v6440_v62 = vadd.f32 %v4789_v1, %v4181_v15  ;;  %v3430_v48 = vpop.f32.mrb[49].mxu0  ;;  %vm3628_vm6 = vcmp.lt.f32.partialorder %v6434_v38, 0.0 }
 0xbcf   : > { %v3467_v46 = vand.u32 2147483647, %v6437_v25  ;;  %v6443_v51 = vadd.f32 %v4181_v15, %v3430_v48  ;;  %vm3627_vm7 = vcmp.lt.f32.partialorder %v6437_v25, 0.0  ;;  %v3452_v25 = vmul.f32 0.5, %v6429_v57 }
 0xbd0   : > { %v3476_v50 = vmul.f32 0.3275911, %v3468_v49  ;;  %v6446_v45 = vmul.f32 0.70710677, %v6440_v62  ;;  %v3580_v60 = vsub.f32 0.0, %v3468_v49  ;;  %v3454_v57 = vmul.f32 0.5, %v6440_v62 }
 0xbd1   : > { %v3475_v30 = vmul.f32 0.3275911, %v3467_v46  ;;  %v6449_v34 = vmul.f32 0.70710677, %v6443_v51  ;;  %v4792_v35 = vpop.f32.mrb[50].mxu0  ;;  %v3579_v0 = vsub.f32 0.0, %v3467_v46 }
 0xbd2   : > { %v3484_v61 = vadd.f32 1.0, %v3476_v50  ;;  %v3470_v3 = vand.u32 2147483647, %v6446_v45  ;;  %v3440_v54 = vpop.f32.mrb[51].mxu0  ;;  %v3588_v56 = vmul.f32 %v3580_v60, %v3468_v49  ;;  %v6459_v12 = vadd.f32 %v4792_v35, %v4181_v15 }
 0xbd3   : > { %v3483_v40 = vadd.f32 1.0, %v3475_v30  ;;  %v3469_v6 = vand.u32 2147483647, %v6449_v34  ;;  %v6461_v47 = vadd.f32 %v4181_v15, %v3440_v54  ;;  %v3587_v16 = vmul.f32 %v3579_v0, %v3467_v46 }
 0xbd4   : > { %5336 = vrcp.f32 %v3484_v61  ;;  %v3478_v20 = vmul.f32 0.3275911, %v3470_v3  ;;  %v6467_v52 = vmul.f32 0.70710677, %v6459_v12  ;;  %v3599_v39 = vmul.f32 1.442695, %v3588_v56 }
 0xbd5   : > { %v6453_v11 = vpop.eup %5332  ;;  %5338 = vrcp.f32 %v3483_v40  ;;  %v3477_v53 = vmul.f32 0.3275911, %v3469_v6  ;;  %v6473_v17 = vmul.f32 0.70710677, %v6461_v47  ;;  %v3582_v58 = vsub.f32 0.0, %v3470_v3 }
 0xbd6   : > { %v6455_v23 = vpop.eup %5334  ;;  %v3506_v21 = vmul.f32 1.0614054, %v6453_v11  ;;  %v3486_v29 = vadd.f32 1.0, %v3478_v20  ;;  %v3472_v15 = vand.u32 2147483647, %v6467_v52  ;;  %v3581_v48 = vsub.f32 0.0, %v3469_v6 }
 0xbd7   : > { %v3505_v24 = vmul.f32 1.0614054, %v6455_v23  ;;  %v3485_v8 = vadd.f32 1.0, %v3477_v53  ;;  %v6477_v1 = vand.u32 2147483647, %v6473_v17  ;;  %v3590_v43 = vmul.f32 %v3582_v58, %v3470_v3 }
 0xbd8   : > { %v3514_v2 = vadd.f32 -1.4531521, %v3506_v21  ;;  %5340 = vrcp.f32 %v3486_v29  ;;  %v3480_v46 = vmul.f32 0.3275911, %v3472_v15  ;;  %v3597_v55 = vmul.f32 1.442695, %v3587_v16 }
 0xbd9   : > { %v3513_v31 = vadd.f32 -1.4531521, %v3505_v24  ;;  %5342 = vrcp.f32 %v3485_v8  ;;  %v3479_v61 = vmul.f32 0.3275911, %v6477_v1  ;;  %v3589_v24 = vmul.f32 %v3581_v48, %v3469_v6 }
 0xbda   : > { %v3522_v26 = vmul.f32 %v6453_v11, %v3514_v2  ;;  %5344 = vpow2.f32 %v3595_v59  ;;  %v3488_v54 = vadd.f32 1.0, %v3480_v46  ;;  %v3584_v59 = vsub.f32 0.0, %v3472_v15 }
 0xbdb   : > { %v3521_v33 = vmul.f32 %v6455_v23, %v3513_v31  ;;  %5346 = vpow2.f32 %v3593_v36  ;;  %v3487_v53 = vadd.f32 1.0, %v3479_v61  ;;  %vm3630_vm8 = vcmp.lt.f32.partialorder %v6446_v45, 0.0 }
 0xbdc   : > { %v3530_v18 = vadd.f32 1.4214138, %v3522_v26  ;;  %5348 = vpow2.f32 %v3599_v39  ;;  %v3603_v39 = vmul.f32 1.442695, %v3590_v43  ;;  %vm3629_vm9 = vcmp.lt.f32.partialorder %v6449_v34, 0.0 }
 0xbdd   : > { %v3529_v22 = vadd.f32 1.4214138, %v3521_v33  ;;  %5350 = vrcp.f32 %v3488_v54  ;;  %vm3632_vm10 = vcmp.lt.f32.partialorder %v6467_v52, 0.0  ;;  %vm3631_vm11 = vcmp.lt.f32.partialorder %v6473_v17, 0.0  ;;  %v4190_v52 = vld [vmem:[%s6674_s17] ss:$0 sm:$0xff] }
 0xbde   : > { %v6479_v49 = vpop.eup %5336  ;;  %v3538_v14 = vmul.f32 %v6453_v11, %v3530_v18  ;;  %5352 = vrcp.f32 %v3487_v53 }
 0xbdf   : > { %v6482_v50 = vpop.eup %5338  ;;  %v3537_v42 = vmul.f32 %v6455_v23, %v3529_v22  ;;  %v3508_v30 = vmul.f32 1.0614054, %v6479_v49  ;;  %5354 = vpow2.f32 %v3597_v55 }
 0xbe0   : > { %v3546_v35 = vadd.f32 -0.28449672, %v3538_v14  ;;  %v3507_v40 = vmul.f32 1.0614054, %v6482_v50  ;;  %5356 = vpow2.f32 %v3603_v39 }
 0xbe1   : > { %v3545_v60 = vadd.f32 -0.28449672, %v3537_v42  ;;  %v3516_v20 = vadd.f32 -1.4531521, %v3508_v30  ;;  %v3601_v42 = vmul.f32 1.442695, %v3589_v24 }
 0xbe2   : > { %v6488_v21 = vpop.eup %5340  ;;  %v3554_v28 = vmul.f32 %v6453_v11, %v3546_v35  ;;  %v3515_v29 = vadd.f32 -1.4531521, %v3507_v40 }
 0xbe3   : > { %v6491_v0 = vpop.eup %5342  ;;  %v3553_v8 = vmul.f32 %v6455_v23, %v3545_v60  ;;  %v3524_v2 = vmul.f32 %v6479_v49, %v3516_v20  ;;  %v3510_v56 = vmul.f32 1.0614054, %v6488_v21  ;;  %v3583_v20 = vsub.f32 0.0, %v6477_v1 }
 0xbe4   : > { %v3562_v31 = vadd.f32 0.2548296, %v3554_v28  ;;  %v3523_v3 = vmul.f32 %v6482_v50, %v3515_v29  ;;  %v3509_v26 = vmul.f32 1.0614054, %v6491_v0  ;;  %v5345_v58 = vpop.eup %5344  ;;  %5358 = vpow2.f32 %v3601_v42 }
 0xbe5   : > { %v3561_v36 = vadd.f32 0.2548296, %v3553_v8  ;;  %v3532_v6 = vadd.f32 1.4214138, %v3524_v2  ;;  %v3518_v33 = vadd.f32 -1.4531521, %v3510_v56  ;;  %v5347_v30 = vpop.eup %5346 }
 0xbe6   : > { %v3570_v16 = vmul.f32 %v6453_v11, %v3562_v31  ;;  %v3531_v18 = vadd.f32 1.4214138, %v3523_v3  ;;  %v3517_v22 = vadd.f32 -1.4531521, %v3509_v26  ;;  %v3592_v11 = vmul.f32 %v3584_v59, %v3472_v15  ;;  %v5349_v43 = vpop.eup %5348 }
 0xbe7   : > { %v3569_v14 = vmul.f32 %v6455_v23, %v3561_v36  ;;  %v3540_v48 = vmul.f32 %v6479_v49, %v3532_v6  ;;  %v3526_v46 = vmul.f32 %v6488_v21, %v3518_v33  ;;  %v6509_v2 = vpop.eup %5350  ;;  %v3591_v6 = vmul.f32 %v3583_v20, %v6477_v1 }
 0xbe8   : > { %v3610_v61 = vmul.f32 %v5345_v58, %v3570_v16  ;;  %v3539_v55 = vmul.f32 %v6482_v50, %v3531_v18  ;;  %v3525_v35 = vmul.f32 %v6491_v0, %v3517_v22  ;;  %v3607_v31 = vmul.f32 1.442695, %v3592_v11  ;;  %v6514_v33 = vpop.eup %5352 }
 0xbe9   : > { %v3609_v40 = vmul.f32 %v5347_v30, %v3569_v14  ;;  %v3548_v54 = vadd.f32 -0.28449672, %v3540_v48  ;;  %v3534_v60 = vadd.f32 1.4214138, %v3526_v46  ;;  %v3512_v22 = vmul.f32 1.0614054, %v6509_v2  ;;  %v5355_v58 = vpop.eup %5354 }
 0xbea   : > { %v3618_v53 = vsub.f32 1.0, %v3610_v61  ;;  %v3547_v23 = vadd.f32 -0.28449672, %v3539_v55  ;;  %v3533_v28 = vadd.f32 1.4214138, %v3525_v35  ;;  %5360 = vpow2.f32 %v3607_v31 }
 0xbeb   : > { %v3617_v29 = vsub.f32 1.0, %v3609_v40  ;;  %v3556_v24 = vmul.f32 %v6479_v49, %v3548_v54  ;;  %v3542_v8 = vmul.f32 %v6488_v21, %v3534_v60  ;;  %v3520_v9 = vadd.f32 -1.4531521, %v3512_v22 }
 0xbec   : > { %v3634_v56 = vsub.f32 0.0, %v3618_v53  ;;  %v3555_v15 = vmul.f32 %v6482_v50, %v3547_v23  ;;  %v3541_v59 = vmul.f32 %v6491_v0, %v3533_v28  ;;  %v3511_v11 = vmul.f32 1.0614054, %v6514_v33  ;;  %v5357_v28 = vpop.eup %5356 }
 0xbed   : > { %v3633_v3 = vsub.f32 0.0, %v3617_v29  ;;  %v3564_v26 = vadd.f32 0.2548296, %v3556_v24  ;;  %v3550_v36 = vadd.f32 -0.28449672, %v3542_v8  ;;  %v3528_v20 = vmul.f32 %v6509_v2, %v3520_v9 }
 0xbee   : > { %v3642_v16 = vsel %vm3626_vm4, %v3634_v56, %v3618_v53  ;;  %v3563_v18 = vadd.f32 0.2548296, %v3555_v15  ;;  %v3549_v39 = vadd.f32 -0.28449672, %v3541_v59  ;;  %v3605_v40 = vmul.f32 1.442695, %v3591_v6 }
 0xbef   : > { %v3650_v14 = vadd.f32 1.0, %v3642_v16  ;;  %v3641_v48 = vsel %vm3625_vm5, %v3633_v3, %v3617_v29  ;;  %v3572_v46 = vmul.f32 %v6479_v49, %v3564_v26  ;;  %v3558_v42 = vmul.f32 %v6488_v21, %v3550_v36 }
 0xbf0   : > { %v3649_v30 = vadd.f32 1.0, %v3641_v48  ;;  %v3571_v1 = vmul.f32 %v6482_v50, %v3563_v18  ;;  %v3557_v61 = vmul.f32 %v6491_v0, %v3549_v39  ;;  %v3519_v50 = vadd.f32 -1.4531521, %v3511_v11 }
 0xbf1   : > { %v3612_v55 = vmul.f32 %v5349_v43, %v3572_v46  ;;  %v3566_v35 = vadd.f32 0.2548296, %v3558_v42  ;;  %v3658_v49 = vmul.f32 %v3650_v14, %v6463_v32  ;;  %v3536_v24 = vadd.f32 1.4214138, %v3528_v20 }
 0xbf2   : > { %v3657_v54 = vmul.f32 %v3649_v30, %v6469_v27  ;;  %v3611_v60 = vmul.f32 %v5355_v58, %v3571_v1  ;;  %v3565_v5 = vadd.f32 0.2548296, %v3557_v61  ;;  %v5359_v27 = vpop.eup %5358  ;;  %v3527_v15 = vmul.f32 %v6514_v33, %v3519_v50 }
 0xbf3   : > { %v3620_v53 = vsub.f32 1.0, %v3612_v55  ;;  %v3574_v23 = vmul.f32 %v6488_v21, %v3566_v35  ;;  %v3544_v38 = vmul.f32 %v6509_v2, %v3536_v24  ;;  %5362 = vpow2.f32 %v3605_v40 }
 0xbf4   : > { %v3619_v43 = vsub.f32 1.0, %v3611_v60  ;;  %v3573_v29 = vmul.f32 %v6491_v0, %v3565_v5  ;;  %4809 = vmatprep.mubr.msk.f32.mxu0 %vm1163_vm3, %v3657_v54  ;;  %v3535_v0 = vadd.f32 1.4214138, %v3527_v15  ;;  %v3451_v31 = vmul.f32 0.5, %v6431_v19  ;;  %v5361_v11 = vpop.eup %5360 }
 0xbf5   : > { %v3636_v8 = vsub.f32 0.0, %v3620_v53  ;;  %v3614_v56 = vmul.f32 %v5357_v28, %v3574_v23  ;;  %4810 = vmatmul.mubr.msk.f32.vlgmr.msra.gmra.mrb[52].mxu0 %vm1163_vm3, %v3658_v49  ;;  %v3552_v16 = vadd.f32 -0.28449672, %v3544_v38  ;;  %v3453_v9 = vmul.f32 0.5, %v6443_v51 }
 0xbf6   : > { %v3635_v32 = vsub.f32 0.0, %v3619_v43  ;;  %v3613_v21 = vmul.f32 %v5359_v27, %v3573_v29  ;;  %v3543_v22 = vmul.f32 %v6514_v33, %v3535_v0 }
 0xbf7   : > { %v3644_v59 = vsel %vm3628_vm6, %v3636_v8, %v3620_v53  ;;  %v3622_v3 = vsub.f32 1.0, %v3614_v56  ;;  %v3560_v14 = vmul.f32 %v6509_v2, %v3552_v16 }
 0xbf8   : > { %v3652_v26 = vadd.f32 1.0, %v3644_v59  ;;  %v3643_v36 = vsel %vm3627_vm7, %v3635_v32, %v3619_v43  ;;  %v3621_v6 = vsub.f32 1.0, %v3613_v21  ;;  %v3551_v42 = vadd.f32 -0.28449672, %v3543_v22 }
 0xbf9   : > { %v3651_v18 = vadd.f32 1.0, %v3643_v36  ;;  %v3638_v39 = vsub.f32 0.0, %v3622_v3  ;;  %v3568_v19 = vadd.f32 0.2548296, %v3560_v14  ;;  %v3455_v43 = vmul.f32 0.5, %v6461_v47 }
 0xbfa   : > { %v3637_v58 = vsub.f32 0.0, %v3621_v6  ;;  %v3660_v30 = vmul.f32 %v3652_v26, %v3452_v25  ;;  %v3559_v35 = vmul.f32 %v6514_v33, %v3551_v42 }
 0xbfb   : > { %v3659_v48 = vmul.f32 %v3651_v18, %v3451_v31  ;;  %v3646_v46 = vsel %vm3630_vm8, %v3638_v39, %v3622_v3  ;;  %v3576_v45 = vmul.f32 %v6509_v2, %v3568_v19 }
 0xbfc   : > { %v3654_v1 = vadd.f32 1.0, %v3646_v46  ;;  %v3645_v61 = vsel %vm3629_vm9, %v3637_v58, %v3621_v6  ;;  %v3567_v40 = vadd.f32 0.2548296, %v3559_v35 }
 0xbfd   : > { %v3653_v55 = vadd.f32 1.0, %v3645_v61  ;;  %4812 = vmatprep.mubr.msk.f32.mxu0 %vm1163_vm3, %v3659_v48  ;;  %v3616_v60 = vmul.f32 %v5361_v11, %v3576_v45  ;;  %v5363_v5 = vpop.eup %5362 }
 0xbfe   : > { %4813 = vmatmul.mubr.msk.f32.gmra.mrb[54].mxu0 %vm1163_vm3, %v3660_v30  ;;  %v3662_v54 = vmul.f32 %v3654_v1, %v3454_v57  ;;  %v3575_v20 = vmul.f32 %v6514_v33, %v3567_v40  ;;  %v3456_v33 = vmul.f32 0.5, %v6459_v12 }
 0xbff   : > { %v3661_v34 = vmul.f32 %v3653_v55, %v3453_v9  ;;  %v3624_v51 = vsub.f32 1.0, %v3616_v60 }
 0xc00   : > { %v3615_v49 = vmul.f32 %v5363_v5, %v3575_v20 }
 0xc01   : > { %4815 = vmatprep.mubr.msk.f32.mxu0 %vm1163_vm3, %v3661_v34  ;;  %v3640_v53 = vsub.f32 0.0, %v3624_v51 }
 0xc02   : > { %4816 = vmatmul.mubr.msk.f32.gmra.mrb[56].mxu0 %vm1163_vm3, %v3662_v54  ;;  %v3623_v62 = vsub.f32 1.0, %v3615_v49 }
 0xc03   : > { %v3648_v2 = vsel %vm3632_vm10, %v3640_v53, %v3624_v51 }
 0xc04   : > { %v3639_v23 = vsub.f32 0.0, %v3623_v62  ;;  %v3656_v50 = vadd.f32 1.0, %v3648_v2 }
 0xc06   : > { %v3647_v28 = vsel %vm3631_vm11, %v3639_v23, %v3623_v62  ;;  %v3664_v27 = vmul.f32 %v3656_v50, %v3456_v33 }
 0xc07   : > { %v3655_v29 = vadd.f32 1.0, %v3647_v28 }
 0xc09   : > { %v3663_v24 = vmul.f32 %v3655_v29, %v3455_v43 }
 0xc0b   : > { %4818 = vmatprep.mubr.msk.f32.mxu0 %vm1163_vm3, %v3663_v24 }
 0xc0c   : > { %4819 = vmatmul.mubr.msk.f32.gmra.mrb[58].mxu0 %vm1163_vm3, %v3664_v27 }
 0xcc8   : > { %v4811_v8 = vpop.f32.mrb[52].mxu0 }
 0xcc9   : > { %v3776_v56 = vadd.f32 %v4811_v8, %v4190_v52  ;;  %v3770_v17 = vpop.f32.mrb[53].mxu0 }
 0xcca   : > { %v3771_v15 = vadd.f32 %v4190_v52, %v3770_v17 }
 0xccb   : > { %v3810_v32 = vadd.f32 %v3776_v56, %v6360_v41 }
 0xccc   : > { %v3809_v47 = vadd.f32 %v3771_v15, %v6358_v44 }
 0xccd   : > { %v3822_v12 = vsel %vm611_vm0, %v3810_v32, 0.0 }
 0xcce   : > { %3823 = vadd.xlane.f32.xlu1 %v3822_v12  ;;  %v3819_v21 = vsel %vm611_vm0, %v3809_v47, 0.0 }
 0xccf   : > { %3820 = vadd.xlane.f32.xlu0 %v3819_v21 }
 0xcd1   : > { %v4814_v38 = vpop.f32.mrb[54].mxu0 }
 0xcd2   : > { %v3786_v59 = vadd.f32 %v4814_v38, %v4190_v52  ;;  %v3780_v3 = vpop.f32.mrb[55].mxu0 }
 0xcd3   : > { %v3781_v0 = vadd.f32 %v4190_v52, %v3780_v3 }
 0xcd4   : > { %v3812_v26 = vadd.f32 %v3786_v59, %v6372_v7 }
 0xcd5   : > { %v3811_v36 = vadd.f32 %v3781_v0, %v6369_v13  ;;  %v4817_v6 = vpop.f32.mrb[56].mxu0 }
 0xcd6   : > { %v3796_v16 = vadd.f32 %v4817_v6, %v4190_v52  ;;  %v3790_v31 = vpop.f32.mrb[57].mxu0  ;;  %v3828_v41 = vsel %vm611_vm0, %v3812_v26, 0.0 }
 0xcd7   : > { %v3791_v44 = vadd.f32 %v4190_v52, %v3790_v31  ;;  %3829 = vadd.xlane.f32.xlu1 %v3828_v41  ;;  %v3825_v18 = vsel %vm611_vm0, %v3811_v36, 0.0 }
 0xcd8   : > { %v3814_v39 = vadd.f32 %v3796_v16, %v6382_v10  ;;  %3826 = vadd.xlane.f32.xlu0 %v3825_v18 }
 0xcd9   : > { %v3813_v22 = vadd.f32 %v3791_v44, %v6380_v37 }
 0xcda   : > { %v3834_v25 = vsel %vm611_vm0, %v3814_v39, 0.0 }
 0xcdb   : > { %3835 = vadd.xlane.f32.xlu1 %v3834_v25  ;;  %v3831_v7 = vsel %vm611_vm0, %v3813_v22, 0.0 }
 0xcdc   : > { %3832 = vadd.xlane.f32.xlu0 %v3831_v7 }
 0xcdf   : > { %v4820_v13 = vpop.f32.mrb[58].mxu0 }
 0xce0   : > { %v3806_v58 = vadd.f32 %v4820_v13, %v4190_v52  ;;  %v3800_v14 = vpop.f32.mrb[59].mxu0  ;;  %v4199_v13 = vld [vmem:[%s6669_s12] ss:$0 sm:$0xff] }
 0xce1   : > { %v3801_v48 = vadd.f32 %v4190_v52, %v3800_v14 }
 0xce2   : > { %v3816_v46 = vadd.f32 %v3806_v58, %v6392_v63 }
 0xce3   : > { %v3815_v42 = vadd.f32 %v3801_v48, %v6388_v4 }
 0xce4   : > { %v3840_v30 = vsel %vm611_vm0, %v3816_v46, 0.0 }
 0xce5   : > { %3841 = vadd.xlane.f32.xlu1 %v3840_v30  ;;  %v3837_v10 = vsel %vm611_vm0, %v3815_v42, 0.0 }
 0xce6   : > { %3838 = vadd.xlane.f32.xlu0 %v3837_v10 }
 0xd5b   : > { %v3824_v37 = vpop.xlane.xlu1 %3823 }
 0xd5c   : > { %v3844_v1 = vmul.f32 0.03125, %v3824_v37  ;;  %v3821_v61 = vpop.xlane.xlu0 %3820 }
 0xd5d   : > { %v3843_v19 = vmul.f32 0.03125, %v3821_v61 }
 0xd5e   : > { %v6577_v9 = vsub.f32 %v3810_v32, %v3844_v1 }
 0xd5f   : > { %v6579_v55 = vsub.f32 %v3809_v47, %v3843_v19 }
 0xd60   : > { %v3860_v35 = vmul.f32 %v6577_v9, %v6577_v9 }
 0xd61   : > { %v3859_v4 = vmul.f32 %v6579_v55, %v6579_v55 }
 0xd62   : > { %v3870_v63 = vsel %vm611_vm0, %v3860_v35, 0.0 }
 0xd63   : > { %3871 = vadd.xlane.f32.xlu1 %v3870_v63  ;;  %v3867_v57 = vsel %vm611_vm0, %v3859_v4, 0.0 }
 0xd64   : > { %v3830_v45 = vpop.xlane.xlu1 %3829  ;;  %3868 = vadd.xlane.f32.xlu0 %v3867_v57 }
 0xd65   : > { %v3846_v11 = vmul.f32 0.03125, %v3830_v45  ;;  %v3827_v34 = vpop.xlane.xlu0 %3826 }
 0xd66   : > { %v3845_v40 = vmul.f32 0.03125, %v3827_v34 }
 0xd67   : > { %v6587_v54 = vsub.f32 %v3812_v26, %v3846_v11 }
 0xd68   : > { %v6589_v60 = vsub.f32 %v3811_v36, %v3845_v40  ;;  %v3836_v5 = vpop.xlane.xlu1 %3835 }
 0xd69   : > { %v3848_v20 = vmul.f32 0.03125, %v3836_v5  ;;  %v3833_v51 = vpop.xlane.xlu0 %3832  ;;  %v3862_v49 = vmul.f32 %v6587_v54, %v6587_v54 }
 0xd6a   : > { %v3847_v53 = vmul.f32 0.03125, %v3833_v51  ;;  %v3861_v62 = vmul.f32 %v6589_v60, %v6589_v60 }
 0xd6b   : > { %v6595_v2 = vsub.f32 %v3814_v39, %v3848_v20  ;;  %v3876_v23 = vsel %vm611_vm0, %v3862_v49, 0.0 }
 0xd6c   : > { %v6598_v50 = vsub.f32 %v3813_v22, %v3847_v53  ;;  %3877 = vadd.xlane.f32.xlu1 %v3876_v23  ;;  %v3873_v28 = vsel %vm611_vm0, %v3861_v62, 0.0 }
 0xd6d   : > { %3874 = vadd.xlane.f32.xlu0 %v3873_v28  ;;  %v3864_v43 = vmul.f32 %v6595_v2, %v6595_v2 }
 0xd6e   : > { %v3863_v29 = vmul.f32 %v6598_v50, %v6598_v50 }
 0xd6f   : > { %v3882_v33 = vsel %vm611_vm0, %v3864_v43, 0.0 }
 0xd70   : > { %3883 = vadd.xlane.f32.xlu1 %v3882_v33  ;;  %v3879_v24 = vsel %vm611_vm0, %v3863_v29, 0.0 }
 0xd71   : > { %3880 = vadd.xlane.f32.xlu0 %v3879_v24 }
 0xd72   : > { %v3842_v27 = vpop.xlane.xlu1 %3841 }
 0xd73   : > { %v3850_v52 = vmul.f32 0.03125, %v3842_v27  ;;  %v3839_v8 = vpop.xlane.xlu0 %3838 }
 0xd74   : > { %v3849_v56 = vmul.f32 0.03125, %v3839_v8 }
 0xd75   : > { %v6607_v17 = vsub.f32 %v3816_v46, %v3850_v52 }
 0xd76   : > { %v6609_v15 = vsub.f32 %v3815_v42, %v3849_v56  ;;  %v4200_v42 = vld [vmem:[%s6670_s13] ss:$0 sm:$0xff] }
 0xd77   : > { %v3866_v32 = vmul.f32 %v6607_v17, %v6607_v17 }
 0xd78   : > { %v3865_v47 = vmul.f32 %v6609_v15, %v6609_v15 }
 0xd79   : > { %v3888_v12 = vsel %vm611_vm0, %v3866_v32, 0.0 }
 0xd7a   : > { %3889 = vadd.xlane.f32.xlu1 %v3888_v12  ;;  %v3885_v21 = vsel %vm611_vm0, %v3865_v47, 0.0 }
 0xd7b   : > { %3886 = vadd.xlane.f32.xlu0 %v3885_v21 }
 0xdf0   : > { %v3872_v38 = vpop.xlane.xlu1 %3871 }
 0xdf1   : > { %v3892_v59 = vmul.f32 0.03125, %v3872_v38  ;;  %v3869_v3 = vpop.xlane.xlu0 %3868 }
 0xdf2   : > { %v3891_v0 = vmul.f32 0.03125, %v3869_v3 }
 0xdf3   : > { %v3900_v26 = vadd.f32 1e-05, %v3892_v59 }
 0xdf4   : > { %v3899_v36 = vadd.f32 1e-05, %v3891_v0 }
 0xdf5   : > { %5364 = vrsqrt.f32 %v3900_v26 }
 0xdf6   : > { %5366 = vrsqrt.f32 %v3899_v36 }
 0xdf9   : > { %v3878_v6 = vpop.xlane.xlu1 %3877 }
 0xdfa   : > { %v3894_v16 = vmul.f32 0.03125, %v3878_v6  ;;  %v3875_v31 = vpop.xlane.xlu0 %3874 }
 0xdfb   : > { %v3893_v41 = vmul.f32 0.03125, %v3875_v31 }
 0xdfc   : > { %v3902_v44 = vadd.f32 1e-05, %v3894_v16 }
 0xdfd   : > { %v3901_v18 = vadd.f32 1e-05, %v3893_v41  ;;  %v3884_v39 = vpop.xlane.xlu1 %3883 }
 0xdfe   : > { %5368 = vrsqrt.f32 %v3902_v44  ;;  %v3896_v22 = vmul.f32 0.03125, %v3884_v39  ;;  %v3881_v25 = vpop.xlane.xlu0 %3880 }
 0xdff   : > { %v5365_v7 = vpop.eup %5364  ;;  %5370 = vrsqrt.f32 %v3901_v18  ;;  %v3895_v58 = vmul.f32 0.03125, %v3881_v25 }
 0xe00   : > { %v5367_v14 = vpop.eup %5366  ;;  %v3916_v48 = vmul.f32 %v5365_v7, %v6577_v9  ;;  %v3904_v46 = vadd.f32 1e-05, %v3896_v22 }
 0xe01   : > { %v3915_v30 = vmul.f32 %v5367_v14, %v6579_v55  ;;  %v3903_v10 = vadd.f32 1e-05, %v3895_v58 }
 0xe02   : > { %v3930_v37 = vmul.f32 %v4199_v13, %v3916_v48  ;;  %5372 = vrsqrt.f32 %v3904_v46 }
 0xe03   : > { %v3929_v1 = vmul.f32 %v4199_v13, %v3915_v30  ;;  %5374 = vrsqrt.f32 %v3903_v10 }
 0xe04   : > { %v3944_v61 = vadd.f32 %v4200_v42, %v3930_v37 }
 0xe05   : > { %v3943_v19 = vadd.f32 %v4200_v42, %v3929_v1 }
 0xe06   : > { %3952 = vst.msk [vmem:[%s6630_s21 + $0x8] sm:$0xff] %vm611_vm0, %v3944_v61 }
 0xe07   : > { %3951 = vst.msk [vmem:[%s6630_s21] sm:$0xff] %vm611_vm0, %v3943_v19  ;;  %v3890_v63 = vpop.xlane.xlu1 %3889 }
 0xe08   : > { %v5369_v9 = vpop.eup %5368  ;;  %v3898_v45 = vmul.f32 0.03125, %v3890_v63  ;;  %v3887_v11 = vpop.xlane.xlu0 %3886 }
 0xe09   : > { %v5371_v55 = vpop.eup %5370  ;;  %v3918_v35 = vmul.f32 %v5369_v9, %v6587_v54  ;;  %v3897_v5 = vmul.f32 0.03125, %v3887_v11 }
 0xe0a   : > { %v3917_v4 = vmul.f32 %v5371_v55, %v6589_v60  ;;  %v3906_v53 = vadd.f32 1e-05, %v3898_v45 }
 0xe0b   : > { %v3932_v57 = vmul.f32 %v4199_v13, %v3918_v35  ;;  %v3905_v23 = vadd.f32 1e-05, %v3897_v5 }
 0xe0c   : > { %v5373_v34 = vpop.eup %5372  ;;  %v3931_v40 = vmul.f32 %v4199_v13, %v3917_v4  ;;  %5376 = vrsqrt.f32 %v3906_v53 }
 0xe0d   : > { %v5375_v20 = vpop.eup %5374  ;;  %v3946_v51 = vadd.f32 %v4200_v42, %v3932_v57  ;;  %v3920_v49 = vmul.f32 %v5373_v34, %v6595_v2  ;;  %5378 = vrsqrt.f32 %v3905_v23 }
 0xe0e   : > { %v3945_v62 = vadd.f32 %v4200_v42, %v3931_v40  ;;  %v3919_v54 = vmul.f32 %v5375_v20, %v6598_v50 }
 0xe0f   : > { %3954 = vst.msk [vmem:[%s6630_s21 + $0x18] sm:$0xff] %vm611_vm0, %v3946_v51  ;;  %v3934_v60 = vmul.f32 %v4199_v13, %v3920_v49 }
 0xe10   : > { %3953 = vst.msk [vmem:[%s6630_s21 + $0x10] sm:$0xff] %vm611_vm0, %v3945_v62  ;;  %v3933_v28 = vmul.f32 %v4199_v13, %v3919_v54 }
 0xe11   : > { %v3948_v43 = vadd.f32 %v4200_v42, %v3934_v60 }
 0xe12   : > { %v3947_v29 = vadd.f32 %v4200_v42, %v3933_v28 }
 0xe13   : > { %3956 = vst.msk [vmem:[%s6630_s21 + $0x28] sm:$0xff] %vm611_vm0, %v3948_v43 }
 0xe14   : > { %3955 = vst.msk [vmem:[%s6630_s21 + $0x20] sm:$0xff] %vm611_vm0, %v3947_v29 }
 0xe16   : > { %v5377_v2 = vpop.eup %5376 }
 0xe17   : > { %v5379_v33 = vpop.eup %5378  ;;  %v3922_v50 = vmul.f32 %v5377_v2, %v6607_v17 }
 0xe18   : > { %v3921_v24 = vmul.f32 %v5379_v33, %v6609_v15 }
 0xe19   : > { %v3936_v27 = vmul.f32 %v4199_v13, %v3922_v50 }
 0xe1a   : > { %v3935_v52 = vmul.f32 %v4199_v13, %v3921_v24 }
 0xe1b   : > { %v3950_v8 = vadd.f32 %v4200_v42, %v3936_v27 }
 0xe1c   : > { %v3949_v56 = vadd.f32 %v4200_v42, %v3935_v52 }
 0xe1d   : > { %3958 = vst.msk [vmem:[%s6630_s21 + $0x38] sm:$0xff] %vm611_vm0, %v3950_v8 }
 0xe1e   : > { %3957 = vst.msk [vmem:[%s6630_s21 + $0x30] sm:$0xff] %vm611_vm0, %v3949_v56 }
 0xe1f PF: > { %s28_s27 = sadd.s32 1, %s5394_s27  }
 0xe20   : > { %p25_p4 = scmp.ge.s32.totalorder %s28_s27, 4  }
 0xe22   :  { %27 = sbr.rel (!%p25_p4) target bundleno = 4 (0x4), region = 122 }

</bundles_post_ra>
